<compile_context>
chip_gen: v7x
topology: tpu7x:2x2x1
jax: 0.10.0
libtpu: 0.0.40
codegen_flags: <defaults>
</compile_context>

<pallas_src>
import functools

import jax
import jax.numpy as jnp
from jax.experimental import pallas as pl
from jax.experimental.pallas import tpu as pltpu

# Small, decoder-consistent sizes.
B = 8      # batch
V = 256    # params.output_dim (vocab)
E = 32     # params.embed_dim
H = 128    # params.hidden_dim
L = 2      # params.n_layer (kernel is specialized for 2 layers)
T = 8      # decode steps fused into one kernel launch (demo)


def _lstm_cell(gates, c_prev):
    """PyTorch gate order (i, f, g, o) along the 4H axis; all f32."""
    i_g = jax.nn.sigmoid(gates[:, 0 * H:1 * H])
    f_g = jax.nn.sigmoid(gates[:, 1 * H:2 * H])
    g_g = jnp.tanh(gates[:, 2 * H:3 * H])
    o_g = jax.nn.sigmoid(gates[:, 3 * H:4 * H])
    c_new = f_g * c_prev + i_g * g_g
    h_new = o_g * jnp.tanh(c_new)
    return h_new, c_new


def decoder_kernel(ids_ref,               # VMEM [T*B, 1] int32
                   hin_ref, cin_ref,      # VMEM [L, B, H] f32
                   tbl0_ref,              # VMEM [V, 4H]  bf16 (emb @ W_ih0, pre-fused)
                   whh0_ref,              # VMEM [H, 4H]  bf16
                   b0_ref,                # VMEM [1, 4H]  f32  (b_ih0 + b_hh0)
                   wih1_ref, whh1_ref,    # VMEM [H, 4H]  bf16 each
                   b1_ref,                # VMEM [B, 4H]  f32  (pre-broadcast)
                   wfc_ref, bfc_ref,      # VMEM [H, V]   bf16, [1, V] f32
                   pred_ref,              # VMEM [T*B, V] f32  (output)
                   hout_ref, cout_ref,    # VMEM [L, B, H] f32 (outputs)
                   x0_ref,                # VMEM scratch [T*B, 4H] f32
                   hbuf_ref,              # VMEM scratch [T*B, H]  f32
                   *, n_steps):
    n_rows = n_steps * B

    # ---- hoisted embedding + layer-0 input projection (+ bias), all steps ----
    ids = ids_ref[...]                                              # [T*B, 1]
    iota = jax.lax.broadcasted_iota(jnp.int32, (n_rows, V), 1)
    one_hot = (iota == ids).astype(jnp.bfloat16)                    # [T*B, V]
    x0_ref[...] = (jnp.dot(one_hot, tbl0_ref[...],
                           preferred_element_type=jnp.float32)
                   + b0_ref[...])                                   # [T*B, 4H]
    # TODO(synk): nn.Dropout is identity in eval mode; training-mode dropout on
    # the embedded inputs / inter-layer activations is not implemented (and the
    # emb@W_ih0 pre-fusion would have to be undone if it were added).

    b1 = b1_ref[...]                                                # [B, 4H] f32

    # ---- recurrence: h/c live in registers (4 x [8,128] f32 = 4 vregs) ----
    def step(t, carry):
        h0, c0, h1, c1 = carry
        row = pl.multiple_of(t * B, B)
        # Layer 0: input contribution precomputed; one K=H matmul on the MXU.
        g0 = x0_ref[pl.ds(row, B), :] + jnp.dot(
            h0.astype(jnp.bfloat16), whh0_ref[...],
            preferred_element_type=jnp.float32)                     # [B, 4H]
        h0n, c0n = _lstm_cell(g0, c0)
        # Layer 1: split matmuls (no lane concat); bias pre-broadcast [B, 4H].
        g1 = (jnp.dot(h0n.astype(jnp.bfloat16), wih1_ref[...],
                      preferred_element_type=jnp.float32)
              + jnp.dot(h1.astype(jnp.bfloat16), whh1_ref[...],
                        preferred_element_type=jnp.float32)
              + b1)                                                 # [B, 4H]
        h1n, c1n = _lstm_cell(g1, c1)
        hbuf_ref[pl.ds(row, B), :] = h1n
        return h0n, c0n, h1n, c1n

    init = (hin_ref[0], cin_ref[0], hin_ref[1], cin_ref[1])
    h0f, c0f, h1f, c1f = jax.lax.fori_loop(0, n_steps, step, init, unroll=True)

    # ---- hoisted fc projection: one M = T*B matmul ----
    pred_ref[...] = (jnp.dot(hbuf_ref[...].astype(jnp.bfloat16), wfc_ref[...],
                             preferred_element_type=jnp.float32)
                     + bfc_ref[...])

    hout_ref[0] = h0f
    hout_ref[1] = h1f
    cout_ref[0] = c0f
    cout_ref[1] = c1f


def prepare_params(emb, w_ih0, w_hh0, b_ih0, b_hh0,
                   w_ih1, w_hh1, b_ih1, b_hh1, w_fc, b_fc):
    """PyTorch-layout weights -> fused, bf16, MXU-friendly kernel params."""
    emb_b = emb.astype(jnp.bfloat16)
    # Pre-fuse the embedding table with the layer-0 input weights (dropout is
    # the eval-mode identity, so emb(x) @ W_ih0^T == one_hot(x) @ (emb @ W_ih0^T)).
    tbl0 = jnp.dot(emb_b, w_ih0.T.astype(jnp.bfloat16),
                   preferred_element_type=jnp.float32).astype(jnp.bfloat16)  # [V, 4H]
    whh0 = w_hh0.T.astype(jnp.bfloat16)                                      # [H, 4H]
    b0 = (b_ih0 + b_hh0).reshape(1, 4 * H).astype(jnp.float32)
    wih1 = w_ih1.T.astype(jnp.bfloat16)                                      # [H, 4H]
    whh1 = w_hh1.T.astype(jnp.bfloat16)                                      # [H, 4H]
    b1 = jnp.broadcast_to((b_ih1 + b_hh1).reshape(1, 4 * H),
                          (B, 4 * H)).astype(jnp.float32)                    # [B, 4H]
    wfc = w_fc.T.astype(jnp.bfloat16)                                        # [H, V]
    bfc = b_fc.reshape(1, V).astype(jnp.float32)
    return tbl0, whh0, b0, wih1, whh1, b1, wfc, bfc


def decoder_decode(targets, hidden, cell, params):
    """Run T chained Decoder.forward steps (teacher forcing) in ONE pallas_call.

    targets: [T, B] int token ids; hidden/cell: [L, B, H] f32.
    Returns (predictions [T, B, V] f32, hidden [L, B, H], cell [L, B, H]).
    """
    tbl0, whh0, b0, wih1, whh1, b1, wfc, bfc = params
    t_steps, b_ = targets.shape
    assert b_ == B
    n_rows = t_steps * B
    ids = targets.astype(jnp.int32).reshape(n_rows, 1)

    flops = (2 * n_rows * V * 4 * H               # hoisted emb·W_ih0 gather-matmul
             + t_steps * 3 * 2 * B * H * 4 * H    # 3 recurrent matmuls per step
             + 2 * n_rows * H * V)                # hoisted fc
    transcendentals = 5 * L * B * H * t_steps
    bytes_accessed = (tbl0.size * 2
                      + (whh0.size + wih1.size + whh1.size + wfc.size) * 2
                      + (b0.size + b1.size + bfc.size) * 4
                      + 2 * 2 * L * B * H * 4     # h/c in + out
                      + n_rows * (V * 4 + 4))     # preds out + ids in

    vmem = pl.BlockSpec(memory_space=pltpu.MemorySpace.VMEM)
    kernel = functools.partial(decoder_kernel, n_steps=t_steps)

    preds, h_out, c_out = pl.pallas_call(
        kernel,
        out_shape=(jax.ShapeDtypeStruct((n_rows, V), jnp.float32),
                   jax.ShapeDtypeStruct((L, B, H), jnp.float32),
                   jax.ShapeDtypeStruct((L, B, H), jnp.float32)),
        in_specs=[vmem] * 11,
        out_specs=(vmem, vmem, vmem),
        scratch_shapes=[pltpu.VMEM((n_rows, 4 * H), jnp.float32),   # x0 gate inputs
                        pltpu.VMEM((n_rows, H), jnp.float32)],      # h_L stash
        compiler_params=pltpu.CompilerParams(
            vmem_limit_bytes=16 * 1024 * 1024),
        cost_estimate=pl.CostEstimate(flops=int(flops),
                                      transcendentals=int(transcendentals),
                                      bytes_accessed=int(bytes_accessed)),
    )(ids, hidden, cell, tbl0, whh0, b0, wih1, whh1, b1, wfc, bfc)

    return preds.reshape(t_steps, B, V), h_out, c_out


def decoder_forward(target, hidden, cell, params):
    """Single decode step; mirrors Decoder.forward(target, hidden, cell)."""
    preds, h, c = decoder_decode(target.reshape(1, B).astype(jnp.int32),
                                 hidden, cell, params)
    return preds[0], h, c


def reference_decode(targets, hidden, cell, params):
    """Pure-JAX mirror of the kernel math (same bf16 matmul operands, f32 acc)."""
    tbl0, whh0, b0, wih1, whh1, b1, wfc, bfc = params
    t_steps = targets.shape[0]
    x0_all = tbl0[targets.reshape(-1)].astype(jnp.float32) + b0     # [T*B, 4H]
    h0, c0 = hidden[0], cell[0]
    h1, c1 = hidden[1], cell[1]
    h1_all = []
    for t in range(t_steps):
        g0 = x0_all[t * B:(t + 1) * B] + jnp.dot(
            h0.astype(jnp.bfloat16), whh0, preferred_element_type=jnp.float32)
        h0, c0 = _lstm_cell(g0, c0)
        g1 = (jnp.dot(h0.astype(jnp.bfloat16), wih1,
                      preferred_element_type=jnp.float32)
              + jnp.dot(h1.astype(jnp.bfloat16), whh1,
                        preferred_element_type=jnp.float32)
              + b1)
        h1, c1 = _lstm_cell(g1, c1)
        h1_all.append(h1)
    h_all = jnp.concatenate(h1_all, axis=0)                         # [T*B, H]
    preds = (jnp.dot(h_all.astype(jnp.bfloat16), wfc,
                     preferred_element_type=jnp.float32) + bfc)
    return (preds.reshape(t_steps, B, V),
            jnp.stack([h0, h1]), jnp.stack([c0, c1]))


if __name__ == "__main__":
    key = jax.random.PRNGKey(0)
    ks = jax.random.split(key, 16)
    bound = 1.0 / jnp.sqrt(jnp.float32(H))

    def u(kk, shape):
        return jax.random.uniform(kk, shape, jnp.float32, -bound, bound)

    # Deterministic synthetic parameters in PyTorch layout.
    emb = jax.random.normal(ks[0], (V, E), jnp.float32)             # nn.Embedding(V, E)
    w_ih0 = u(ks[1], (4 * H, E)); w_hh0 = u(ks[2], (4 * H, H))      # LSTM layer 0
    b_ih0 = u(ks[3], (4 * H,));   b_hh0 = u(ks[4], (4 * H,))
    w_ih1 = u(ks[5], (4 * H, H)); w_hh1 = u(ks[6], (4 * H, H))      # LSTM layer 1
    b_ih1 = u(ks[7], (4 * H,));   b_hh1 = u(ks[8], (4 * H,))
    w_fc = u(ks[9], (V, H));      b_fc = u(ks[10], (V,))            # nn.Linear(H, V)

    params = prepare_params(emb, w_ih0, w_hh0, b_ih0, b_hh0,
                            w_ih1, w_hh1, b_ih1, b_hh1, w_fc, b_fc)

    # Inputs: token ids [T, B] (teacher-forced decode), state [L, B, H].
    targets = jax.random.randint(ks[11], (T, B), 0, V, dtype=jnp.int32)
    hidden = jax.random.normal(ks[12], (L, B, H), jnp.float32)
    cell = jax.random.normal(ks[13], (L, B, H), jnp.float32)

    # Fused multi-step decode: single kernel invocation, state in registers.
    preds, h_out, c_out = jax.block_until_ready(
        decoder_decode(targets, hidden, cell, params))
    preds_r, h_r, c_r = reference_decode(targets, hidden, cell, params)
    assert preds.shape == (T, B, V)
    assert h_out.shape == (L, B, H) and c_out.shape == (L, B, H)
    assert jnp.allclose(preds, preds_r, atol=2e-3, rtol=2e-3)
    assert jnp.allclose(h_out, h_r, atol=2e-3, rtol=2e-3)
    assert jnp.allclose(c_out, c_r, atol=2e-3, rtol=2e-3)

    # Single-step API identical to Decoder.forward(target, hidden, cell).
    pred1, h1, c1 = jax.block_until_ready(
        decoder_forward(targets[0], hidden, cell, params))
    pr1, hr1, cr1 = reference_decode(targets[:1], hidden, cell, params)
    assert pred1.shape == (B, V)
    assert jnp.allclose(pred1, pr1[0], atol=2e-3, rtol=2e-3)
    assert jnp.allclose(h1, hr1, atol=2e-3, rtol=2e-3)
    assert jnp.allclose(c1, cr1, atol=2e-3, rtol=2e-3)

    print("KERNEL_OK")
</pallas_src>

<mosaic_0001>
module attributes {stable_mosaic.version = 11 : i64} {
  func.func @decoder_kernel(%arg0: memref<64x1xi32, #tpu.memory_space<vmem>>, %arg1: memref<2x8x128xf32, #tpu.memory_space<vmem>>, %arg2: memref<2x8x128xf32, #tpu.memory_space<vmem>>, %arg3: memref<256x512xbf16, #tpu.memory_space<vmem>>, %arg4: memref<128x512xbf16, #tpu.memory_space<vmem>>, %arg5: memref<1x512xf32, #tpu.memory_space<vmem>>, %arg6: memref<128x512xbf16, #tpu.memory_space<vmem>>, %arg7: memref<128x512xbf16, #tpu.memory_space<vmem>>, %arg8: memref<8x512xf32, #tpu.memory_space<vmem>>, %arg9: memref<128x256xbf16, #tpu.memory_space<vmem>>, %arg10: memref<1x256xf32, #tpu.memory_space<vmem>>, %arg11: memref<64x256xf32, #tpu.memory_space<vmem>>, %arg12: memref<2x8x128xf32, #tpu.memory_space<vmem>>, %arg13: memref<2x8x128xf32, #tpu.memory_space<vmem>>, %arg14: memref<64x512xf32, #tpu.memory_space<vmem>>, %arg15: memref<64x128xf32, #tpu.memory_space<vmem>>) attributes {dimension_semantics = [], scalar_prefetch = 0 : i64, scratch_operands = 2 : i64, tpu.core_type = #tpu.core_type<tc>} {
    %c0 = arith.constant 0 : index
    %c0_0 = arith.constant 0 : index
    %0 = vector.load %arg0[%c0, %c0_0] : memref<64x1xi32, #tpu.memory_space<vmem>>, vector<64x1xi32>
    %1 = tpu.iota {dimensions = array<i32: 1>} : vector<64x256xi32>
    %2 = vector.broadcast %0 : vector<64x1xi32> to vector<64x256xi32>
    %3 = arith.cmpi eq, %1, %2 : vector<64x256xi32>
    %4 = arith.extui %3 : vector<64x256xi1> to vector<64x256xi32>
    %5 = arith.sitofp %4 : vector<64x256xi32> to vector<64x256xf32>
    %6 = arith.truncf %5 : vector<64x256xf32> to vector<64x256xbf16>
    %c0_1 = arith.constant 0 : index
    %c0_2 = arith.constant 0 : index
    %7 = vector.load %arg3[%c0_1, %c0_2] : memref<256x512xbf16, #tpu.memory_space<vmem>>, vector<256x512xbf16>
    %cst = arith.constant dense<0.000000e+00> : vector<64x512xf32>
    %8 = tpu.matmul %6, %7, %cst {dimension_numbers = #tpu.dot_dimension_numbers<[1], [0], [0], [1], [0, 0, 1, 1], [], []>} : vector<64x256xbf16>, vector<256x512xbf16>, vector<64x512xf32> -> vector<64x512xf32>
    %c0_3 = arith.constant 0 : index
    %c0_4 = arith.constant 0 : index
    %9 = vector.load %arg5[%c0_3, %c0_4] : memref<1x512xf32, #tpu.memory_space<vmem>>, vector<1x512xf32>
    %10 = vector.broadcast %9 : vector<1x512xf32> to vector<64x512xf32>
    %11 = arith.addf %8, %10 : vector<64x512xf32>
    %c0_5 = arith.constant 0 : index
    %c0_6 = arith.constant 0 : index
    %12 = vector.load %arg14[%c0_5, %c0_6] : memref<64x512xf32, #tpu.memory_space<vmem>>, vector<64x512xf32>
    tpu.vector_store %arg14[%c0_5, %c0_6], %11 {strides = array<i32>} : memref<64x512xf32, #tpu.memory_space<vmem>>, vector<64x512xf32>,
    %c0_7 = arith.constant 0 : index
    %c0_8 = arith.constant 0 : index
    %13 = vector.load %arg8[%c0_7, %c0_8] : memref<8x512xf32, #tpu.memory_space<vmem>>, vector<8x512xf32>
    %c0_9 = arith.constant 0 : index
    %c0_10 = arith.constant 0 : index
    %c0_11 = arith.constant 0 : index
    %14 = vector.load %arg1[%c0_9, %c0_10, %c0_11] : memref<2x8x128xf32, #tpu.memory_space<vmem>>, vector<1x8x128xf32>
    %15 = vector.shape_cast %14 : vector<1x8x128xf32> to vector<8x128xf32>
    %c0_12 = arith.constant 0 : index
    %c0_13 = arith.constant 0 : index
    %c0_14 = arith.constant 0 : index
    %16 = vector.load %arg2[%c0_12, %c0_13, %c0_14] : memref<2x8x128xf32, #tpu.memory_space<vmem>>, vector<1x8x128xf32>
    %17 = vector.shape_cast %16 : vector<1x8x128xf32> to vector<8x128xf32>
    %c1 = arith.constant 1 : index
    %c0_15 = arith.constant 0 : index
    %c0_16 = arith.constant 0 : index
    %18 = vector.load %arg1[%c1, %c0_15, %c0_16] : memref<2x8x128xf32, #tpu.memory_space<vmem>>, vector<1x8x128xf32>
    %19 = vector.shape_cast %18 : vector<1x8x128xf32> to vector<8x128xf32>
    %c1_17 = arith.constant 1 : index
    %c0_18 = arith.constant 0 : index
    %c0_19 = arith.constant 0 : index
    %20 = vector.load %arg2[%c1_17, %c0_18, %c0_19] : memref<2x8x128xf32, #tpu.memory_space<vmem>>, vector<1x8x128xf32>
    %21 = vector.shape_cast %20 : vector<1x8x128xf32> to vector<8x128xf32>
    %c0_i32 = arith.constant 0 : i32
    %c8_i32 = arith.constant 8 : i32
    %22 = arith.muli %c0_i32, %c8_i32 : i32
    %23 = tpu.assume_multiple %22, 8 : i32
    %24 = arith.index_cast %23 : i32 to index
    %c0_20 = arith.constant 0 : index
    %25 = vector.load %arg14[%24, %c0_20] : memref<64x512xf32, #tpu.memory_space<vmem>>, vector<8x512xf32>
    %26 = arith.truncf %15 : vector<8x128xf32> to vector<8x128xbf16>
    %c0_21 = arith.constant 0 : index
    %c0_22 = arith.constant 0 : index
    %27 = vector.load %arg4[%c0_21, %c0_22] : memref<128x512xbf16, #tpu.memory_space<vmem>>, vector<128x512xbf16>
    %cst_23 = arith.constant dense<0.000000e+00> : vector<8x512xf32>
    %28 = tpu.matmul %26, %27, %cst_23 {dimension_numbers = #tpu.dot_dimension_numbers<[1], [0], [0], [1], [0, 0, 1, 1], [], []>} : vector<8x128xbf16>, vector<128x512xbf16>, vector<8x512xf32> -> vector<8x512xf32>
    %29 = arith.addf %25, %28 : vector<8x512xf32>
    %30 = vector.extract_strided_slice %29 {offsets = [0, 0], sizes = [8, 128], strides = [1, 1]} : vector<8x512xf32> to vector<8x128xf32>
    %31 = arith.negf %30 : vector<8x128xf32>
    %32 = math.exp %31 : vector<8x128xf32>
    %cst_24 = arith.constant 1.000000e+00 : f32
    %33 = vector.broadcast %cst_24 : f32 to vector<8x128xf32>
    %34 = arith.addf %33, %32 : vector<8x128xf32>
    %35 = arith.divf %33, %34 : vector<8x128xf32>
    %36 = vector.extract_strided_slice %29 {offsets = [0, 128], sizes = [8, 128], strides = [1, 1]} : vector<8x512xf32> to vector<8x128xf32>
    %37 = arith.negf %36 : vector<8x128xf32>
    %38 = math.exp %37 : vector<8x128xf32>
    %cst_25 = arith.constant 1.000000e+00 : f32
    %39 = vector.broadcast %cst_25 : f32 to vector<8x128xf32>
    %40 = arith.addf %39, %38 : vector<8x128xf32>
    %41 = arith.divf %39, %40 : vector<8x128xf32>
    %42 = vector.extract_strided_slice %29 {offsets = [0, 256], sizes = [8, 128], strides = [1, 1]} : vector<8x512xf32> to vector<8x128xf32>
    %43 = math.tanh %42 : vector<8x128xf32>
    %44 = vector.extract_strided_slice %29 {offsets = [0, 384], sizes = [8, 128], strides = [1, 1]} : vector<8x512xf32> to vector<8x128xf32>
    %45 = arith.negf %44 : vector<8x128xf32>
    %46 = math.exp %45 : vector<8x128xf32>
    %cst_26 = arith.constant 1.000000e+00 : f32
    %47 = vector.broadcast %cst_26 : f32 to vector<8x128xf32>
    %48 = arith.addf %47, %46 : vector<8x128xf32>
    %49 = arith.divf %47, %48 : vector<8x128xf32>
    %50 = arith.mulf %41, %17 : vector<8x128xf32>
    %51 = arith.mulf %35, %43 : vector<8x128xf32>
    %52 = arith.addf %50, %51 : vector<8x128xf32>
    %53 = math.tanh %52 : vector<8x128xf32>
    %54 = arith.mulf %49, %53 : vector<8x128xf32>
    %55 = arith.truncf %54 : vector<8x128xf32> to vector<8x128xbf16>
    %c0_27 = arith.constant 0 : index
    %c0_28 = arith.constant 0 : index
    %56 = vector.load %arg6[%c0_27, %c0_28] : memref<128x512xbf16, #tpu.memory_space<vmem>>, vector<128x512xbf16>
    %cst_29 = arith.constant dense<0.000000e+00> : vector<8x512xf32>
    %57 = tpu.matmul %55, %56, %cst_29 {dimension_numbers = #tpu.dot_dimension_numbers<[1], [0], [0], [1], [0, 0, 1, 1], [], []>} : vector<8x128xbf16>, vector<128x512xbf16>, vector<8x512xf32> -> vector<8x512xf32>
    %58 = arith.truncf %19 : vector<8x128xf32> to vector<8x128xbf16>
    %c0_30 = arith.constant 0 : index
    %c0_31 = arith.constant 0 : index
    %59 = vector.load %arg7[%c0_30, %c0_31] : memref<128x512xbf16, #tpu.memory_space<vmem>>, vector<128x512xbf16>
    %cst_32 = arith.constant dense<0.000000e+00> : vector<8x512xf32>
    %60 = tpu.matmul %58, %59, %cst_32 {dimension_numbers = #tpu.dot_dimension_numbers<[1], [0], [0], [1], [0, 0, 1, 1], [], []>} : vector<8x128xbf16>, vector<128x512xbf16>, vector<8x512xf32> -> vector<8x512xf32>
    %61 = arith.addf %57, %60 : vector<8x512xf32>
    %62 = arith.addf %61, %13 : vector<8x512xf32>
    %63 = vector.extract_strided_slice %62 {offsets = [0, 0], sizes = [8, 128], strides = [1, 1]} : vector<8x512xf32> to vector<8x128xf32>
    %64 = arith.negf %63 : vector<8x128xf32>
    %65 = math.exp %64 : vector<8x128xf32>
    %cst_33 = arith.constant 1.000000e+00 : f32
    %66 = vector.broadcast %cst_33 : f32 to vector<8x128xf32>
    %67 = arith.addf %66, %65 : vector<8x128xf32>
    %68 = arith.divf %66, %67 : vector<8x128xf32>
    %69 = vector.extract_strided_slice %62 {offsets = [0, 128], sizes = [8, 128], strides = [1, 1]} : vector<8x512xf32> to vector<8x128xf32>
    %70 = arith.negf %69 : vector<8x128xf32>
    %71 = math.exp %70 : vector<8x128xf32>
    %cst_34 = arith.constant 1.000000e+00 : f32
    %72 = vector.broadcast %cst_34 : f32 to vector<8x128xf32>
    %73 = arith.addf %72, %71 : vector<8x128xf32>
    %74 = arith.divf %72, %73 : vector<8x128xf32>
    %75 = vector.extract_strided_slice %62 {offsets = [0, 256], sizes = [8, 128], strides = [1, 1]} : vector<8x512xf32> to vector<8x128xf32>
    %76 = math.tanh %75 : vector<8x128xf32>
    %77 = vector.extract_strided_slice %62 {offsets = [0, 384], sizes = [8, 128], strides = [1, 1]} : vector<8x512xf32> to vector<8x128xf32>
    %78 = arith.negf %77 : vector<8x128xf32>
    %79 = math.exp %78 : vector<8x128xf32>
    %cst_35 = arith.constant 1.000000e+00 : f32
    %80 = vector.broadcast %cst_35 : f32 to vector<8x128xf32>
    %81 = arith.addf %80, %79 : vector<8x128xf32>
    %82 = arith.divf %80, %81 : vector<8x128xf32>
    %83 = arith.mulf %74, %21 : vector<8x128xf32>
    %84 = arith.mulf %68, %76 : vector<8x128xf32>
    %85 = arith.addf %83, %84 : vector<8x128xf32>
    %86 = math.tanh %85 : vector<8x128xf32>
    %87 = arith.mulf %82, %86 : vector<8x128xf32>
    %88 = arith.index_cast %23 : i32 to index
    %c0_36 = arith.constant 0 : index
    %89 = vector.load %arg15[%88, %c0_36] : memref<64x128xf32, #tpu.memory_space<vmem>>, vector<8x128xf32>
    tpu.vector_store %arg15[%88, %c0_36], %87 {strides = array<i32>} : memref<64x128xf32, #tpu.memory_space<vmem>>, vector<8x128xf32>,
    %c1_i32 = arith.constant 1 : i32
    %c8_i32_37 = arith.constant 8 : i32
    %90 = arith.muli %c1_i32, %c8_i32_37 : i32
    %91 = tpu.assume_multiple %90, 8 : i32
    %92 = arith.index_cast %91 : i32 to index
    %c0_38 = arith.constant 0 : index
    %93 = vector.load %arg14[%92, %c0_38] : memref<64x512xf32, #tpu.memory_space<vmem>>, vector<8x512xf32>
    %94 = arith.truncf %54 : vector<8x128xf32> to vector<8x128xbf16>
    %c0_39 = arith.constant 0 : index
    %c0_40 = arith.constant 0 : index
    %95 = vector.load %arg4[%c0_39, %c0_40] : memref<128x512xbf16, #tpu.memory_space<vmem>>, vector<128x512xbf16>
    %cst_41 = arith.constant dense<0.000000e+00> : vector<8x512xf32>
    %96 = tpu.matmul %94, %95, %cst_41 {dimension_numbers = #tpu.dot_dimension_numbers<[1], [0], [0], [1], [0, 0, 1, 1], [], []>} : vector<8x128xbf16>, vector<128x512xbf16>, vector<8x512xf32> -> vector<8x512xf32>
    %97 = arith.addf %93, %96 : vector<8x512xf32>
    %98 = vector.extract_strided_slice %97 {offsets = [0, 0], sizes = [8, 128], strides = [1, 1]} : vector<8x512xf32> to vector<8x128xf32>
    %99 = arith.negf %98 : vector<8x128xf32>
    %100 = math.exp %99 : vector<8x128xf32>
    %cst_42 = arith.constant 1.000000e+00 : f32
    %101 = vector.broadcast %cst_42 : f32 to vector<8x128xf32>
    %102 = arith.addf %101, %100 : vector<8x128xf32>
    %103 = arith.divf %101, %102 : vector<8x128xf32>
    %104 = vector.extract_strided_slice %97 {offsets = [0, 128], sizes = [8, 128], strides = [1, 1]} : vector<8x512xf32> to vector<8x128xf32>
    %105 = arith.negf %104 : vector<8x128xf32>
    %106 = math.exp %105 : vector<8x128xf32>
    %cst_43 = arith.constant 1.000000e+00 : f32
    %107 = vector.broadcast %cst_43 : f32 to vector<8x128xf32>
    %108 = arith.addf %107, %106 : vector<8x128xf32>
    %109 = arith.divf %107, %108 : vector<8x128xf32>
    %110 = vector.extract_strided_slice %97 {offsets = [0, 256], sizes = [8, 128], strides = [1, 1]} : vector<8x512xf32> to vector<8x128xf32>
    %111 = math.tanh %110 : vector<8x128xf32>
    %112 = vector.extract_strided_slice %97 {offsets = [0, 384], sizes = [8, 128], strides = [1, 1]} : vector<8x512xf32> to vector<8x128xf32>
    %113 = arith.negf %112 : vector<8x128xf32>
    %114 = math.exp %113 : vector<8x128xf32>
    %cst_44 = arith.constant 1.000000e+00 : f32
    %115 = vector.broadcast %cst_44 : f32 to vector<8x128xf32>
    %116 = arith.addf %115, %114 : vector<8x128xf32>
    %117 = arith.divf %115, %116 : vector<8x128xf32>
    %118 = arith.mulf %109, %52 : vector<8x128xf32>
    %119 = arith.mulf %103, %111 : vector<8x128xf32>
    %120 = arith.addf %118, %119 : vector<8x128xf32>
    %121 = math.tanh %120 : vector<8x128xf32>
    %122 = arith.mulf %117, %121 : vector<8x128xf32>
    %123 = arith.truncf %122 : vector<8x128xf32> to vector<8x128xbf16>
    %c0_45 = arith.constant 0 : index
    %c0_46 = arith.constant 0 : index
    %124 = vector.load %arg6[%c0_45, %c0_46] : memref<128x512xbf16, #tpu.memory_space<vmem>>, vector<128x512xbf16>
    %cst_47 = arith.constant dense<0.000000e+00> : vector<8x512xf32>
    %125 = tpu.matmul %123, %124, %cst_47 {dimension_numbers = #tpu.dot_dimension_numbers<[1], [0], [0], [1], [0, 0, 1, 1], [], []>} : vector<8x128xbf16>, vector<128x512xbf16>, vector<8x512xf32> -> vector<8x512xf32>
    %126 = arith.truncf %87 : vector<8x128xf32> to vector<8x128xbf16>
    %c0_48 = arith.constant 0 : index
    %c0_49 = arith.constant 0 : index
    %127 = vector.load %arg7[%c0_48, %c0_49] : memref<128x512xbf16, #tpu.memory_space<vmem>>, vector<128x512xbf16>
    %cst_50 = arith.constant dense<0.000000e+00> : vector<8x512xf32>
    %128 = tpu.matmul %126, %127, %cst_50 {dimension_numbers = #tpu.dot_dimension_numbers<[1], [0], [0], [1], [0, 0, 1, 1], [], []>} : vector<8x128xbf16>, vector<128x512xbf16>, vector<8x512xf32> -> vector<8x512xf32>
    %129 = arith.addf %125, %128 : vector<8x512xf32>
    %130 = arith.addf %129, %13 : vector<8x512xf32>
    %131 = vector.extract_strided_slice %130 {offsets = [0, 0], sizes = [8, 128], strides = [1, 1]} : vector<8x512xf32> to vector<8x128xf32>
    %132 = arith.negf %131 : vector<8x128xf32>
    %133 = math.exp %132 : vector<8x128xf32>
    %cst_51 = arith.constant 1.000000e+00 : f32
    %134 = vector.broadcast %cst_51 : f32 to vector<8x128xf32>
    %135 = arith.addf %134, %133 : vector<8x128xf32>
    %136 = arith.divf %134, %135 : vector<8x128xf32>
    %137 = vector.extract_strided_slice %130 {offsets = [0, 128], sizes = [8, 128], strides = [1, 1]} : vector<8x512xf32> to vector<8x128xf32>
    %138 = arith.negf %137 : vector<8x128xf32>
    %139 = math.exp %138 : vector<8x128xf32>
    %cst_52 = arith.constant 1.000000e+00 : f32
    %140 = vector.broadcast %cst_52 : f32 to vector<8x128xf32>
    %141 = arith.addf %140, %139 : vector<8x128xf32>
    %142 = arith.divf %140, %141 : vector<8x128xf32>
    %143 = vector.extract_strided_slice %130 {offsets = [0, 256], sizes = [8, 128], strides = [1, 1]} : vector<8x512xf32> to vector<8x128xf32>
    %144 = math.tanh %143 : vector<8x128xf32>
    %145 = vector.extract_strided_slice %130 {offsets = [0, 384], sizes = [8, 128], strides = [1, 1]} : vector<8x512xf32> to vector<8x128xf32>
    %146 = arith.negf %145 : vector<8x128xf32>
    %147 = math.exp %146 : vector<8x128xf32>
    %cst_53 = arith.constant 1.000000e+00 : f32
    %148 = vector.broadcast %cst_53 : f32 to vector<8x128xf32>
    %149 = arith.addf %148, %147 : vector<8x128xf32>
    %150 = arith.divf %148, %149 : vector<8x128xf32>
    %151 = arith.mulf %142, %85 : vector<8x128xf32>
    %152 = arith.mulf %136, %144 : vector<8x128xf32>
    %153 = arith.addf %151, %152 : vector<8x128xf32>
    %154 = math.tanh %153 : vector<8x128xf32>
    %155 = arith.mulf %150, %154 : vector<8x128xf32>
    %156 = arith.index_cast %91 : i32 to index
    %c0_54 = arith.constant 0 : index
    %157 = vector.load %arg15[%156, %c0_54] : memref<64x128xf32, #tpu.memory_space<vmem>>, vector<8x128xf32>
    tpu.vector_store %arg15[%156, %c0_54], %155 {strides = array<i32>} : memref<64x128xf32, #tpu.memory_space<vmem>>, vector<8x128xf32>,
    %c2_i32 = arith.constant 2 : i32
    %c8_i32_55 = arith.constant 8 : i32
    %158 = arith.muli %c2_i32, %c8_i32_55 : i32
    %159 = tpu.assume_multiple %158, 8 : i32
    %160 = arith.index_cast %159 : i32 to index
    %c0_56 = arith.constant 0 : index
    %161 = vector.load %arg14[%160, %c0_56] : memref<64x512xf32, #tpu.memory_space<vmem>>, vector<8x512xf32>
    %162 = arith.truncf %122 : vector<8x128xf32> to vector<8x128xbf16>
    %c0_57 = arith.constant 0 : index
    %c0_58 = arith.constant 0 : index
    %163 = vector.load %arg4[%c0_57, %c0_58] : memref<128x512xbf16, #tpu.memory_space<vmem>>, vector<128x512xbf16>
    %cst_59 = arith.constant dense<0.000000e+00> : vector<8x512xf32>
    %164 = tpu.matmul %162, %163, %cst_59 {dimension_numbers = #tpu.dot_dimension_numbers<[1], [0], [0], [1], [0, 0, 1, 1], [], []>} : vector<8x128xbf16>, vector<128x512xbf16>, vector<8x512xf32> -> vector<8x512xf32>
    %165 = arith.addf %161, %164 : vector<8x512xf32>
    %166 = vector.extract_strided_slice %165 {offsets = [0, 0], sizes = [8, 128], strides = [1, 1]} : vector<8x512xf32> to vector<8x128xf32>
    %167 = arith.negf %166 : vector<8x128xf32>
    %168 = math.exp %167 : vector<8x128xf32>
    %cst_60 = arith.constant 1.000000e+00 : f32
    %169 = vector.broadcast %cst_60 : f32 to vector<8x128xf32>
    %170 = arith.addf %169, %168 : vector<8x128xf32>
    %171 = arith.divf %169, %170 : vector<8x128xf32>
    %172 = vector.extract_strided_slice %165 {offsets = [0, 128], sizes = [8, 128], strides = [1, 1]} : vector<8x512xf32> to vector<8x128xf32>
    %173 = arith.negf %172 : vector<8x128xf32>
    %174 = math.exp %173 : vector<8x128xf32>
    %cst_61 = arith.constant 1.000000e+00 : f32
    %175 = vector.broadcast %cst_61 : f32 to vector<8x128xf32>
    %176 = arith.addf %175, %174 : vector<8x128xf32>
    %177 = arith.divf %175, %176 : vector<8x128xf32>
    %178 = vector.extract_strided_slice %165 {offsets = [0, 256], sizes = [8, 128], strides = [1, 1]} : vector<8x512xf32> to vector<8x128xf32>
    %179 = math.tanh %178 : vector<8x128xf32>
    %180 = vector.extract_strided_slice %165 {offsets = [0, 384], sizes = [8, 128], strides = [1, 1]} : vector<8x512xf32> to vector<8x128xf32>
    %181 = arith.negf %180 : vector<8x128xf32>
    %182 = math.exp %181 : vector<8x128xf32>
    %cst_62 = arith.constant 1.000000e+00 : f32
    %183 = vector.broadcast %cst_62 : f32 to vector<8x128xf32>
    %184 = arith.addf %183, %182 : vector<8x128xf32>
    %185 = arith.divf %183, %184 : vector<8x128xf32>
    %186 = arith.mulf %177, %120 : vector<8x128xf32>
    %187 = arith.mulf %171, %179 : vector<8x128xf32>
    %188 = arith.addf %186, %187 : vector<8x128xf32>
    %189 = math.tanh %188 : vector<8x128xf32>
    %190 = arith.mulf %185, %189 : vector<8x128xf32>
    %191 = arith.truncf %190 : vector<8x128xf32> to vector<8x128xbf16>
    %c0_63 = arith.constant 0 : index
    %c0_64 = arith.constant 0 : index
    %192 = vector.load %arg6[%c0_63, %c0_64] : memref<128x512xbf16, #tpu.memory_space<vmem>>, vector<128x512xbf16>
    %cst_65 = arith.constant dense<0.000000e+00> : vector<8x512xf32>
    %193 = tpu.matmul %191, %192, %cst_65 {dimension_numbers = #tpu.dot_dimension_numbers<[1], [0], [0], [1], [0, 0, 1, 1], [], []>} : vector<8x128xbf16>, vector<128x512xbf16>, vector<8x512xf32> -> vector<8x512xf32>
    %194 = arith.truncf %155 : vector<8x128xf32> to vector<8x128xbf16>
    %c0_66 = arith.constant 0 : index
    %c0_67 = arith.constant 0 : index
    %195 = vector.load %arg7[%c0_66, %c0_67] : memref<128x512xbf16, #tpu.memory_space<vmem>>, vector<128x512xbf16>
    %cst_68 = arith.constant dense<0.000000e+00> : vector<8x512xf32>
    %196 = tpu.matmul %194, %195, %cst_68 {dimension_numbers = #tpu.dot_dimension_numbers<[1], [0], [0], [1], [0, 0, 1, 1], [], []>} : vector<8x128xbf16>, vector<128x512xbf16>, vector<8x512xf32> -> vector<8x512xf32>
    %197 = arith.addf %193, %196 : vector<8x512xf32>
    %198 = arith.addf %197, %13 : vector<8x512xf32>
    %199 = vector.extract_strided_slice %198 {offsets = [0, 0], sizes = [8, 128], strides = [1, 1]} : vector<8x512xf32> to vector<8x128xf32>
    %200 = arith.negf %199 : vector<8x128xf32>
    %201 = math.exp %200 : vector<8x128xf32>
    %cst_69 = arith.constant 1.000000e+00 : f32
    %202 = vector.broadcast %cst_69 : f32 to vector<8x128xf32>
    %203 = arith.addf %202, %201 : vector<8x128xf32>
    %204 = arith.divf %202, %203 : vector<8x128xf32>
    %205 = vector.extract_strided_slice %198 {offsets = [0, 128], sizes = [8, 128], strides = [1, 1]} : vector<8x512xf32> to vector<8x128xf32>
    %206 = arith.negf %205 : vector<8x128xf32>
    %207 = math.exp %206 : vector<8x128xf32>
    %cst_70 = arith.constant 1.000000e+00 : f32
    %208 = vector.broadcast %cst_70 : f32 to vector<8x128xf32>
    %209 = arith.addf %208, %207 : vector<8x128xf32>
    %210 = arith.divf %208, %209 : vector<8x128xf32>
    %211 = vector.extract_strided_slice %198 {offsets = [0, 256], sizes = [8, 128], strides = [1, 1]} : vector<8x512xf32> to vector<8x128xf32>
    %212 = math.tanh %211 : vector<8x128xf32>
    %213 = vector.extract_strided_slice %198 {offsets = [0, 384], sizes = [8, 128], strides = [1, 1]} : vector<8x512xf32> to vector<8x128xf32>
    %214 = arith.negf %213 : vector<8x128xf32>
    %215 = math.exp %214 : vector<8x128xf32>
    %cst_71 = arith.constant 1.000000e+00 : f32
    %216 = vector.broadcast %cst_71 : f32 to vector<8x128xf32>
    %217 = arith.addf %216, %215 : vector<8x128xf32>
    %218 = arith.divf %216, %217 : vector<8x128xf32>
    %219 = arith.mulf %210, %153 : vector<8x128xf32>
    %220 = arith.mulf %204, %212 : vector<8x128xf32>
    %221 = arith.addf %219, %220 : vector<8x128xf32>
    %222 = math.tanh %221 : vector<8x128xf32>
    %223 = arith.mulf %218, %222 : vector<8x128xf32>
    %224 = arith.index_cast %159 : i32 to index
    %c0_72 = arith.constant 0 : index
    %225 = vector.load %arg15[%224, %c0_72] : memref<64x128xf32, #tpu.memory_space<vmem>>, vector<8x128xf32>
    tpu.vector_store %arg15[%224, %c0_72], %223 {strides = array<i32>} : memref<64x128xf32, #tpu.memory_space<vmem>>, vector<8x128xf32>,
    %c3_i32 = arith.constant 3 : i32
    %c8_i32_73 = arith.constant 8 : i32
    %226 = arith.muli %c3_i32, %c8_i32_73 : i32
    %227 = tpu.assume_multiple %226, 8 : i32
    %228 = arith.index_cast %227 : i32 to index
    %c0_74 = arith.constant 0 : index
    %229 = vector.load %arg14[%228, %c0_74] : memref<64x512xf32, #tpu.memory_space<vmem>>, vector<8x512xf32>
    %230 = arith.truncf %190 : vector<8x128xf32> to vector<8x128xbf16>
    %c0_75 = arith.constant 0 : index
    %c0_76 = arith.constant 0 : index
    %231 = vector.load %arg4[%c0_75, %c0_76] : memref<128x512xbf16, #tpu.memory_space<vmem>>, vector<128x512xbf16>
    %cst_77 = arith.constant dense<0.000000e+00> : vector<8x512xf32>
    %232 = tpu.matmul %230, %231, %cst_77 {dimension_numbers = #tpu.dot_dimension_numbers<[1], [0], [0], [1], [0, 0, 1, 1], [], []>} : vector<8x128xbf16>, vector<128x512xbf16>, vector<8x512xf32> -> vector<8x512xf32>
    %233 = arith.addf %229, %232 : vector<8x512xf32>
    %234 = vector.extract_strided_slice %233 {offsets = [0, 0], sizes = [8, 128], strides = [1, 1]} : vector<8x512xf32> to vector<8x128xf32>
    %235 = arith.negf %234 : vector<8x128xf32>
    %236 = math.exp %235 : vector<8x128xf32>
    %cst_78 = arith.constant 1.000000e+00 : f32
    %237 = vector.broadcast %cst_78 : f32 to vector<8x128xf32>
    %238 = arith.addf %237, %236 : vector<8x128xf32>
    %239 = arith.divf %237, %238 : vector<8x128xf32>
    %240 = vector.extract_strided_slice %233 {offsets = [0, 128], sizes = [8, 128], strides = [1, 1]} : vector<8x512xf32> to vector<8x128xf32>
    %241 = arith.negf %240 : vector<8x128xf32>
    %242 = math.exp %241 : vector<8x128xf32>
    %cst_79 = arith.constant 1.000000e+00 : f32
    %243 = vector.broadcast %cst_79 : f32 to vector<8x128xf32>
    %244 = arith.addf %243, %242 : vector<8x128xf32>
    %245 = arith.divf %243, %244 : vector<8x128xf32>
    %246 = vector.extract_strided_slice %233 {offsets = [0, 256], sizes = [8, 128], strides = [1, 1]} : vector<8x512xf32> to vector<8x128xf32>
    %247 = math.tanh %246 : vector<8x128xf32>
    %248 = vector.extract_strided_slice %233 {offsets = [0, 384], sizes = [8, 128], strides = [1, 1]} : vector<8x512xf32> to vector<8x128xf32>
    %249 = arith.negf %248 : vector<8x128xf32>
    %250 = math.exp %249 : vector<8x128xf32>
    %cst_80 = arith.constant 1.000000e+00 : f32
    %251 = vector.broadcast %cst_80 : f32 to vector<8x128xf32>
    %252 = arith.addf %251, %250 : vector<8x128xf32>
    %253 = arith.divf %251, %252 : vector<8x128xf32>
    %254 = arith.mulf %245, %188 : vector<8x128xf32>
    %255 = arith.mulf %239, %247 : vector<8x128xf32>
    %256 = arith.addf %254, %255 : vector<8x128xf32>
    %257 = math.tanh %256 : vector<8x128xf32>
    %258 = arith.mulf %253, %257 : vector<8x128xf32>
    %259 = arith.truncf %258 : vector<8x128xf32> to vector<8x128xbf16>
    %c0_81 = arith.constant 0 : index
    %c0_82 = arith.constant 0 : index
    %260 = vector.load %arg6[%c0_81, %c0_82] : memref<128x512xbf16, #tpu.memory_space<vmem>>, vector<128x512xbf16>
    %cst_83 = arith.constant dense<0.000000e+00> : vector<8x512xf32>
    %261 = tpu.matmul %259, %260, %cst_83 {dimension_numbers = #tpu.dot_dimension_numbers<[1], [0], [0], [1], [0, 0, 1, 1], [], []>} : vector<8x128xbf16>, vector<128x512xbf16>, vector<8x512xf32> -> vector<8x512xf32>
    %262 = arith.truncf %223 : vector<8x128xf32> to vector<8x128xbf16>
    %c0_84 = arith.constant 0 : index
    %c0_85 = arith.constant 0 : index
    %263 = vector.load %arg7[%c0_84, %c0_85] : memref<128x512xbf16, #tpu.memory_space<vmem>>, vector<128x512xbf16>
    %cst_86 = arith.constant dense<0.000000e+00> : vector<8x512xf32>
    %264 = tpu.matmul %262, %263, %cst_86 {dimension_numbers = #tpu.dot_dimension_numbers<[1], [0], [0], [1], [0, 0, 1, 1], [], []>} : vector<8x128xbf16>, vector<128x512xbf16>, vector<8x512xf32> -> vector<8x512xf32>
    %265 = arith.addf %261, %264 : vector<8x512xf32>
    %266 = arith.addf %265, %13 : vector<8x512xf32>
    %267 = vector.extract_strided_slice %266 {offsets = [0, 0], sizes = [8, 128], strides = [1, 1]} : vector<8x512xf32> to vector<8x128xf32>
    %268 = arith.negf %267 : vector<8x128xf32>
    %269 = math.exp %268 : vector<8x128xf32>
    %cst_87 = arith.constant 1.000000e+00 : f32
    %270 = vector.broadcast %cst_87 : f32 to vector<8x128xf32>
    %271 = arith.addf %270, %269 : vector<8x128xf32>
    %272 = arith.divf %270, %271 : vector<8x128xf32>
    %273 = vector.extract_strided_slice %266 {offsets = [0, 128], sizes = [8, 128], strides = [1, 1]} : vector<8x512xf32> to vector<8x128xf32>
    %274 = arith.negf %273 : vector<8x128xf32>
    %275 = math.exp %274 : vector<8x128xf32>
    %cst_88 = arith.constant 1.000000e+00 : f32
    %276 = vector.broadcast %cst_88 : f32 to vector<8x128xf32>
    %277 = arith.addf %276, %275 : vector<8x128xf32>
    %278 = arith.divf %276, %277 : vector<8x128xf32>
    %279 = vector.extract_strided_slice %266 {offsets = [0, 256], sizes = [8, 128], strides = [1, 1]} : vector<8x512xf32> to vector<8x128xf32>
    %280 = math.tanh %279 : vector<8x128xf32>
    %281 = vector.extract_strided_slice %266 {offsets = [0, 384], sizes = [8, 128], strides = [1, 1]} : vector<8x512xf32> to vector<8x128xf32>
    %282 = arith.negf %281 : vector<8x128xf32>
    %283 = math.exp %282 : vector<8x128xf32>
    %cst_89 = arith.constant 1.000000e+00 : f32
    %284 = vector.broadcast %cst_89 : f32 to vector<8x128xf32>
    %285 = arith.addf %284, %283 : vector<8x128xf32>
    %286 = arith.divf %284, %285 : vector<8x128xf32>
    %287 = arith.mulf %278, %221 : vector<8x128xf32>
    %288 = arith.mulf %272, %280 : vector<8x128xf32>
    %289 = arith.addf %287, %288 : vector<8x128xf32>
    %290 = math.tanh %289 : vector<8x128xf32>
    %291 = arith.mulf %286, %290 : vector<8x128xf32>
    %292 = arith.index_cast %227 : i32 to index
    %c0_90 = arith.constant 0 : index
    %293 = vector.load %arg15[%292, %c0_90] : memref<64x128xf32, #tpu.memory_space<vmem>>, vector<8x128xf32>
    tpu.vector_store %arg15[%292, %c0_90], %291 {strides = array<i32>} : memref<64x128xf32, #tpu.memory_space<vmem>>, vector<8x128xf32>,
    %c4_i32 = arith.constant 4 : i32
    %c8_i32_91 = arith.constant 8 : i32
    %294 = arith.muli %c4_i32, %c8_i32_91 : i32
    %295 = tpu.assume_multiple %294, 8 : i32
    %296 = arith.index_cast %295 : i32 to index
    %c0_92 = arith.constant 0 : index
    %297 = vector.load %arg14[%296, %c0_92] : memref<64x512xf32, #tpu.memory_space<vmem>>, vector<8x512xf32>
    %298 = arith.truncf %258 : vector<8x128xf32> to vector<8x128xbf16>
    %c0_93 = arith.constant 0 : index
    %c0_94 = arith.constant 0 : index
    %299 = vector.load %arg4[%c0_93, %c0_94] : memref<128x512xbf16, #tpu.memory_space<vmem>>, vector<128x512xbf16>
    %cst_95 = arith.constant dense<0.000000e+00> : vector<8x512xf32>
    %300 = tpu.matmul %298, %299, %cst_95 {dimension_numbers = #tpu.dot_dimension_numbers<[1], [0], [0], [1], [0, 0, 1, 1], [], []>} : vector<8x128xbf16>, vector<128x512xbf16>, vector<8x512xf32> -> vector<8x512xf32>
    %301 = arith.addf %297, %300 : vector<8x512xf32>
    %302 = vector.extract_strided_slice %301 {offsets = [0, 0], sizes = [8, 128], strides = [1, 1]} : vector<8x512xf32> to vector<8x128xf32>
    %303 = arith.negf %302 : vector<8x128xf32>
    %304 = math.exp %303 : vector<8x128xf32>
    %cst_96 = arith.constant 1.000000e+00 : f32
    %305 = vector.broadcast %cst_96 : f32 to vector<8x128xf32>
    %306 = arith.addf %305, %304 : vector<8x128xf32>
    %307 = arith.divf %305, %306 : vector<8x128xf32>
    %308 = vector.extract_strided_slice %301 {offsets = [0, 128], sizes = [8, 128], strides = [1, 1]} : vector<8x512xf32> to vector<8x128xf32>
    %309 = arith.negf %308 : vector<8x128xf32>
    %310 = math.exp %309 : vector<8x128xf32>
    %cst_97 = arith.constant 1.000000e+00 : f32
    %311 = vector.broadcast %cst_97 : f32 to vector<8x128xf32>
    %312 = arith.addf %311, %310 : vector<8x128xf32>
    %313 = arith.divf %311, %312 : vector<8x128xf32>
    %314 = vector.extract_strided_slice %301 {offsets = [0, 256], sizes = [8, 128], strides = [1, 1]} : vector<8x512xf32> to vector<8x128xf32>
    %315 = math.tanh %314 : vector<8x128xf32>
    %316 = vector.extract_strided_slice %301 {offsets = [0, 384], sizes = [8, 128], strides = [1, 1]} : vector<8x512xf32> to vector<8x128xf32>
    %317 = arith.negf %316 : vector<8x128xf32>
    %318 = math.exp %317 : vector<8x128xf32>
    %cst_98 = arith.constant 1.000000e+00 : f32
    %319 = vector.broadcast %cst_98 : f32 to vector<8x128xf32>
    %320 = arith.addf %319, %318 : vector<8x128xf32>
    %321 = arith.divf %319, %320 : vector<8x128xf32>
    %322 = arith.mulf %313, %256 : vector<8x128xf32>
    %323 = arith.mulf %307, %315 : vector<8x128xf32>
    %324 = arith.addf %322, %323 : vector<8x128xf32>
    %325 = math.tanh %324 : vector<8x128xf32>
    %326 = arith.mulf %321, %325 : vector<8x128xf32>
    %327 = arith.truncf %326 : vector<8x128xf32> to vector<8x128xbf16>
    %c0_99 = arith.constant 0 : index
    %c0_100 = arith.constant 0 : index
    %328 = vector.load %arg6[%c0_99, %c0_100] : memref<128x512xbf16, #tpu.memory_space<vmem>>, vector<128x512xbf16>
    %cst_101 = arith.constant dense<0.000000e+00> : vector<8x512xf32>
    %329 = tpu.matmul %327, %328, %cst_101 {dimension_numbers = #tpu.dot_dimension_numbers<[1], [0], [0], [1], [0, 0, 1, 1], [], []>} : vector<8x128xbf16>, vector<128x512xbf16>, vector<8x512xf32> -> vector<8x512xf32>
    %330 = arith.truncf %291 : vector<8x128xf32> to vector<8x128xbf16>
    %c0_102 = arith.constant 0 : index
    %c0_103 = arith.constant 0 : index
    %331 = vector.load %arg7[%c0_102, %c0_103] : memref<128x512xbf16, #tpu.memory_space<vmem>>, vector<128x512xbf16>
    %cst_104 = arith.constant dense<0.000000e+00> : vector<8x512xf32>
    %332 = tpu.matmul %330, %331, %cst_104 {dimension_numbers = #tpu.dot_dimension_numbers<[1], [0], [0], [1], [0, 0, 1, 1], [], []>} : vector<8x128xbf16>, vector<128x512xbf16>, vector<8x512xf32> -> vector<8x512xf32>
    %333 = arith.addf %329, %332 : vector<8x512xf32>
    %334 = arith.addf %333, %13 : vector<8x512xf32>
    %335 = vector.extract_strided_slice %334 {offsets = [0, 0], sizes = [8, 128], strides = [1, 1]} : vector<8x512xf32> to vector<8x128xf32>
    %336 = arith.negf %335 : vector<8x128xf32>
    %337 = math.exp %336 : vector<8x128xf32>
    %cst_105 = arith.constant 1.000000e+00 : f32
    %338 = vector.broadcast %cst_105 : f32 to vector<8x128xf32>
    %339 = arith.addf %338, %337 : vector<8x128xf32>
    %340 = arith.divf %338, %339 : vector<8x128xf32>
    %341 = vector.extract_strided_slice %334 {offsets = [0, 128], sizes = [8, 128], strides = [1, 1]} : vector<8x512xf32> to vector<8x128xf32>
    %342 = arith.negf %341 : vector<8x128xf32>
    %343 = math.exp %342 : vector<8x128xf32>
    %cst_106 = arith.constant 1.000000e+00 : f32
    %344 = vector.broadcast %cst_106 : f32 to vector<8x128xf32>
    %345 = arith.addf %344, %343 : vector<8x128xf32>
    %346 = arith.divf %344, %345 : vector<8x128xf32>
    %347 = vector.extract_strided_slice %334 {offsets = [0, 256], sizes = [8, 128], strides = [1, 1]} : vector<8x512xf32> to vector<8x128xf32>
    %348 = math.tanh %347 : vector<8x128xf32>
    %349 = vector.extract_strided_slice %334 {offsets = [0, 384], sizes = [8, 128], strides = [1, 1]} : vector<8x512xf32> to vector<8x128xf32>
    %350 = arith.negf %349 : vector<8x128xf32>
    %351 = math.exp %350 : vector<8x128xf32>
    %cst_107 = arith.constant 1.000000e+00 : f32
    %352 = vector.broadcast %cst_107 : f32 to vector<8x128xf32>
    %353 = arith.addf %352, %351 : vector<8x128xf32>
    %354 = arith.divf %352, %353 : vector<8x128xf32>
    %355 = arith.mulf %346, %289 : vector<8x128xf32>
    %356 = arith.mulf %340, %348 : vector<8x128xf32>
    %357 = arith.addf %355, %356 : vector<8x128xf32>
    %358 = math.tanh %357 : vector<8x128xf32>
    %359 = arith.mulf %354, %358 : vector<8x128xf32>
    %360 = arith.index_cast %295 : i32 to index
    %c0_108 = arith.constant 0 : index
    %361 = vector.load %arg15[%360, %c0_108] : memref<64x128xf32, #tpu.memory_space<vmem>>, vector<8x128xf32>
    tpu.vector_store %arg15[%360, %c0_108], %359 {strides = array<i32>} : memref<64x128xf32, #tpu.memory_space<vmem>>, vector<8x128xf32>,
    %c5_i32 = arith.constant 5 : i32
    %c8_i32_109 = arith.constant 8 : i32
    %362 = arith.muli %c5_i32, %c8_i32_109 : i32
    %363 = tpu.assume_multiple %362, 8 : i32
    %364 = arith.index_cast %363 : i32 to index
    %c0_110 = arith.constant 0 : index
    %365 = vector.load %arg14[%364, %c0_110] : memref<64x512xf32, #tpu.memory_space<vmem>>, vector<8x512xf32>
    %366 = arith.truncf %326 : vector<8x128xf32> to vector<8x128xbf16>
    %c0_111 = arith.constant 0 : index
    %c0_112 = arith.constant 0 : index
    %367 = vector.load %arg4[%c0_111, %c0_112] : memref<128x512xbf16, #tpu.memory_space<vmem>>, vector<128x512xbf16>
    %cst_113 = arith.constant dense<0.000000e+00> : vector<8x512xf32>
    %368 = tpu.matmul %366, %367, %cst_113 {dimension_numbers = #tpu.dot_dimension_numbers<[1], [0], [0], [1], [0, 0, 1, 1], [], []>} : vector<8x128xbf16>, vector<128x512xbf16>, vector<8x512xf32> -> vector<8x512xf32>
    %369 = arith.addf %365, %368 : vector<8x512xf32>
    %370 = vector.extract_strided_slice %369 {offsets = [0, 0], sizes = [8, 128], strides = [1, 1]} : vector<8x512xf32> to vector<8x128xf32>
    %371 = arith.negf %370 : vector<8x128xf32>
    %372 = math.exp %371 : vector<8x128xf32>
    %cst_114 = arith.constant 1.000000e+00 : f32
    %373 = vector.broadcast %cst_114 : f32 to vector<8x128xf32>
    %374 = arith.addf %373, %372 : vector<8x128xf32>
    %375 = arith.divf %373, %374 : vector<8x128xf32>
    %376 = vector.extract_strided_slice %369 {offsets = [0, 128], sizes = [8, 128], strides = [1, 1]} : vector<8x512xf32> to vector<8x128xf32>
    %377 = arith.negf %376 : vector<8x128xf32>
    %378 = math.exp %377 : vector<8x128xf32>
    %cst_115 = arith.constant 1.000000e+00 : f32
    %379 = vector.broadcast %cst_115 : f32 to vector<8x128xf32>
    %380 = arith.addf %379, %378 : vector<8x128xf32>
    %381 = arith.divf %379, %380 : vector<8x128xf32>
    %382 = vector.extract_strided_slice %369 {offsets = [0, 256], sizes = [8, 128], strides = [1, 1]} : vector<8x512xf32> to vector<8x128xf32>
    %383 = math.tanh %382 : vector<8x128xf32>
    %384 = vector.extract_strided_slice %369 {offsets = [0, 384], sizes = [8, 128], strides = [1, 1]} : vector<8x512xf32> to vector<8x128xf32>
    %385 = arith.negf %384 : vector<8x128xf32>
    %386 = math.exp %385 : vector<8x128xf32>
    %cst_116 = arith.constant 1.000000e+00 : f32
    %387 = vector.broadcast %cst_116 : f32 to vector<8x128xf32>
    %388 = arith.addf %387, %386 : vector<8x128xf32>
    %389 = arith.divf %387, %388 : vector<8x128xf32>
    %390 = arith.mulf %381, %324 : vector<8x128xf32>
    %391 = arith.mulf %375, %383 : vector<8x128xf32>
    %392 = arith.addf %390, %391 : vector<8x128xf32>
    %393 = math.tanh %392 : vector<8x128xf32>
    %394 = arith.mulf %389, %393 : vector<8x128xf32>
    %395 = arith.truncf %394 : vector<8x128xf32> to vector<8x128xbf16>
    %c0_117 = arith.constant 0 : index
    %c0_118 = arith.constant 0 : index
    %396 = vector.load %arg6[%c0_117, %c0_118] : memref<128x512xbf16, #tpu.memory_space<vmem>>, vector<128x512xbf16>
    %cst_119 = arith.constant dense<0.000000e+00> : vector<8x512xf32>
    %397 = tpu.matmul %395, %396, %cst_119 {dimension_numbers = #tpu.dot_dimension_numbers<[1], [0], [0], [1], [0, 0, 1, 1], [], []>} : vector<8x128xbf16>, vector<128x512xbf16>, vector<8x512xf32> -> vector<8x512xf32>
    %398 = arith.truncf %359 : vector<8x128xf32> to vector<8x128xbf16>
    %c0_120 = arith.constant 0 : index
    %c0_121 = arith.constant 0 : index
    %399 = vector.load %arg7[%c0_120, %c0_121] : memref<128x512xbf16, #tpu.memory_space<vmem>>, vector<128x512xbf16>
    %cst_122 = arith.constant dense<0.000000e+00> : vector<8x512xf32>
    %400 = tpu.matmul %398, %399, %cst_122 {dimension_numbers = #tpu.dot_dimension_numbers<[1], [0], [0], [1], [0, 0, 1, 1], [], []>} : vector<8x128xbf16>, vector<128x512xbf16>, vector<8x512xf32> -> vector<8x512xf32>
    %401 = arith.addf %397, %400 : vector<8x512xf32>
    %402 = arith.addf %401, %13 : vector<8x512xf32>
    %403 = vector.extract_strided_slice %402 {offsets = [0, 0], sizes = [8, 128], strides = [1, 1]} : vector<8x512xf32> to vector<8x128xf32>
    %404 = arith.negf %403 : vector<8x128xf32>
    %405 = math.exp %404 : vector<8x128xf32>
    %cst_123 = arith.constant 1.000000e+00 : f32
    %406 = vector.broadcast %cst_123 : f32 to vector<8x128xf32>
    %407 = arith.addf %406, %405 : vector<8x128xf32>
    %408 = arith.divf %406, %407 : vector<8x128xf32>
    %409 = vector.extract_strided_slice %402 {offsets = [0, 128], sizes = [8, 128], strides = [1, 1]} : vector<8x512xf32> to vector<8x128xf32>
    %410 = arith.negf %409 : vector<8x128xf32>
    %411 = math.exp %410 : vector<8x128xf32>
    %cst_124 = arith.constant 1.000000e+00 : f32
    %412 = vector.broadcast %cst_124 : f32 to vector<8x128xf32>
    %413 = arith.addf %412, %411 : vector<8x128xf32>
    %414 = arith.divf %412, %413 : vector<8x128xf32>
    %415 = vector.extract_strided_slice %402 {offsets = [0, 256], sizes = [8, 128], strides = [1, 1]} : vector<8x512xf32> to vector<8x128xf32>
    %416 = math.tanh %415 : vector<8x128xf32>
    %417 = vector.extract_strided_slice %402 {offsets = [0, 384], sizes = [8, 128], strides = [1, 1]} : vector<8x512xf32> to vector<8x128xf32>
    %418 = arith.negf %417 : vector<8x128xf32>
    %419 = math.exp %418 : vector<8x128xf32>
    %cst_125 = arith.constant 1.000000e+00 : f32
    %420 = vector.broadcast %cst_125 : f32 to vector<8x128xf32>
    %421 = arith.addf %420, %419 : vector<8x128xf32>
    %422 = arith.divf %420, %421 : vector<8x128xf32>
    %423 = arith.mulf %414, %357 : vector<8x128xf32>
    %424 = arith.mulf %408, %416 : vector<8x128xf32>
    %425 = arith.addf %423, %424 : vector<8x128xf32>
    %426 = math.tanh %425 : vector<8x128xf32>
    %427 = arith.mulf %422, %426 : vector<8x128xf32>
    %428 = arith.index_cast %363 : i32 to index
    %c0_126 = arith.constant 0 : index
    %429 = vector.load %arg15[%428, %c0_126] : memref<64x128xf32, #tpu.memory_space<vmem>>, vector<8x128xf32>
    tpu.vector_store %arg15[%428, %c0_126], %427 {strides = array<i32>} : memref<64x128xf32, #tpu.memory_space<vmem>>, vector<8x128xf32>,
    %c6_i32 = arith.constant 6 : i32
    %c8_i32_127 = arith.constant 8 : i32
    %430 = arith.muli %c6_i32, %c8_i32_127 : i32
    %431 = tpu.assume_multiple %430, 8 : i32
    %432 = arith.index_cast %431 : i32 to index
    %c0_128 = arith.constant 0 : index
    %433 = vector.load %arg14[%432, %c0_128] : memref<64x512xf32, #tpu.memory_space<vmem>>, vector<8x512xf32>
    %434 = arith.truncf %394 : vector<8x128xf32> to vector<8x128xbf16>
    %c0_129 = arith.constant 0 : index
    %c0_130 = arith.constant 0 : index
    %435 = vector.load %arg4[%c0_129, %c0_130] : memref<128x512xbf16, #tpu.memory_space<vmem>>, vector<128x512xbf16>
    %cst_131 = arith.constant dense<0.000000e+00> : vector<8x512xf32>
    %436 = tpu.matmul %434, %435, %cst_131 {dimension_numbers = #tpu.dot_dimension_numbers<[1], [0], [0], [1], [0, 0, 1, 1], [], []>} : vector<8x128xbf16>, vector<128x512xbf16>, vector<8x512xf32> -> vector<8x512xf32>
    %437 = arith.addf %433, %436 : vector<8x512xf32>
    %438 = vector.extract_strided_slice %437 {offsets = [0, 0], sizes = [8, 128], strides = [1, 1]} : vector<8x512xf32> to vector<8x128xf32>
    %439 = arith.negf %438 : vector<8x128xf32>
    %440 = math.exp %439 : vector<8x128xf32>
    %cst_132 = arith.constant 1.000000e+00 : f32
    %441 = vector.broadcast %cst_132 : f32 to vector<8x128xf32>
    %442 = arith.addf %441, %440 : vector<8x128xf32>
    %443 = arith.divf %441, %442 : vector<8x128xf32>
    %444 = vector.extract_strided_slice %437 {offsets = [0, 128], sizes = [8, 128], strides = [1, 1]} : vector<8x512xf32> to vector<8x128xf32>
    %445 = arith.negf %444 : vector<8x128xf32>
    %446 = math.exp %445 : vector<8x128xf32>
    %cst_133 = arith.constant 1.000000e+00 : f32
    %447 = vector.broadcast %cst_133 : f32 to vector<8x128xf32>
    %448 = arith.addf %447, %446 : vector<8x128xf32>
    %449 = arith.divf %447, %448 : vector<8x128xf32>
    %450 = vector.extract_strided_slice %437 {offsets = [0, 256], sizes = [8, 128], strides = [1, 1]} : vector<8x512xf32> to vector<8x128xf32>
    %451 = math.tanh %450 : vector<8x128xf32>
    %452 = vector.extract_strided_slice %437 {offsets = [0, 384], sizes = [8, 128], strides = [1, 1]} : vector<8x512xf32> to vector<8x128xf32>
    %453 = arith.negf %452 : vector<8x128xf32>
    %454 = math.exp %453 : vector<8x128xf32>
    %cst_134 = arith.constant 1.000000e+00 : f32
    %455 = vector.broadcast %cst_134 : f32 to vector<8x128xf32>
    %456 = arith.addf %455, %454 : vector<8x128xf32>
    %457 = arith.divf %455, %456 : vector<8x128xf32>
    %458 = arith.mulf %449, %392 : vector<8x128xf32>
    %459 = arith.mulf %443, %451 : vector<8x128xf32>
    %460 = arith.addf %458, %459 : vector<8x128xf32>
    %461 = math.tanh %460 : vector<8x128xf32>
    %462 = arith.mulf %457, %461 : vector<8x128xf32>
    %463 = arith.truncf %462 : vector<8x128xf32> to vector<8x128xbf16>
    %c0_135 = arith.constant 0 : index
    %c0_136 = arith.constant 0 : index
    %464 = vector.load %arg6[%c0_135, %c0_136] : memref<128x512xbf16, #tpu.memory_space<vmem>>, vector<128x512xbf16>
    %cst_137 = arith.constant dense<0.000000e+00> : vector<8x512xf32>
    %465 = tpu.matmul %463, %464, %cst_137 {dimension_numbers = #tpu.dot_dimension_numbers<[1], [0], [0], [1], [0, 0, 1, 1], [], []>} : vector<8x128xbf16>, vector<128x512xbf16>, vector<8x512xf32> -> vector<8x512xf32>
    %466 = arith.truncf %427 : vector<8x128xf32> to vector<8x128xbf16>
    %c0_138 = arith.constant 0 : index
    %c0_139 = arith.constant 0 : index
    %467 = vector.load %arg7[%c0_138, %c0_139] : memref<128x512xbf16, #tpu.memory_space<vmem>>, vector<128x512xbf16>
    %cst_140 = arith.constant dense<0.000000e+00> : vector<8x512xf32>
    %468 = tpu.matmul %466, %467, %cst_140 {dimension_numbers = #tpu.dot_dimension_numbers<[1], [0], [0], [1], [0, 0, 1, 1], [], []>} : vector<8x128xbf16>, vector<128x512xbf16>, vector<8x512xf32> -> vector<8x512xf32>
    %469 = arith.addf %465, %468 : vector<8x512xf32>
    %470 = arith.addf %469, %13 : vector<8x512xf32>
    %471 = vector.extract_strided_slice %470 {offsets = [0, 0], sizes = [8, 128], strides = [1, 1]} : vector<8x512xf32> to vector<8x128xf32>
    %472 = arith.negf %471 : vector<8x128xf32>
    %473 = math.exp %472 : vector<8x128xf32>
    %cst_141 = arith.constant 1.000000e+00 : f32
    %474 = vector.broadcast %cst_141 : f32 to vector<8x128xf32>
    %475 = arith.addf %474, %473 : vector<8x128xf32>
    %476 = arith.divf %474, %475 : vector<8x128xf32>
    %477 = vector.extract_strided_slice %470 {offsets = [0, 128], sizes = [8, 128], strides = [1, 1]} : vector<8x512xf32> to vector<8x128xf32>
    %478 = arith.negf %477 : vector<8x128xf32>
    %479 = math.exp %478 : vector<8x128xf32>
    %cst_142 = arith.constant 1.000000e+00 : f32
    %480 = vector.broadcast %cst_142 : f32 to vector<8x128xf32>
    %481 = arith.addf %480, %479 : vector<8x128xf32>
    %482 = arith.divf %480, %481 : vector<8x128xf32>
    %483 = vector.extract_strided_slice %470 {offsets = [0, 256], sizes = [8, 128], strides = [1, 1]} : vector<8x512xf32> to vector<8x128xf32>
    %484 = math.tanh %483 : vector<8x128xf32>
    %485 = vector.extract_strided_slice %470 {offsets = [0, 384], sizes = [8, 128], strides = [1, 1]} : vector<8x512xf32> to vector<8x128xf32>
    %486 = arith.negf %485 : vector<8x128xf32>
    %487 = math.exp %486 : vector<8x128xf32>
    %cst_143 = arith.constant 1.000000e+00 : f32
    %488 = vector.broadcast %cst_143 : f32 to vector<8x128xf32>
    %489 = arith.addf %488, %487 : vector<8x128xf32>
    %490 = arith.divf %488, %489 : vector<8x128xf32>
    %491 = arith.mulf %482, %425 : vector<8x128xf32>
    %492 = arith.mulf %476, %484 : vector<8x128xf32>
    %493 = arith.addf %491, %492 : vector<8x128xf32>
    %494 = math.tanh %493 : vector<8x128xf32>
    %495 = arith.mulf %490, %494 : vector<8x128xf32>
    %496 = arith.index_cast %431 : i32 to index
    %c0_144 = arith.constant 0 : index
    %497 = vector.load %arg15[%496, %c0_144] : memref<64x128xf32, #tpu.memory_space<vmem>>, vector<8x128xf32>
    tpu.vector_store %arg15[%496, %c0_144], %495 {strides = array<i32>} : memref<64x128xf32, #tpu.memory_space<vmem>>, vector<8x128xf32>,
    %c7_i32 = arith.constant 7 : i32
    %c8_i32_145 = arith.constant 8 : i32
    %498 = arith.muli %c7_i32, %c8_i32_145 : i32
    %499 = tpu.assume_multiple %498, 8 : i32
    %500 = arith.index_cast %499 : i32 to index
    %c0_146 = arith.constant 0 : index
    %501 = vector.load %arg14[%500, %c0_146] : memref<64x512xf32, #tpu.memory_space<vmem>>, vector<8x512xf32>
    %502 = arith.truncf %462 : vector<8x128xf32> to vector<8x128xbf16>
    %c0_147 = arith.constant 0 : index
    %c0_148 = arith.constant 0 : index
    %503 = vector.load %arg4[%c0_147, %c0_148] : memref<128x512xbf16, #tpu.memory_space<vmem>>, vector<128x512xbf16>
    %cst_149 = arith.constant dense<0.000000e+00> : vector<8x512xf32>
    %504 = tpu.matmul %502, %503, %cst_149 {dimension_numbers = #tpu.dot_dimension_numbers<[1], [0], [0], [1], [0, 0, 1, 1], [], []>} : vector<8x128xbf16>, vector<128x512xbf16>, vector<8x512xf32> -> vector<8x512xf32>
    %505 = arith.addf %501, %504 : vector<8x512xf32>
    %506 = vector.extract_strided_slice %505 {offsets = [0, 0], sizes = [8, 128], strides = [1, 1]} : vector<8x512xf32> to vector<8x128xf32>
    %507 = arith.negf %506 : vector<8x128xf32>
    %508 = math.exp %507 : vector<8x128xf32>
    %cst_150 = arith.constant 1.000000e+00 : f32
    %509 = vector.broadcast %cst_150 : f32 to vector<8x128xf32>
    %510 = arith.addf %509, %508 : vector<8x128xf32>
    %511 = arith.divf %509, %510 : vector<8x128xf32>
    %512 = vector.extract_strided_slice %505 {offsets = [0, 128], sizes = [8, 128], strides = [1, 1]} : vector<8x512xf32> to vector<8x128xf32>
    %513 = arith.negf %512 : vector<8x128xf32>
    %514 = math.exp %513 : vector<8x128xf32>
    %cst_151 = arith.constant 1.000000e+00 : f32
    %515 = vector.broadcast %cst_151 : f32 to vector<8x128xf32>
    %516 = arith.addf %515, %514 : vector<8x128xf32>
    %517 = arith.divf %515, %516 : vector<8x128xf32>
    %518 = vector.extract_strided_slice %505 {offsets = [0, 256], sizes = [8, 128], strides = [1, 1]} : vector<8x512xf32> to vector<8x128xf32>
    %519 = math.tanh %518 : vector<8x128xf32>
    %520 = vector.extract_strided_slice %505 {offsets = [0, 384], sizes = [8, 128], strides = [1, 1]} : vector<8x512xf32> to vector<8x128xf32>
    %521 = arith.negf %520 : vector<8x128xf32>
    %522 = math.exp %521 : vector<8x128xf32>
    %cst_152 = arith.constant 1.000000e+00 : f32
    %523 = vector.broadcast %cst_152 : f32 to vector<8x128xf32>
    %524 = arith.addf %523, %522 : vector<8x128xf32>
    %525 = arith.divf %523, %524 : vector<8x128xf32>
    %526 = arith.mulf %517, %460 : vector<8x128xf32>
    %527 = arith.mulf %511, %519 : vector<8x128xf32>
    %528 = arith.addf %526, %527 : vector<8x128xf32>
    %529 = math.tanh %528 : vector<8x128xf32>
    %530 = arith.mulf %525, %529 : vector<8x128xf32>
    %531 = arith.truncf %530 : vector<8x128xf32> to vector<8x128xbf16>
    %c0_153 = arith.constant 0 : index
    %c0_154 = arith.constant 0 : index
    %532 = vector.load %arg6[%c0_153, %c0_154] : memref<128x512xbf16, #tpu.memory_space<vmem>>, vector<128x512xbf16>
    %cst_155 = arith.constant dense<0.000000e+00> : vector<8x512xf32>
    %533 = tpu.matmul %531, %532, %cst_155 {dimension_numbers = #tpu.dot_dimension_numbers<[1], [0], [0], [1], [0, 0, 1, 1], [], []>} : vector<8x128xbf16>, vector<128x512xbf16>, vector<8x512xf32> -> vector<8x512xf32>
    %534 = arith.truncf %495 : vector<8x128xf32> to vector<8x128xbf16>
    %c0_156 = arith.constant 0 : index
    %c0_157 = arith.constant 0 : index
    %535 = vector.load %arg7[%c0_156, %c0_157] : memref<128x512xbf16, #tpu.memory_space<vmem>>, vector<128x512xbf16>
    %cst_158 = arith.constant dense<0.000000e+00> : vector<8x512xf32>
    %536 = tpu.matmul %534, %535, %cst_158 {dimension_numbers = #tpu.dot_dimension_numbers<[1], [0], [0], [1], [0, 0, 1, 1], [], []>} : vector<8x128xbf16>, vector<128x512xbf16>, vector<8x512xf32> -> vector<8x512xf32>
    %537 = arith.addf %533, %536 : vector<8x512xf32>
    %538 = arith.addf %537, %13 : vector<8x512xf32>
    %539 = vector.extract_strided_slice %538 {offsets = [0, 0], sizes = [8, 128], strides = [1, 1]} : vector<8x512xf32> to vector<8x128xf32>
    %540 = arith.negf %539 : vector<8x128xf32>
    %541 = math.exp %540 : vector<8x128xf32>
    %cst_159 = arith.constant 1.000000e+00 : f32
    %542 = vector.broadcast %cst_159 : f32 to vector<8x128xf32>
    %543 = arith.addf %542, %541 : vector<8x128xf32>
    %544 = arith.divf %542, %543 : vector<8x128xf32>
    %545 = vector.extract_strided_slice %538 {offsets = [0, 128], sizes = [8, 128], strides = [1, 1]} : vector<8x512xf32> to vector<8x128xf32>
    %546 = arith.negf %545 : vector<8x128xf32>
    %547 = math.exp %546 : vector<8x128xf32>
    %cst_160 = arith.constant 1.000000e+00 : f32
    %548 = vector.broadcast %cst_160 : f32 to vector<8x128xf32>
    %549 = arith.addf %548, %547 : vector<8x128xf32>
    %550 = arith.divf %548, %549 : vector<8x128xf32>
    %551 = vector.extract_strided_slice %538 {offsets = [0, 256], sizes = [8, 128], strides = [1, 1]} : vector<8x512xf32> to vector<8x128xf32>
    %552 = math.tanh %551 : vector<8x128xf32>
    %553 = vector.extract_strided_slice %538 {offsets = [0, 384], sizes = [8, 128], strides = [1, 1]} : vector<8x512xf32> to vector<8x128xf32>
    %554 = arith.negf %553 : vector<8x128xf32>
    %555 = math.exp %554 : vector<8x128xf32>
    %cst_161 = arith.constant 1.000000e+00 : f32
    %556 = vector.broadcast %cst_161 : f32 to vector<8x128xf32>
    %557 = arith.addf %556, %555 : vector<8x128xf32>
    %558 = arith.divf %556, %557 : vector<8x128xf32>
    %559 = arith.mulf %550, %493 : vector<8x128xf32>
    %560 = arith.mulf %544, %552 : vector<8x128xf32>
    %561 = arith.addf %559, %560 : vector<8x128xf32>
    %562 = math.tanh %561 : vector<8x128xf32>
    %563 = arith.mulf %558, %562 : vector<8x128xf32>
    %564 = arith.index_cast %499 : i32 to index
    %c0_162 = arith.constant 0 : index
    %565 = vector.load %arg15[%564, %c0_162] : memref<64x128xf32, #tpu.memory_space<vmem>>, vector<8x128xf32>
    tpu.vector_store %arg15[%564, %c0_162], %563 {strides = array<i32>} : memref<64x128xf32, #tpu.memory_space<vmem>>, vector<8x128xf32>,
    %c8_i32_163 = arith.constant 8 : i32
    %c0_164 = arith.constant 0 : index
    %c0_165 = arith.constant 0 : index
    %566 = vector.load %arg15[%c0_164, %c0_165] : memref<64x128xf32, #tpu.memory_space<vmem>>, vector<64x128xf32>
    %567 = arith.truncf %566 : vector<64x128xf32> to vector<64x128xbf16>
    %c0_166 = arith.constant 0 : index
    %c0_167 = arith.constant 0 : index
    %568 = vector.load %arg9[%c0_166, %c0_167] : memref<128x256xbf16, #tpu.memory_space<vmem>>, vector<128x256xbf16>
    %cst_168 = arith.constant dense<0.000000e+00> : vector<64x256xf32>
    %569 = tpu.matmul %567, %568, %cst_168 {dimension_numbers = #tpu.dot_dimension_numbers<[1], [0], [0], [1], [0, 0, 1, 1], [], []>} : vector<64x128xbf16>, vector<128x256xbf16>, vector<64x256xf32> -> vector<64x256xf32>
    %c0_169 = arith.constant 0 : index
    %c0_170 = arith.constant 0 : index
    %570 = vector.load %arg10[%c0_169, %c0_170] : memref<1x256xf32, #tpu.memory_space<vmem>>, vector<1x256xf32>
    %571 = vector.broadcast %570 : vector<1x256xf32> to vector<64x256xf32>
    %572 = arith.addf %569, %571 : vector<64x256xf32>
    %c0_171 = arith.constant 0 : index
    %c0_172 = arith.constant 0 : index
    %573 = vector.load %arg11[%c0_171, %c0_172] : memref<64x256xf32, #tpu.memory_space<vmem>>, vector<64x256xf32>
    tpu.vector_store %arg11[%c0_171, %c0_172], %572 {strides = array<i32>} : memref<64x256xf32, #tpu.memory_space<vmem>>, vector<64x256xf32>,
    %c0_173 = arith.constant 0 : index
    %c0_174 = arith.constant 0 : index
    %c0_175 = arith.constant 0 : index
    %574 = vector.load %arg12[%c0_173, %c0_174, %c0_175] : memref<2x8x128xf32, #tpu.memory_space<vmem>>, vector<1x8x128xf32>
    %575 = vector.shape_cast %574 : vector<1x8x128xf32> to vector<8x128xf32>
    %576 = vector.shape_cast %530 : vector<8x128xf32> to vector<1x8x128xf32>
    tpu.vector_store %arg12[%c0_173, %c0_174, %c0_175], %576 {strides = array<i32>} : memref<2x8x128xf32, #tpu.memory_space<vmem>>, vector<1x8x128xf32>,
    %c1_176 = arith.constant 1 : index
    %c0_177 = arith.constant 0 : index
    %c0_178 = arith.constant 0 : index
    %577 = vector.load %arg12[%c1_176, %c0_177, %c0_178] : memref<2x8x128xf32, #tpu.memory_space<vmem>>, vector<1x8x128xf32>
    %578 = vector.shape_cast %577 : vector<1x8x128xf32> to vector<8x128xf32>
    %579 = vector.shape_cast %563 : vector<8x128xf32> to vector<1x8x128xf32>
    tpu.vector_store %arg12[%c1_176, %c0_177, %c0_178], %579 {strides = array<i32>} : memref<2x8x128xf32, #tpu.memory_space<vmem>>, vector<1x8x128xf32>,
    %c0_179 = arith.constant 0 : index
    %c0_180 = arith.constant 0 : index
    %c0_181 = arith.constant 0 : index
    %580 = vector.load %arg13[%c0_179, %c0_180, %c0_181] : memref<2x8x128xf32, #tpu.memory_space<vmem>>, vector<1x8x128xf32>
    %581 = vector.shape_cast %580 : vector<1x8x128xf32> to vector<8x128xf32>
    %582 = vector.shape_cast %528 : vector<8x128xf32> to vector<1x8x128xf32>
    tpu.vector_store %arg13[%c0_179, %c0_180, %c0_181], %582 {strides = array<i32>} : memref<2x8x128xf32, #tpu.memory_space<vmem>>, vector<1x8x128xf32>,
    %c1_182 = arith.constant 1 : index
    %c0_183 = arith.constant 0 : index
    %c0_184 = arith.constant 0 : index
    %583 = vector.load %arg13[%c1_182, %c0_183, %c0_184] : memref<2x8x128xf32, #tpu.memory_space<vmem>>, vector<1x8x128xf32>
    %584 = vector.shape_cast %583 : vector<1x8x128xf32> to vector<8x128xf32>
    %585 = vector.shape_cast %561 : vector<8x128xf32> to vector<1x8x128xf32>
    tpu.vector_store %arg13[%c1_182, %c0_183, %c0_184], %585 {strides = array<i32>} : memref<2x8x128xf32, #tpu.memory_space<vmem>>, vector<1x8x128xf32>,
    return
  }
}

</mosaic_0001>

<bundles_post_ra>
// kernel: tpu_custom_call.1
= control target key start
LH: loop header
LB: loop body
LE: loop exit
PB: predicated region body
PF: predicated region fallthrough
CT: control target
= control target key end

     0   :  { %19 = vsyncpa [#allocation5], 0  ;;  %s12506_s0 = inlined_call_operand.vmem [shape: s32[64,1], index: 0, kind: input, shape index: {}]   ;;  %s12507_s1 = inlined_call_operand.vmem [shape: f32[2,8,128], index: 1, kind: input, shape index: {}]   ;;  %s12508_s2 = inlined_call_operand.vmem [shape: f32[2,8,128], index: 2, kind: input, shape index: {}]   ;;  %s12509_s3 = inlined_call_operand.hbm [shape: bf16[256,512], index: 3, kind: input, shape index: {}]   ;;  %s12510_s4 = inlined_call_operand.hbm [shape: bf16[128,512], index: 4, kind: input, shape index: {}]   ;;  %s12511_s5 = inlined_call_operand.vmem [shape: f32[1,512], index: 5, kind: input, shape index: {}]   ;;  %s12512_s6 = inlined_call_operand.hbm [shape: bf16[128,512], index: 6, kind: input, shape index: {}]   ;;  %s12513_s7 = inlined_call_operand.hbm [shape: bf16[128,512], index: 7, kind: input, shape index: {}]   ;;  %s12514_s8 = inlined_call_operand.vmem [shape: f32[8,512], index: 8, kind: input, shape index: {}]   ;;  %s12515_s9 = inlined_call_operand.hbm [shape: bf16[128,256], index: 9, kind: input, shape index: {}]   ;;  %s12516_s10 = inlined_call_operand.vmem [shape: f32[1,256], index: 10, kind: input, shape index: {}]   ;;  %s12517_s11 = inlined_call_operand.hbm [shape: f32[64,256], index: 11, kind: output, shape index: {0}]   ;;  %s12518_s12 = inlined_call_operand.hbm [shape: f32[2,8,128], index: 12, kind: output, shape index: {1}]   ;;  %s12519_s13 = inlined_call_operand.hbm [shape: f32[2,8,128], index: 13, kind: output, shape index: {2}]  }
   0x1   :  { %20 = vsyncpa [#allocation8], 0 }
   0x2   :  { %21 = vsyncpa [#allocation11], 0 }
   0x3   :  { %22 = vsyncpa [#allocation6], 0 }
   0x4   :  { %23 = vsyncpa [#allocation15], 0  ;;  %s10294_s25 = smov [#allocation7]   ;;  %s10295_s27 = smov [#allocation10]  }
   0x5   :  { %s47_s26 = sshll.u32 %s10294_s25, 4  ;;  %s73_s28 = sshll.u32 %s10295_s27, 4  ;;  %s48_s26 = int_to_ptr.vmem [resolvable:$true] %s47_s26  ;;  %s10378_s28 = int_to_ptr.vmem [resolvable:$true] %s73_s28 }
   0x6   :  { %s10108_s14 = scalar_lea.hbm %s12510_s4, 4096 }
   0x7   :  { %p10109_p0 = scmp.ne.s32.totalorder %s12510_s4, %s10108_s14  ;;  %p10112_p1 = scmp.lt.u32.totalorder %s10108_s14, %s12510_s4 }
   0x9   :  { %p10114_p2 = pnand %p10112_p1, %p10109_p0 }
   0xb   :  { %10117 = shalt.err (!%p10114_p2)
}
   0xc   :  { %s10118_s19 = scalar_lea.vmem %s48_s26, 4096  ;;  %p10123_p4 = scmp.lt.s32.totalorder %s48_s26, %s48_s26 }
   0xd   :  { %p10119_p3 = scmp.ne.s32.totalorder %s48_s26, %s10118_s19  ;;  %p10124_p5 = scmp.lt.s32.totalorder %s10118_s19, %s10118_s19 }
   0xf   :  { %p10125_p6 = por %p10124_p5, %p10123_p4 }
  0x11   :  { %p10126_p7 = pnand %p10125_p6, %p10119_p3 }
  0x13   :  { %10129 = shalt.err (!%p10126_p7)
}
  0x14   :  { %s10296_s20 = smov 256   ;;  %s10297_s21 = smov 16  }
  0x15   :  { %53 = dma.hbm_to_vmem [thread:$0]  %s12510_s4, 4096, %s48_s26, [#allocation8], %s10296_s20, %s10296_s20, %s10297_s21  }
  0x16   :  { %s10130_s27 = scalar_lea.hbm %s12513_s7, 4096 }
  0x17   :  { %p10131_p8 = scmp.ne.s32.totalorder %s12513_s7, %s10130_s27  ;;  %p10134_p9 = scmp.lt.u32.totalorder %s10130_s27, %s12513_s7 }
  0x19   :  { %p10136_p10 = pnand %p10134_p9, %p10131_p8 }
  0x1b   :  { %10139 = shalt.err (!%p10136_p10)
}
  0x1c   :  { %s10140_s16 = scalar_lea.vmem %s10378_s28, 4096  ;;  %p10145_p12 = scmp.lt.s32.totalorder %s10378_s28, %s10378_s28 }
  0x1d   :  { %p10141_p11 = scmp.ne.s32.totalorder %s10378_s28, %s10140_s16  ;;  %p10146_p13 = scmp.lt.s32.totalorder %s10140_s16, %s10140_s16 }
  0x1f   :  { %p10147_p0 = por %p10146_p13, %p10145_p12 }
  0x21   :  { %p10148_p1 = pnand %p10147_p0, %p10141_p11 }
  0x23   :  { %10151 = shalt.err (!%p10148_p1)
}
  0x24   :  { %79 = dma.hbm_to_vmem [thread:$0]  %s12513_s7, 4096, %s10378_s28, [#allocation11], %s10296_s20, %s10296_s20, %s10297_s21  }
  0x25   :  { %s10298_s17 = smov [#allocation4]   ;;  %s10299_s19 = smov [#allocation9]  }
  0x26   :  { %s35_s18 = sshll.u32 %s10298_s17, 4  ;;  %s61_s22 = sshll.u32 %s10299_s19, 4  ;;  %s36_s18 = int_to_ptr.vmem [resolvable:$true] %s35_s18  ;;  %s10415_s22 = int_to_ptr.vmem [resolvable:$true] %s61_s22 }
  0x27   :  { %s10152_s25 = scalar_lea.hbm %s12509_s3, 8192 }
  0x28   :  { %p10153_p2 = scmp.ne.s32.totalorder %s12509_s3, %s10152_s25  ;;  %p10156_p3 = scmp.lt.u32.totalorder %s10152_s25, %s12509_s3 }
  0x2a   :  { %p10158_p4 = pnand %p10156_p3, %p10153_p2 }
  0x2c   :  { %10161 = shalt.err (!%p10158_p4)
}
  0x2d   :  { %s10162_s7 = scalar_lea.vmem %s36_s18, 8192  ;;  %p10167_p6 = scmp.lt.s32.totalorder %s36_s18, %s36_s18 }
  0x2e   :  { %p10163_p5 = scmp.ne.s32.totalorder %s36_s18, %s10162_s7  ;;  %p10168_p7 = scmp.lt.s32.totalorder %s10162_s7, %s10162_s7 }
  0x30   :  { %p10169_p8 = por %p10168_p7, %p10167_p6 }
  0x32   :  { %p10170_p9 = pnand %p10169_p8, %p10163_p5 }
  0x34   :  { %10173 = shalt.err (!%p10170_p9)
}
  0x35   :  { %41 = dma.hbm_to_vmem [thread:$0]  %s12509_s3, 8192, %s36_s18, [#allocation5], %s10296_s20, %s10296_s20, %s10297_s21  }
  0x36   :  { %s10174_s26 = scalar_lea.hbm %s12512_s6, 4096 }
  0x37   :  { %p10175_p10 = scmp.ne.s32.totalorder %s12512_s6, %s10174_s26  ;;  %p10178_p11 = scmp.lt.u32.totalorder %s10174_s26, %s12512_s6 }
  0x39   :  { %p10180_p12 = pnand %p10178_p11, %p10175_p10 }
  0x3b   :  { %10183 = shalt.err (!%p10180_p12)
}
  0x3c   :  { %s10184_s25 = scalar_lea.vmem %s10415_s22, 4096  ;;  %p10189_p0 = scmp.lt.s32.totalorder %s10415_s22, %s10415_s22 }
  0x3d   :  { %p10185_p13 = scmp.ne.s32.totalorder %s10415_s22, %s10184_s25  ;;  %p10190_p1 = scmp.lt.s32.totalorder %s10184_s25, %s10184_s25 }
  0x3f   :  { %p10191_p2 = por %p10190_p1, %p10189_p0 }
  0x41   :  { %p10192_p3 = pnand %p10191_p2, %p10185_p13 }
  0x43   :  { %10195 = shalt.err (!%p10192_p3)
}
  0x44   :  { %67 = dma.hbm_to_vmem [thread:$0]  %s12512_s6, 4096, %s10415_s22, [#allocation8], %s10296_s20, %s10296_s20, %s10297_s21  }
  0x45   :  { %s10300_s27 = smov [#allocation12]   ;;  %s10196_s7 = scalar_lea.hbm %s12515_s9, 2048 }
  0x46   :  { %s87_s29 = sshll.u32 %s10300_s27, 4  ;;  %p10197_p4 = scmp.ne.s32.totalorder %s12515_s9, %s10196_s7  ;;  %s88_s29 = int_to_ptr.vmem [resolvable:$true] %s87_s29 }
  0x47   :  { %p10200_p5 = scmp.lt.u32.totalorder %s10196_s7, %s12515_s9 }
  0x49   :  { %p10202_p6 = pnand %p10200_p5, %p10197_p4 }
  0x4b   :  { %10205 = shalt.err (!%p10202_p6)
}
  0x4c   :  { %s10206_s26 = scalar_lea.vmem %s88_s29, 2048  ;;  %p10211_p8 = scmp.lt.s32.totalorder %s88_s29, %s88_s29 }
  0x4d   :  { %p10207_p7 = scmp.ne.s32.totalorder %s88_s29, %s10206_s26  ;;  %p10212_p9 = scmp.lt.s32.totalorder %s10206_s26, %s10206_s26 }
  0x4f   :  { %p10213_p10 = por %p10212_p9, %p10211_p8 }
  0x51   :  { %p10214_p11 = pnand %p10213_p10, %p10207_p7 }
  0x53   :  { %10217 = shalt.err (!%p10214_p11)
}
  0x54   :  { %s10301_s6 = smov 128   ;;  %s10302_s22 = smov 8  }
  0x55   :  { %93 = dma.hbm_to_vmem [thread:$0]  %s12515_s9, 2048, %s88_s29, [#allocation11], %s10301_s6, %s10301_s6, %s10302_s22  }
  0x56   :  { %10284 = dma.done.wait [#allocation5], 8192  }
  0x57   :  { %10285 = vsyncadd [#allocation5], 4294959104 }
  0x58   :  { %10286 = dma.done.wait [#allocation8], 8192  }
  0x59   :  { %10287 = vsyncadd [#allocation8], 4294959104 }
  0x5a   :  { %10288 = dma.done.wait [#allocation11], 6144  }
  0x5b   :  { %10289 = vsyncadd [#allocation11], 4294961152  ;;  %v12521_v0 = vmov 0   ;;  %v114_v1 = vld [vmem:[%s12506_s0 + $0x10] sm:$0xff]  ;;  %v112_v2 = vld [vmem:[%s12506_s0] sm:$0xff] }
  0x5c   :  { %9142 = vset.pattern.permute.xlu1 %v12521_v0  ;;  %9141 = vset.pattern.permute.xlu0 %v12521_v0  ;;  %v115_v3 = vld [vmem:[%s12506_s0 + $0x18] sm:$0xff]  ;;  %v113_v4 = vld [vmem:[%s12506_s0 + $0x8] sm:$0xff]  ;;  %v116_v7 = vld [vmem:[%s12506_s0 + $0x20] sm:$0xff] }
  0x5d   :  { %130 = vperm.xlu1 %9142, %v114_v1   ;;  %124 = vperm.xlu0 %9141, %v112_v2   ;;  %v9143_v5 = vld [vmem:[#allocation4 + $0xc] ss:$16 sps:$4 sm:$0xff]   ;;  %v9145_v8 = vld [vmem:[#allocation4 + $0x4] ss:$16 sps:$4 sm:$0xff]   ;;  %v9147_v9 = vld [vmem:[#allocation4 + $0x8] ss:$16 sps:$4 sm:$0xff]  }
  0x5e   :  { %v117_v6 = vld [vmem:[%s12506_s0 + $0x28] sm:$0xff]  ;;  %v9148_v10 = vld [vmem:[#allocation4] ss:$16 sps:$4 sm:$0xff]   ;;  %682 = vmatprep.subr.bf16.mxu1 %v9143_v5  ;;  %609 = vmatprep.subr.bf16.mxu0 %v9145_v8  ;;  %v9151_v12 = vld [vmem:[#allocation4 + $0x24] ss:$16 sps:$4 sm:$0xff]  }
  0x5f   :  { %v9149_v11 = vld [vmem:[#allocation4 + $0x2c] ss:$16 sps:$4 sm:$0xff]   ;;  %683 = vmatpush1.bf16.msra.mxu1 %v9147_v9  ;;  %610 = vmatpush1.bf16.msra.mxu0 %v9148_v10  ;;  %v9153_v13 = vld [vmem:[#allocation4 + $0x28] ss:$16 sps:$4 sm:$0xff]   ;;  %v9154_v14 = vld [vmem:[#allocation4 + $0x20] ss:$16 sps:$4 sm:$0xff]  }
  0x60   :  { %v119_v15 = vld [vmem:[%s12506_s0 + $0x38] sm:$0xff]  ;;  %684 = vmatprep.subr.bf16.mxu1 %v9149_v11  ;;  %v9157_v17 = vld [vmem:[#allocation4 + $0x44] ss:$16 sps:$4 sm:$0xff]   ;;  %611 = vmatprep.subr.bf16.mxu0 %v9151_v12  ;;  %v9160_v20 = vld [vmem:[#allocation4 + $0x40] ss:$16 sps:$4 sm:$0xff]   ;;  %v12520_v11 = vlaneseq }
  0x61   :  { %133 = vperm.xlu1 %9142, %v115_v3   ;;  %127 = vperm.xlu0 %9141, %v113_v4   ;;  %v9155_v16 = vld [vmem:[#allocation4 + $0x4c] ss:$16 sps:$4 sm:$0xff]   ;;  %v118_v18 = vld [vmem:[%s12506_s0 + $0x30] sm:$0xff]  ;;  %v9159_v19 = vld [vmem:[#allocation4 + $0x48] ss:$16 sps:$4 sm:$0xff]  }
  0x62   :  { %v9161_v21 = vld [vmem:[#allocation4 + $0x6c] ss:$16 sps:$4 sm:$0xff]   ;;  %v9163_v22 = vld [vmem:[#allocation4 + $0x64] ss:$16 sps:$4 sm:$0xff]   ;;  %v9165_v23 = vld [vmem:[#allocation4 + $0x68] ss:$16 sps:$4 sm:$0xff]  }
  0x63   :  { %685 = vmatpush1.bf16.msra.mxu1 %v9153_v13  ;;  %612 = vmatpush1.bf16.msra.mxu0 %v9154_v14  ;;  %v9166_v24 = vld [vmem:[#allocation4 + $0x60] ss:$16 sps:$4 sm:$0xff]   ;;  %v9167_v25 = vld [vmem:[#allocation4 + $0x8c] ss:$16 sps:$4 sm:$0xff]   ;;  %v9169_v26 = vld [vmem:[#allocation4 + $0x84] ss:$16 sps:$4 sm:$0xff]  }
  0x64   :  { %686 = vmatprep.subr.bf16.mxu1 %v9155_v16  ;;  %613 = vmatprep.subr.bf16.mxu0 %v9157_v17  ;;  %v9171_v27 = vld [vmem:[#allocation4 + $0x88] ss:$16 sps:$4 sm:$0xff]   ;;  %v9172_v28 = vld [vmem:[#allocation4 + $0x80] ss:$16 sps:$4 sm:$0xff]   ;;  %v9173_v29 = vld [vmem:[#allocation4 + $0xac] ss:$16 sps:$4 sm:$0xff]  }
  0x65   :  { %139 = vperm.xlu1 %9142, %v117_v6   ;;  %136 = vperm.xlu0 %9141, %v116_v7   ;;  %v9175_v30 = vld [vmem:[#allocation4 + $0xa4] ss:$16 sps:$4 sm:$0xff]   ;;  %v9177_v31 = vld [vmem:[#allocation4 + $0xa8] ss:$16 sps:$4 sm:$0xff]   ;;  %v9178_v32 = vld [vmem:[#allocation4 + $0xa0] ss:$16 sps:$4 sm:$0xff]  }
  0x66   :  { %v9179_v33 = vld [vmem:[#allocation4 + $0xcc] ss:$16 sps:$4 sm:$0xff]   ;;  %v9181_v34 = vld [vmem:[#allocation4 + $0xc4] ss:$16 sps:$4 sm:$0xff]   ;;  %v9183_v35 = vld [vmem:[#allocation4 + $0xc8] ss:$16 sps:$4 sm:$0xff]  }
  0x67   :  { %687 = vmatpush1.bf16.msra.mxu1 %v9159_v19  ;;  %614 = vmatpush1.bf16.msra.mxu0 %v9160_v20  ;;  %v9184_v36 = vld [vmem:[#allocation4 + $0xc0] ss:$16 sps:$4 sm:$0xff]   ;;  %v9185_v37 = vld [vmem:[#allocation4 + $0xec] ss:$16 sps:$4 sm:$0xff]   ;;  %v9187_v38 = vld [vmem:[#allocation4 + $0xe4] ss:$16 sps:$4 sm:$0xff]  }
  0x68   :  { %688 = vmatprep.subr.bf16.mxu1 %v9161_v21  ;;  %615 = vmatprep.subr.bf16.mxu0 %v9163_v22  ;;  %v9189_v39 = vld [vmem:[#allocation4 + $0xe8] ss:$16 sps:$4 sm:$0xff]   ;;  %v9190_v40 = vld [vmem:[#allocation4 + $0xe0] ss:$16 sps:$4 sm:$0xff]   ;;  %v9191_v41 = vld [vmem:[#allocation4 + $0x10c] ss:$16 sps:$4 sm:$0xff]  }
  0x69   :  { %145 = vperm.xlu1 %9142, %v119_v15   ;;  %142 = vperm.xlu0 %9141, %v118_v18   ;;  %v9193_v42 = vld [vmem:[#allocation4 + $0x104] ss:$16 sps:$4 sm:$0xff]   ;;  %v9195_v43 = vld [vmem:[#allocation4 + $0x108] ss:$16 sps:$4 sm:$0xff]   ;;  %v9196_v44 = vld [vmem:[#allocation4 + $0x100] ss:$16 sps:$4 sm:$0xff]  }
  0x6a   :  { %v9197_v45 = vld [vmem:[#allocation4 + $0x12c] ss:$16 sps:$4 sm:$0xff]   ;;  %v9199_v46 = vld [vmem:[#allocation4 + $0x124] ss:$16 sps:$4 sm:$0xff]   ;;  %v9201_v47 = vld [vmem:[#allocation4 + $0x128] ss:$16 sps:$4 sm:$0xff]  }
  0x6b   :  { %689 = vmatpush1.bf16.msra.mxu1 %v9165_v23  ;;  %616 = vmatpush1.bf16.msra.mxu0 %v9166_v24  ;;  %v9202_v48 = vld [vmem:[#allocation4 + $0x120] ss:$16 sps:$4 sm:$0xff]   ;;  %v9203_v49 = vld [vmem:[#allocation4 + $0x14c] ss:$16 sps:$4 sm:$0xff]   ;;  %v9205_v50 = vld [vmem:[#allocation4 + $0x144] ss:$16 sps:$4 sm:$0xff]  }
  0x6c   :  { %690 = vmatprep.subr.bf16.mxu1 %v9167_v25  ;;  %617 = vmatprep.subr.bf16.mxu0 %v9169_v26  ;;  %v9207_v51 = vld [vmem:[#allocation4 + $0x148] ss:$16 sps:$4 sm:$0xff]   ;;  %v9208_v52 = vld [vmem:[#allocation4 + $0x140] ss:$16 sps:$4 sm:$0xff]   ;;  %v9209_v53 = vld [vmem:[#allocation4 + $0x16c] ss:$16 sps:$4 sm:$0xff]  }
  0x6d   :  { %v9211_v54 = vld [vmem:[#allocation4 + $0x164] ss:$16 sps:$4 sm:$0xff]   ;;  %v9213_v55 = vld [vmem:[#allocation4 + $0x168] ss:$16 sps:$4 sm:$0xff]   ;;  %v9214_v56 = vld [vmem:[#allocation4 + $0x160] ss:$16 sps:$4 sm:$0xff]  }
  0x6e   :  { %v9215_v57 = vld [vmem:[#allocation4 + $0x18c] ss:$16 sps:$4 sm:$0xff]   ;;  %v9217_v58 = vld [vmem:[#allocation4 + $0x184] ss:$16 sps:$4 sm:$0xff]   ;;  %v9219_v59 = vld [vmem:[#allocation4 + $0x188] ss:$16 sps:$4 sm:$0xff]  }
  0x6f   :  { %691 = vmatpush1.bf16.msra.mxu1 %v9171_v27  ;;  %618 = vmatpush1.bf16.msra.mxu0 %v9172_v28  ;;  %v9220_v60 = vld [vmem:[#allocation4 + $0x180] ss:$16 sps:$4 sm:$0xff]   ;;  %v9221_v61 = vld [vmem:[#allocation4 + $0x1ac] ss:$16 sps:$4 sm:$0xff]   ;;  %v9223_v62 = vld [vmem:[#allocation4 + $0x1a4] ss:$16 sps:$4 sm:$0xff]  }
  0x70   :  { %692 = vmatprep.subr.bf16.mxu1 %v9173_v29  ;;  %619 = vmatprep.subr.bf16.mxu0 %v9175_v30  ;;  %v9225_v63 = vld [vmem:[#allocation4 + $0x1a8] ss:$16 sps:$4 sm:$0xff]   ;;  %v9226_v1 = vld [vmem:[#allocation4 + $0x1a0] ss:$16 sps:$4 sm:$0xff]   ;;  %v9227_v2 = vld [vmem:[#allocation4 + $0x1cc] ss:$16 sps:$4 sm:$0xff]  }
  0x71   :  { %v9229_v3 = vld [vmem:[#allocation4 + $0x1c4] ss:$16 sps:$4 sm:$0xff]   ;;  %v9231_v4 = vld [vmem:[#allocation4 + $0x1c8] ss:$16 sps:$4 sm:$0xff]   ;;  %v9232_v5 = vld [vmem:[#allocation4 + $0x1c0] ss:$16 sps:$4 sm:$0xff]  }
  0x72   :  { %v9233_v6 = vld [vmem:[#allocation4 + $0x1ec] ss:$16 sps:$4 sm:$0xff]   ;;  %v9235_v7 = vld [vmem:[#allocation4 + $0x1e4] ss:$16 sps:$4 sm:$0xff]   ;;  %v9237_v8 = vld [vmem:[#allocation4 + $0x1e8] ss:$16 sps:$4 sm:$0xff]  }
  0x73   :  { %693 = vmatpush1.bf16.msra.mxu1 %v9177_v31  ;;  %620 = vmatpush1.bf16.msra.mxu0 %v9178_v32  ;;  %v9238_v9 = vld [vmem:[#allocation4 + $0x1e0] ss:$16 sps:$4 sm:$0xff]   ;;  %v9241_v10 = vld [vmem:[#allocation7 + $0x4] ss:$16 sps:$4 sm:$0xff]   ;;  %v121_v12 = vand.u32 127, %v12520_v11 }
  0x74   :  { %694 = vmatprep.subr.bf16.mxu1 %v9179_v33  ;;  %621 = vmatprep.subr.bf16.mxu0 %v9181_v34  ;;  %v9239_v18 = vld [vmem:[#allocation7] ss:$16 sps:$4 sm:$0xff]   ;;  %v9244_v20 = vld [vmem:[#allocation7 + $0x24] ss:$16 sps:$4 sm:$0xff]   ;;  %v10304_v23 = vmov 1.0|1.0  }
  0x75   :  { %v122_v15 = vadd.s32 128, %v121_v12  ;;  %v9242_v24 = vld [vmem:[#allocation7 + $0x20] ss:$16 sps:$4 sm:$0xff]   ;;  %v9247_v25 = vld [vmem:[#allocation7 + $0x44] ss:$16 sps:$4 sm:$0xff]  }
  0x76   :  { %v10502_v28 = vld [vmem:[#allocation7 + $0x40] ss:$16 sps:$4 sm:$0xff]   ;;  %v10504_v29 = vld [vmem:[#allocation7 + $0x64] ss:$16 sps:$4 sm:$0xff]   ;;  %v10702_v30 = vld [vmem:[#allocation10 + $0xec] ss:$16 sps:$4 sm:$0xff]  }
  0x77   :  { %695 = vmatpush1.bf16.msra.mxu1 %v9183_v35  ;;  %622 = vmatpush1.bf16.msra.mxu0 %v9184_v36  ;;  %v10510_v31 = vld [vmem:[#allocation7 + $0x60] ss:$16 sps:$4 sm:$0xff]   ;;  %v10516_v33 = vld [vmem:[#allocation7 + $0x84] ss:$16 sps:$4 sm:$0xff]   ;;  %12738 = vst [vmem:[#allocation39_spill] sm:$0xff] %v10702_v30  ;;  %v8293_v36 = vld [vmem:[%s12507_s1 + $0x8] sm:$0xff] }
  0x78   :  { %696 = vmatprep.subr.bf16.mxu1 %v9185_v37  ;;  %623 = vmatprep.subr.bf16.mxu0 %v9187_v38  ;;  %v10520_v34 = vld [vmem:[#allocation7 + $0x80] ss:$16 sps:$4 sm:$0xff]   ;;  %v10522_v35 = vld [vmem:[#allocation7 + $0xa4] ss:$16 sps:$4 sm:$0xff]   ;;  %v10705_v32 = vld [vmem:[#allocation10 + $0xe8] ss:$16 sps:$4 sm:$0xff]  }
  0x79   :  { %v10530_v37 = vld [vmem:[#allocation7 + $0xa0] ss:$16 sps:$4 sm:$0xff]   ;;  %v10536_v38 = vld [vmem:[#allocation7 + $0xc4] ss:$16 sps:$4 sm:$0xff]   ;;  %12739 = vst [vmem:[#allocation40_spill] sm:$0xff] %v10705_v32 }
  0x7a   :  { %v10676_v19 = vld [vmem:[#allocation10 + $0xa0] ss:$16 sps:$4 sm:$0xff]   ;;  %v10715_v11 = vld [vmem:[#allocation9 + $0xc] ss:$16 sps:$4 sm:$0xff]  }
  0x7b   :  { %697 = vmatpush1.bf16.msra.mxu1 %v9189_v39  ;;  %624 = vmatpush1.bf16.msra.mxu0 %v9190_v40  ;;  %v10544_v39 = vld [vmem:[#allocation7 + $0xc0] ss:$16 sps:$4 sm:$0xff]   ;;  %v10546_v40 = vld [vmem:[#allocation7 + $0xe4] ss:$16 sps:$4 sm:$0xff]   ;;  %12729 = vst [vmem:[#allocation30_spill] sm:$0xff] %v10676_v19  ;;  %12741 = vst [vmem:[#allocation42_spill] sm:$0xff] %v10715_v11 }
  0x7c   :  { %698 = vmatprep.subr.bf16.mxu1 %v9191_v41  ;;  %625 = vmatprep.subr.bf16.mxu0 %v9193_v42  ;;  %v10550_v41 = vld [vmem:[#allocation7 + $0xe0] ss:$16 sps:$4 sm:$0xff]  }
  0x7d   :  { %v791_v42 = vld [vmem:[%s12507_s1] sm:$0xff] }
  0x7f   :  { %699 = vmatpush1.bf16.msra.mxu1 %v9195_v43  ;;  %626 = vmatpush1.bf16.msra.mxu0 %v9196_v44  ;;  %v10559_v43 = vld [vmem:[#allocation7 + $0xc] ss:$16 sps:$4 sm:$0xff]   ;;  %v10565_v44 = vld [vmem:[#allocation7 + $0x8] ss:$16 sps:$4 sm:$0xff]  }
  0x80   :  { %700 = vmatprep.subr.bf16.mxu1 %v9197_v45  ;;  %627 = vmatprep.subr.bf16.mxu0 %v9199_v46  ;;  %v804_v45 = vpack.c.bf16 %v791_v42, %v791_v42  ;;  %v10567_v46 = vld [vmem:[#allocation7 + $0x2c] ss:$16 sps:$4 sm:$0xff]   ;;  %v1140_v42 = vpack.c.bf16 %v8293_v36, %v8293_v36 }
  0x81   :  { %v10727_v36 = vld [vmem:[#allocation9 + $0x2c] ss:$16 sps:$4 sm:$0xff]  }
  0x82   :  { %12745 = vst [vmem:[#allocation46_spill] sm:$0xff] %v10727_v36 }
  0x83   :  { %701 = vmatpush1.bf16.msra.mxu1 %v9201_v47  ;;  %628 = vmatpush1.bf16.msra.mxu0 %v9202_v48  ;;  %v10571_v47 = vld [vmem:[#allocation7 + $0x28] ss:$16 sps:$4 sm:$0xff]   ;;  %v10573_v48 = vld [vmem:[#allocation7 + $0x4c] ss:$16 sps:$4 sm:$0xff]  }
  0x84   :  { %702 = vmatprep.subr.bf16.mxu1 %v9203_v49  ;;  %629 = vmatprep.subr.bf16.mxu0 %v9205_v50  ;;  %v10578_v49 = vld [vmem:[#allocation7 + $0x48] ss:$16 sps:$4 sm:$0xff]   ;;  %v10580_v50 = vld [vmem:[#allocation7 + $0x6c] ss:$16 sps:$4 sm:$0xff]  }
  0x87   :  { %703 = vmatpush1.bf16.msra.mxu1 %v9207_v51  ;;  %630 = vmatpush1.bf16.msra.mxu0 %v9208_v52  ;;  %v10584_v51 = vld [vmem:[#allocation7 + $0x68] ss:$16 sps:$4 sm:$0xff]   ;;  %v10586_v52 = vld [vmem:[#allocation7 + $0x8c] ss:$16 sps:$4 sm:$0xff]  }
  0x88   :  { %704 = vmatprep.subr.bf16.mxu1 %v9209_v53  ;;  %631 = vmatprep.subr.bf16.mxu0 %v9211_v54  ;;  %v10590_v53 = vld [vmem:[#allocation7 + $0x88] ss:$16 sps:$4 sm:$0xff]   ;;  %v10592_v54 = vld [vmem:[#allocation7 + $0xac] ss:$16 sps:$4 sm:$0xff]  }
  0x8b   :  { %705 = vmatpush1.bf16.msra.mxu1 %v9213_v55  ;;  %632 = vmatpush1.bf16.msra.mxu0 %v9214_v56  ;;  %v10596_v55 = vld [vmem:[#allocation7 + $0xa8] ss:$16 sps:$4 sm:$0xff]   ;;  %v10598_v56 = vld [vmem:[#allocation7 + $0xcc] ss:$16 sps:$4 sm:$0xff]  }
  0x8c   :  { %706 = vmatprep.subr.bf16.mxu1 %v9215_v57  ;;  %633 = vmatprep.subr.bf16.mxu0 %v9217_v58  ;;  %v10603_v57 = vld [vmem:[#allocation7 + $0xc8] ss:$16 sps:$4 sm:$0xff]   ;;  %v10606_v58 = vld [vmem:[#allocation7 + $0xec] ss:$16 sps:$4 sm:$0xff]  }
  0x8f   :  { %707 = vmatpush1.bf16.msra.mxu1 %v9219_v59  ;;  %634 = vmatpush1.bf16.msra.mxu0 %v9220_v60  ;;  %v10609_v59 = vld [vmem:[#allocation7 + $0xe8] ss:$16 sps:$4 sm:$0xff]   ;;  %v10614_v60 = vld [vmem:[#allocation10] ss:$16 sps:$4 sm:$0xff]  }
  0x90   :  { %708 = vmatprep.subr.bf16.mxu1 %v9221_v61  ;;  %635 = vmatprep.subr.bf16.mxu0 %v9223_v62  ;;  %v10616_v61 = vld [vmem:[#allocation10 + $0x4] ss:$16 sps:$4 sm:$0xff]   ;;  %v10620_v62 = vld [vmem:[#allocation10 + $0xc] ss:$16 sps:$4 sm:$0xff]  }
  0x93   :  { %709 = vmatpush1.bf16.msra.mxu1 %v9225_v63  ;;  %636 = vmatpush1.bf16.msra.mxu0 %v9226_v1  ;;  %v10622_v63 = vld [vmem:[#allocation10 + $0x8] ss:$16 sps:$4 sm:$0xff]   ;;  %v10626_v1 = vld [vmem:[#allocation10 + $0x24] ss:$16 sps:$4 sm:$0xff]  }
  0x94   :  { %710 = vmatprep.subr.bf16.mxu1 %v9227_v2  ;;  %637 = vmatprep.subr.bf16.mxu0 %v9229_v3  ;;  %v10628_v2 = vld [vmem:[#allocation10 + $0x20] ss:$16 sps:$4 sm:$0xff]   ;;  %v10630_v3 = vld [vmem:[#allocation10 + $0x2c] ss:$16 sps:$4 sm:$0xff]  }
  0x97   :  { %711 = vmatpush1.bf16.msra.mxu1 %v9231_v4  ;;  %638 = vmatpush1.bf16.msra.mxu0 %v9232_v5  ;;  %v10633_v4 = vld [vmem:[#allocation10 + $0x28] ss:$16 sps:$4 sm:$0xff]   ;;  %v10638_v5 = vld [vmem:[#allocation10 + $0x44] ss:$16 sps:$4 sm:$0xff]  }
  0x98   :  { %712 = vmatprep.subr.bf16.mxu1 %v9233_v6  ;;  %639 = vmatprep.subr.bf16.mxu0 %v9235_v7  ;;  %v10640_v6 = vld [vmem:[#allocation10 + $0x40] ss:$16 sps:$4 sm:$0xff]   ;;  %v10642_v7 = vld [vmem:[#allocation10 + $0x4c] ss:$16 sps:$4 sm:$0xff]  }
  0x9b   :  { %713 = vmatpush1.bf16.msra.mxu1 %v9237_v8  ;;  %640 = vmatpush1.bf16.msra.mxu0 %v9238_v9  ;;  %v10645_v8 = vld [vmem:[#allocation10 + $0x48] ss:$16 sps:$4 sm:$0xff]   ;;  %v10650_v9 = vld [vmem:[#allocation10 + $0x64] ss:$16 sps:$4 sm:$0xff]  }
  0x9c   :  { %997 = vmatprep.subr.bf16.mxu1 %v9241_v10  ;;  %1333 = vmatprep.subr.bf16.mxu0 %v10616_v61  ;;  %v10652_v10 = vld [vmem:[#allocation10 + $0x60] ss:$16 sps:$4 sm:$0xff]  }
  0x9d   :  { %12721 = vst [vmem:[#allocation22_spill] sm:$0xff] %v10652_v10 }
  0xdc   :  { %v131_v13 = vpop.permute.xlu1 %130  ;;  %v125_v14 = vpop.permute.xlu0 %124 }
  0xdd   :  { %vm152_vm0 = vcmp.eq.s32.totalorder %v122_v15, %v131_v13  ;;  %vm147_vm4 = vcmp.eq.s32.totalorder %v121_v12, %v125_v14  ;;  %vm148_vm7 = vcmp.eq.s32.totalorder %v122_v15, %v125_v14  ;;  %vm151_vm9 = vcmp.eq.s32.totalorder %v121_v12, %v131_v13  ;;  %v10657_v13 = vld [vmem:[#allocation10 + $0x68] ss:$16 sps:$4 sm:$0xff]   ;;  %v10662_v14 = vld [vmem:[#allocation10 + $0x84] ss:$16 sps:$4 sm:$0xff]  }
  0xde   :  { %12723 = vst [vmem:[#allocation24_spill] sm:$0xff] %v10657_v13  ;;  %12724 = vst [vmem:[#allocation25_spill] sm:$0xff] %v10662_v14 }
  0xe0   :  { %v134_v16 = vpop.permute.xlu1 %133  ;;  %v128_v17 = vpop.permute.xlu0 %127 }
  0xe1   :  { %vm154_vm1 = vcmp.eq.s32.totalorder %v122_v15, %v134_v16  ;;  %vm149_vm2 = vcmp.eq.s32.totalorder %v121_v12, %v128_v17  ;;  %vm150_vm3 = vcmp.eq.s32.totalorder %v122_v15, %v128_v17  ;;  %vm153_vm10 = vcmp.eq.s32.totalorder %v121_v12, %v134_v16  ;;  %v10666_v16 = vld [vmem:[#allocation10 + $0x8c] ss:$16 sps:$4 sm:$0xff]   ;;  %v10669_v17 = vld [vmem:[#allocation10 + $0x88] ss:$16 sps:$4 sm:$0xff]  }
  0xe2   :  { %vm10494_vm5 = vmpackc.low %vm154_vm1, %vm152_vm0  ;;  %12726 = vst [vmem:[#allocation27_spill] sm:$0xff] %v10666_v16 }
  0xe3   :  { %vm8263_vm6 = vmpackc.low %vm149_vm2, %vm147_vm4  ;;  %12727 = vst [vmem:[#allocation28_spill] sm:$0xff] %v10669_v17 }
  0xe4   :  { %v140_v21 = vpop.permute.xlu1 %139  ;;  %v137_v22 = vpop.permute.xlu0 %136  ;;  %vm8261_vm8 = vmpackc.low %vm150_vm3, %vm148_vm7 }
  0xe5   :  { %8262 = vmatprep.mubr.msk.bf16.mxu0 %vm8261_vm8, %v10304_v23  ;;  %8278 = vmatprep.mubr.msk.bf16.mxu1 %vm8261_vm8, %v10304_v23  ;;  %vm158_vm11 = vcmp.eq.s32.totalorder %v122_v15, %v140_v21  ;;  %vm156_vm12 = vcmp.eq.s32.totalorder %v122_v15, %v137_v22  ;;  %vm8267_vm13 = vmpackc.low %vm153_vm10, %vm151_vm9  ;;  %vm157_vm14 = vcmp.eq.s32.totalorder %v121_v12, %v140_v21  ;;  %v10681_v21 = vld [vmem:[#allocation10 + $0xa8] ss:$16 sps:$4 sm:$0xff]  }
  0xe6   :  { %8264 = vmatmul.mubr.msk.bf16.vlgmr.msra.gmra.mrb[0].mxu0 %vm8263_vm6, %v10304_v23  ;;  %8280 = vmatmul.mubr.msk.bf16.vlgmr.msra.gmra.mrb[0].mxu1 %vm8263_vm6, %v10304_v23  ;;  %vm155_vm15 = vcmp.eq.s32.totalorder %v121_v12, %v137_v22  ;;  %vm8269_vm0 = vmpackc.low %vm158_vm11, %vm156_vm12  ;;  %12731 = vst [vmem:[#allocation32_spill] sm:$0xff] %v10681_v21  ;;  %v10686_v22 = vld [vmem:[#allocation10 + $0xc4] ss:$16 sps:$4 sm:$0xff]  }
  0xe7   :  { %998 = vmatpush1.bf16.msra.mxu1 %v9239_v18  ;;  %8266 = vmatprep.mubr.msk.bf16.mxu0 %vm10494_vm5, %v10304_v23  ;;  %vm10506_vm3 = vmpackc.low %vm157_vm14, %vm155_vm15  ;;  %v10674_v18 = vld [vmem:[#allocation10 + $0xa4] ss:$16 sps:$4 sm:$0xff]   ;;  %12732 = vst [vmem:[#allocation33_spill] sm:$0xff] %v10686_v22 }
  0xe8   :  { %8282 = vmatprep.mubr.msk.bf16.mxu1 %vm10494_vm5, %v10304_v23  ;;  %999 = vmatprep.subr.bf16.mxu1 %v9244_v20  ;;  %v146_v26 = vpop.permute.xlu1 %145  ;;  %v143_v27 = vpop.permute.xlu0 %142  ;;  %12728 = vst [vmem:[#allocation29_spill] sm:$0xff] %v10674_v18  ;;  %v10678_v20 = vld [vmem:[#allocation10 + $0xac] ss:$16 sps:$4 sm:$0xff]  }
  0xe9   :  { %vm162_vm1 = vcmp.eq.s32.totalorder %v122_v15, %v146_v26  ;;  %vm160_vm2 = vcmp.eq.s32.totalorder %v122_v15, %v143_v27  ;;  %vm161_vm5 = vcmp.eq.s32.totalorder %v121_v12, %v146_v26  ;;  %vm159_vm6 = vcmp.eq.s32.totalorder %v121_v12, %v143_v27  ;;  %1334 = vmatpush1.bf16.msra.mxu0 %v10614_v60  ;;  %v10654_v12 = vld [vmem:[#allocation10 + $0x6c] ss:$16 sps:$4 sm:$0xff]   ;;  %v10664_v15 = vld [vmem:[#allocation10 + $0x80] ss:$16 sps:$4 sm:$0xff]   ;;  %v10698_v26 = vld [vmem:[#allocation10 + $0xe4] ss:$16 sps:$4 sm:$0xff]  }
  0xea   :  { %vm10512_vm4 = vmpackc.low %vm162_vm1, %vm160_vm2  ;;  %1335 = vmatprep.subr.bf16.mxu0 %v10626_v1  ;;  %12722 = vst [vmem:[#allocation23_spill] sm:$0xff] %v10654_v12  ;;  %v10700_v27 = vld [vmem:[#allocation10 + $0xe0] ss:$16 sps:$4 sm:$0xff]  }
  0xeb   :  { %1000 = vmatpush1.bf16.msra.mxu1 %v9242_v24  ;;  %vm10526_vm7 = vmpackc.low %vm161_vm5, %vm159_vm6  ;;  %12725 = vst [vmem:[#allocation26_spill] sm:$0xff] %v10664_v15  ;;  %v10690_v24 = vld [vmem:[#allocation10 + $0xcc] ss:$16 sps:$4 sm:$0xff]  }
  0xec   :  { %1001 = vmatprep.subr.bf16.mxu1 %v9247_v25  ;;  %12730 = vst [vmem:[#allocation31_spill] sm:$0xff] %v10678_v20  ;;  %12734 = vst [vmem:[#allocation35_spill] sm:$0xff] %v10690_v24  ;;  %v10693_v25 = vld [vmem:[#allocation10 + $0xc8] ss:$16 sps:$4 sm:$0xff]  }
  0xed   :  { %1336 = vmatpush1.bf16.msra.mxu0 %v10628_v2  ;;  %12735 = vst [vmem:[#allocation36_spill] sm:$0xff] %v10693_v25  ;;  %12736 = vst [vmem:[#allocation37_spill] sm:$0xff] %v10698_v26 }
  0xee   :  { %8268 = vmatmul.mubr.msk.bf16.gmra.mrb[4].mxu0 %vm8267_vm13, %v10304_v23  ;;  %8284 = vmatmul.mubr.msk.bf16.gmra.mrb[4].mxu1 %vm8267_vm13, %v10304_v23  ;;  %12737 = vst [vmem:[#allocation38_spill] sm:$0xff] %v10700_v27 }
  0xef   :  { %1002 = vmatpush1.bf16.msra.mxu1 %v10502_v28  ;;  %8270 = vmatprep.mubr.msk.bf16.mxu0 %vm8269_vm0, %v10304_v23 }
  0xf0   :  { %8286 = vmatprep.mubr.msk.bf16.mxu1 %vm8269_vm0, %v10304_v23  ;;  %1003 = vmatprep.subr.bf16.mxu1 %v10504_v29 }
  0xf1   :  { %1337 = vmatprep.subr.bf16.mxu0 %v10638_v5 }
  0xf2   :  { %1338 = vmatpush1.bf16.msra.mxu0 %v10640_v6 }
  0xf3   :  { %1004 = vmatpush1.bf16.msra.mxu1 %v10510_v31  ;;  %1339 = vmatprep.subr.bf16.mxu0 %v10650_v9 }
  0xf4   :  { %1005 = vmatprep.subr.bf16.mxu1 %v10516_v33 }
  0xf6   :  { %8272 = vmatmul.mubr.msk.bf16.gmra.mrb[8].mxu0 %vm10506_vm3, %v10304_v23  ;;  %8288 = vmatmul.mubr.msk.bf16.gmra.mrb[8].mxu1 %vm10506_vm3, %v10304_v23 }
  0xf7   :  { %1006 = vmatpush1.bf16.msra.mxu1 %v10520_v34  ;;  %8274 = vmatprep.mubr.msk.bf16.mxu0 %vm10512_vm4, %v10304_v23 }
  0xf8   :  { %8290 = vmatprep.mubr.msk.bf16.mxu1 %vm10512_vm4, %v10304_v23  ;;  %1007 = vmatprep.subr.bf16.mxu1 %v10522_v35 }
  0xf9   :  { %1340 = vmatpush1.bf16.msra.mxu0 %v10652_v10 }
  0xfa   :  { %1341 = vmatprep.subr.bf16.mxu0 %v10662_v14 }
  0xfb   :  { %1008 = vmatpush1.bf16.msra.mxu1 %v10530_v37 }
  0xfc   :  { %1009 = vmatprep.subr.bf16.mxu1 %v10536_v38 }
  0xfd   :  { %1342 = vmatpush1.bf16.msra.mxu0 %v10664_v15 }
  0xfe   :  { %8276 = vmatmul.mubr.msk.bf16.gmra.mrb[12].mxu0 %vm10526_vm7, %v10304_v23  ;;  %8292 = vmatmul.mubr.msk.bf16.gmra.mrb[12].mxu1 %vm10526_vm7, %v10304_v23  ;;  %v10688_v23 = vld [vmem:[#allocation10 + $0xc0] ss:$16 sps:$4 sm:$0xff]  }
  0xff   :  { %1010 = vmatpush1.bf16.msra.mxu1 %v10544_v39  ;;  %1029 = vmatprep.mubr.bf16.mxu1 %v12521_v0  ;;  %12733 = vst [vmem:[#allocation34_spill] sm:$0xff] %v10688_v23 }
 0x100   :  { %1011 = vmatprep.subr.bf16.mxu1 %v10546_v40  ;;  %1365 = vmatprep.mubr.bf16.mxu0 %v12521_v0 }
 0x101   :  { %1343 = vmatprep.subr.bf16.mxu0 %v10674_v18 }
 0x102   :  { %1344 = vmatpush1.bf16.msra.mxu0 %v10676_v19 }
 0x103   :  { %1012 = vmatpush1.bf16.msra.mxu1 %v10550_v41  ;;  %1345 = vmatprep.subr.bf16.mxu0 %v10686_v22 }
 0x104   :  { %1038 = vmatprep.subr.bf16.mxu1 %v10559_v43 }
 0x106   :  { %1030 = vmatmul.mubr.bf16.vlgmr.msra.gmra.mrb[16].mxu1 %v804_v45  ;;  %1346 = vmatpush1.bf16.msra.mxu0 %v10688_v23  ;;  %v10786_v23 = vld [vmem:[#allocation9 + $0xcc] ss:$16 sps:$4 sm:$0xff]  }
 0x107   :  { %1039 = vmatpush1.bf16.msra.mxu1 %v10565_v44  ;;  %1070 = vmatprep.mubr.bf16.mxu1 %v12521_v0  ;;  %12766 = vst [vmem:[#allocation66_spill] sm:$0xff] %v10786_v23 }
 0x108   :  { %1040 = vmatprep.subr.bf16.mxu1 %v10567_v46  ;;  %1347 = vmatprep.subr.bf16.mxu0 %v10698_v26  ;;  %v10719_v26 = vld [vmem:[#allocation9 + $0x8] ss:$16 sps:$4 sm:$0xff]  }
 0x109   :  { %12743 = vst [vmem:[#allocation44_spill] sm:$0xff] %v10719_v26 }
 0x10a   :  { %1348 = vmatpush1.bf16.msra.mxu0 %v10700_v27  ;;  %v12746_v27 = vmov 0  }
 0x10b   :  { %1041 = vmatpush1.bf16.msra.mxu1 %v10571_v47 }
 0x10c   :  { %1042 = vmatprep.subr.bf16.mxu1 %v10573_v48 }
 0x10d   :  { %1366 = vmatmul.mubr.bf16.vlgmr.msra.gmra.mrb[16].mxu0 %v1140_v42 }
 0x10e   :  { %1607 = vmatprep.mubr.bf16.mxu0 %v12746_v27 }
 0x10f   :  { %1043 = vmatpush1.bf16.msra.mxu1 %v10578_v49 }
 0x110   :  { %1044 = vmatprep.subr.bf16.mxu1 %v10580_v50 }
 0x113   :  { %1045 = vmatpush1.bf16.msra.mxu1 %v10584_v51 }
 0x114   :  { %1046 = vmatprep.subr.bf16.mxu1 %v10586_v52 }
 0x117   :  { %1047 = vmatpush1.bf16.msra.mxu1 %v10590_v53 }
 0x118   :  { %1048 = vmatprep.subr.bf16.mxu1 %v10592_v54 }
 0x11b   :  { %1049 = vmatpush1.bf16.msra.mxu1 %v10596_v55 }
 0x11c   :  { %1050 = vmatprep.subr.bf16.mxu1 %v10598_v56 }
 0x11f   :  { %1051 = vmatpush1.bf16.msra.mxu1 %v10603_v57 }
 0x120   :  { %1052 = vmatprep.subr.bf16.mxu1 %v10606_v58 }
 0x123   :  { %1053 = vmatpush1.bf16.msra.mxu1 %v10609_v59 }
 0x124   :  { %1374 = vmatprep.subr.bf16.mxu1 %v10620_v62 }
 0x126   :  { %1071 = vmatmul.mubr.bf16.vlgmr.msra.gmra.mrb[20].mxu1 %v804_v45  ;;  %v10713_v45 = vld [vmem:[#allocation9 + $0x4] ss:$16 sps:$4 sm:$0xff]  }
 0x127   :  { %1406 = vmatprep.mubr.bf16.mxu1 %v12521_v0  ;;  %1375 = vmatpush1.bf16.msra.mxu1 %v10622_v63  ;;  %12740 = vst [vmem:[#allocation41_spill] sm:$0xff] %v10713_v45  ;;  %v10717_v0 = vld [vmem:[#allocation9] ss:$16 sps:$4 sm:$0xff]  }
 0x128   :  { %1376 = vmatprep.subr.bf16.mxu1 %v10630_v3  ;;  %12742 = vst [vmem:[#allocation43_spill] sm:$0xff] %v10717_v0  ;;  %1575 = vmatprep.subr.bf16.mxu0 %v10713_v45  ;;  %v10783_v45 = vld [vmem:[#allocation9 + $0xc4] ss:$16 sps:$4 sm:$0xff]  }
 0x129   :  { %1576 = vmatpush1.bf16.msra.mxu0 %v10717_v0  ;;  %v10743_v0 = vld [vmem:[#allocation9 + $0x40] ss:$16 sps:$4 sm:$0xff]   ;;  %12765 = vst [vmem:[#allocation65_spill] sm:$0xff] %v10783_v45 }
 0x12a   :  { %12751 = vst [vmem:[#allocation51_spill] sm:$0xff] %v10743_v0 }
 0x12b   :  { %1377 = vmatpush1.bf16.msra.mxu1 %v10633_v4 }
 0x12c   :  { %1378 = vmatprep.subr.bf16.mxu1 %v10642_v7 }
 0x12f   :  { %1379 = vmatpush1.bf16.msra.mxu1 %v10645_v8 }
 0x130   :  { %1380 = vmatprep.subr.bf16.mxu1 %v10654_v12 }
 0x133   :  { %1381 = vmatpush1.bf16.msra.mxu1 %v10657_v13 }
 0x134   :  { %1382 = vmatprep.subr.bf16.mxu1 %v10666_v16 }
 0x137   :  { %1383 = vmatpush1.bf16.msra.mxu1 %v10669_v17 }
 0x138   :  { %1384 = vmatprep.subr.bf16.mxu1 %v10678_v20 }
 0x13b   :  { %1385 = vmatpush1.bf16.msra.mxu1 %v10681_v21 }
 0x13c   :  { %1386 = vmatprep.subr.bf16.mxu1 %v10690_v24 }
 0x13f   :  { %1387 = vmatpush1.bf16.msra.mxu1 %v10693_v25  ;;  %v10732_v25 = vld [vmem:[#allocation9 + $0x28] ss:$16 sps:$4 sm:$0xff]  }
 0x140   :  { %1388 = vmatprep.subr.bf16.mxu1 %v10702_v30  ;;  %v10730_v30 = vld [vmem:[#allocation9 + $0x20] ss:$16 sps:$4 sm:$0xff]   ;;  %12748 = vst [vmem:[#allocation48_spill] sm:$0xff] %v10732_v25 }
 0x141   :  { %12747 = vst [vmem:[#allocation47_spill] sm:$0xff] %v10730_v30 }
 0x143   :  { %1389 = vmatpush1.bf16.msra.mxu1 %v10705_v32  ;;  %v10725_v32 = vld [vmem:[#allocation9 + $0x24] ss:$16 sps:$4 sm:$0xff]  }
 0x144   :  { %1616 = vmatprep.subr.bf16.mxu1 %v10715_v11  ;;  %12744 = vst [vmem:[#allocation45_spill] sm:$0xff] %v10725_v32  ;;  %1577 = vmatprep.subr.bf16.mxu0 %v10725_v32  ;;  %v10745_v11 = vld [vmem:[#allocation9 + $0x48] ss:$16 sps:$4 sm:$0xff]  }
 0x145   :  { %1578 = vmatpush1.bf16.msra.mxu0 %v10730_v30  ;;  %12752 = vst [vmem:[#allocation52_spill] sm:$0xff] %v10745_v11  ;;  %v10753_v30 = vld [vmem:[#allocation9 + $0x6c] ss:$16 sps:$4 sm:$0xff]   ;;  %v10757_v32 = vld [vmem:[#allocation9 + $0x68] ss:$16 sps:$4 sm:$0xff]  }
 0x146   :  { %1407 = vmatmul.mubr.bf16.vlgmr.msra.gmra.mrb[24].mxu1 %v1140_v42  ;;  %v10739_v42 = vld [vmem:[#allocation9 + $0x44] ss:$16 sps:$4 sm:$0xff]   ;;  %12754 = vst [vmem:[#allocation54_spill] sm:$0xff] %v10753_v30  ;;  %12756 = vst [vmem:[#allocation56_spill] sm:$0xff] %v10757_v32 }
 0x147   :  { %1617 = vmatpush1.bf16.msra.mxu1 %v10719_v26  ;;  %1648 = vmatprep.mubr.bf16.mxu1 %v12746_v27  ;;  %12749 = vst [vmem:[#allocation49_spill] sm:$0xff] %v10739_v42  ;;  %v10741_v26 = vld [vmem:[#allocation9 + $0x4c] ss:$16 sps:$4 sm:$0xff]  }
 0x148   :  { %1618 = vmatprep.subr.bf16.mxu1 %v10727_v36  ;;  %12750 = vst [vmem:[#allocation50_spill] sm:$0xff] %v10741_v26  ;;  %1579 = vmatprep.subr.bf16.mxu0 %v10739_v42  ;;  %v10751_v36 = vld [vmem:[#allocation9 + $0x64] ss:$16 sps:$4 sm:$0xff]   ;;  %v10769_v42 = vld [vmem:[#allocation9 + $0x88] ss:$16 sps:$4 sm:$0xff]  }
 0x149   :  { %1580 = vmatpush1.bf16.msra.mxu0 %v10743_v0  ;;  %12753 = vst [vmem:[#allocation53_spill] sm:$0xff] %v10751_v36  ;;  %v10765_v0 = vld [vmem:[#allocation9 + $0x8c] ss:$16 sps:$4 sm:$0xff]   ;;  %12760 = vst [vmem:[#allocation60_spill] sm:$0xff] %v10769_v42 }
 0x14a   :  { %1581 = vmatprep.subr.bf16.mxu0 %v10751_v36  ;;  %12758 = vst [vmem:[#allocation58_spill] sm:$0xff] %v10765_v0  ;;  %v10781_v36 = vld [vmem:[#allocation9 + $0xac] ss:$16 sps:$4 sm:$0xff]  }
 0x14b   :  { %1619 = vmatpush1.bf16.msra.mxu1 %v10732_v25  ;;  %v10755_v25 = vld [vmem:[#allocation9 + $0x60] ss:$16 sps:$4 sm:$0xff]   ;;  %12764 = vst [vmem:[#allocation64_spill] sm:$0xff] %v10781_v36 }
 0x14c   :  { %1620 = vmatprep.subr.bf16.mxu1 %v10741_v26  ;;  %12755 = vst [vmem:[#allocation55_spill] sm:$0xff] %v10755_v25  ;;  %v10763_v26 = vld [vmem:[#allocation9 + $0x84] ss:$16 sps:$4 sm:$0xff]  }
 0x14d   :  { %1582 = vmatpush1.bf16.msra.mxu0 %v10755_v25  ;;  %12757 = vst [vmem:[#allocation57_spill] sm:$0xff] %v10763_v26  ;;  %v10777_v25 = vld [vmem:[#allocation9 + $0xa4] ss:$16 sps:$4 sm:$0xff]  }
 0x14e   :  { %1583 = vmatprep.subr.bf16.mxu0 %v10763_v26  ;;  %12762 = vst [vmem:[#allocation62_spill] sm:$0xff] %v10777_v25  ;;  %v10799_v26 = vld [vmem:[#allocation9 + $0xec] ss:$16 sps:$4 sm:$0xff]  }
 0x14f   :  { %1621 = vmatpush1.bf16.msra.mxu1 %v10745_v11  ;;  %v10767_v11 = vld [vmem:[#allocation9 + $0x80] ss:$16 sps:$4 sm:$0xff]   ;;  %12770 = vst [vmem:[#allocation70_spill] sm:$0xff] %v10799_v26 }
 0x150   :  { %1622 = vmatprep.subr.bf16.mxu1 %v10753_v30  ;;  %12759 = vst [vmem:[#allocation59_spill] sm:$0xff] %v10767_v11  ;;  %v10775_v30 = vld [vmem:[#allocation9 + $0xa0] ss:$16 sps:$4 sm:$0xff]  }
 0x151   :  { %1584 = vmatpush1.bf16.msra.mxu0 %v10767_v11  ;;  %12761 = vst [vmem:[#allocation61_spill] sm:$0xff] %v10775_v30  ;;  %v10790_v11 = vld [vmem:[#allocation9 + $0xc0] ss:$16 sps:$4 sm:$0xff]  }
 0x152   :  { %1585 = vmatprep.subr.bf16.mxu0 %v10777_v25  ;;  %12767 = vst [vmem:[#allocation67_spill] sm:$0xff] %v10790_v11  ;;  %v10802_v25 = vld [vmem:[#allocation9 + $0xe0] ss:$16 sps:$4 sm:$0xff]  }
 0x153   :  { %1623 = vmatpush1.bf16.msra.mxu1 %v10757_v32  ;;  %v10779_v32 = vld [vmem:[#allocation9 + $0xa8] ss:$16 sps:$4 sm:$0xff]   ;;  %12771 = vst [vmem:[#allocation71_spill] sm:$0xff] %v10802_v25 }
 0x154   :  { %1624 = vmatprep.subr.bf16.mxu1 %v10765_v0  ;;  %12763 = vst [vmem:[#allocation63_spill] sm:$0xff] %v10779_v32  ;;  %v10796_v0 = vld [vmem:[#allocation9 + $0xe4] ss:$16 sps:$4 sm:$0xff]  }
 0x155   :  { %1586 = vmatpush1.bf16.msra.mxu0 %v10775_v30  ;;  %12769 = vst [vmem:[#allocation69_spill] sm:$0xff] %v10796_v0  ;;  %v10806_v30 = vld [vmem:[#allocation9 + $0xe8] ss:$16 sps:$4 sm:$0xff]  }
 0x156   :  { %1587 = vmatprep.subr.bf16.mxu0 %v10783_v45  ;;  %12772 = vst [vmem:[#allocation72_spill] sm:$0xff] %v10806_v30  ;;  %v10095_v45 = vld [vmem:[#allocation7 + $0x4] ss:$16 sps:$4 sm:$0xff]  }
 0x157   :  { %1625 = vmatpush1.bf16.msra.mxu1 %v10769_v42  ;;  %v10794_v42 = vld [vmem:[#allocation9 + $0xc8] ss:$16 sps:$4 sm:$0xff]  }
 0x158   :  { %1626 = vmatprep.subr.bf16.mxu1 %v10781_v36  ;;  %12768 = vst [vmem:[#allocation68_spill] sm:$0xff] %v10794_v42 }
 0x159   :  { %1588 = vmatpush1.bf16.msra.mxu0 %v10790_v11 }
 0x15a   :  { %1589 = vmatprep.subr.bf16.mxu0 %v10796_v0  ;;  %v267_v0 = vld [vmem:[%s12511_s5] sm:$0xf] }
 0x15b   :  { %1627 = vmatpush1.bf16.msra.mxu1 %v10779_v32 }
 0x15c   :  { %1628 = vmatprep.subr.bf16.mxu1 %v10786_v23  ;;  %v12773_v23 = vlaneseq }
 0x15d   :  { %1590 = vmatpush1.bf16.msra.mxu0 %v10802_v25 }
 0x15e   :  { %1885 = vmatprep.subr.bf16.mxu0 %v10095_v45  ;;  %v10813_v11 = vshrl.u32 %v12773_v23, 7 }
 0x15f   :  { %1629 = vmatpush1.bf16.msra.mxu1 %v10794_v42 }
 0x160   :  { %1630 = vmatprep.subr.bf16.mxu1 %v10799_v26  ;;  %12774 = vst [vmem:[#allocation73_spill] sm:$0xff] %v10813_v11  ;;  %v12570_v32 = vsub.s32 0, %v10813_v11  ;;  %v279_v42 = vsub.s32 2, %v10813_v11  ;;  %v12575_v26 = vsub.s32 1, %v10813_v11  ;;  %v283_v25 = vsub.s32 3, %v10813_v11 }
 0x162   :  { %v10828_v23 = vrot.slane %v267_v0, %v279_v42  ;;  %v276_v22 = vrot.slane %v267_v0, %v12575_v26  ;;  %v10834_v21 = vrot.slane %v267_v0, %v283_v25 }
 0x163   :  { %1631 = vmatpush1.bf16.msra.mxu1 %v10806_v30 }
 0x164   :  { %1926 = vmatprep.subr.bf16.mxu1 %v10559_v43  ;;  %v272_v43 = vrot.slane %v267_v0, %v12570_v32 }
 0x1b9   :  { %v10822_v30 = vpop.f32.mrb[0].mxu0  ;;  %v10824_v45 = vpop.f32.mrb[0].mxu1 }
 0x1ba   :  { %v645_v36 = vpop.f32.mrb[1].mxu0  ;;  %v10830_v24 = vpop.f32.mrb[1].mxu1 }
 0x1bb   :  { %v647_v19 = vpop.f32.mrb[2].mxu0  ;;  %v720_v20 = vpop.f32.mrb[2].mxu1 }
 0x1bc   :  { %v10836_v18 = vadd.f32 %v647_v19, %v272_v43  ;;  %v10839_v17 = vadd.f32 %v720_v20, %v10828_v23  ;;  %v649_v15 = vpop.f32.mrb[3].mxu0  ;;  %v722_v16 = vpop.f32.mrb[3].mxu1 }
 0x1bd   :  { %v10841_v32 = vadd.f32 %v649_v15, %v276_v22  ;;  %v10844_v42 = vadd.f32 %v722_v16, %v10834_v21 }
 0x1be   :  { %12775 = vst [vmem:[#allocation74_spill] sm:$0xff] %v10836_v18  ;;  %12776 = vst [vmem:[#allocation75_spill] sm:$0xff] %v10839_v17 }
 0x1bf   :  { %12777 = vst [vmem:[#allocation76_spill] sm:$0xff] %v10841_v32  ;;  %12778 = vst [vmem:[#allocation77_spill] sm:$0xff] %v10844_v42 }
 0x1c1   :  { %v653_v14 = vpop.f32.mrb[4].mxu0  ;;  %v726_v13 = vpop.f32.mrb[4].mxu1 }
 0x1c2   :  { %v10846_v11 = vadd.f32 %v653_v14, %v272_v43  ;;  %v10849_v0 = vadd.f32 %v726_v13, %v10828_v23  ;;  %v655_v25 = vpop.f32.mrb[5].mxu0  ;;  %v728_v19 = vpop.f32.mrb[5].mxu1 }
 0x1c3   :  { %v10851_v26 = vadd.f32 %v655_v25, %v276_v22  ;;  %v10854_v20 = vadd.f32 %v728_v19, %v10834_v21  ;;  %v657_v17 = vpop.f32.mrb[6].mxu0  ;;  %v730_v15 = vpop.f32.mrb[6].mxu1 }
 0x1c4   :  { %12779 = vst [vmem:[#allocation78_spill] sm:$0xff] %v10846_v11  ;;  %12780 = vst [vmem:[#allocation79_spill] sm:$0xff] %v10849_v0  ;;  %v10856_v32 = vadd.f32 %v657_v17, %v272_v43  ;;  %v10859_v16 = vadd.f32 %v730_v15, %v10828_v23  ;;  %v659_v42 = vpop.f32.mrb[7].mxu0  ;;  %v732_v14 = vpop.f32.mrb[7].mxu1 }
 0x1c5   :  { %12781 = vst [vmem:[#allocation80_spill] sm:$0xff] %v10851_v26  ;;  %12782 = vst [vmem:[#allocation81_spill] sm:$0xff] %v10854_v20  ;;  %v10861_v11 = vadd.f32 %v659_v42, %v276_v22  ;;  %v10864_v13 = vadd.f32 %v732_v14, %v10834_v21 }
 0x1c6   :  { %12783 = vst [vmem:[#allocation82_spill] sm:$0xff] %v10856_v32  ;;  %12784 = vst [vmem:[#allocation83_spill] sm:$0xff] %v10859_v16 }
 0x1c7   :  { %12785 = vst [vmem:[#allocation84_spill] sm:$0xff] %v10861_v11  ;;  %12786 = vst [vmem:[#allocation85_spill] sm:$0xff] %v10864_v13 }
 0x1c9   :  { %v663_v0 = vpop.f32.mrb[8].mxu0  ;;  %v736_v25 = vpop.f32.mrb[8].mxu1 }
 0x1ca   :  { %v10866_v26 = vadd.f32 %v663_v0, %v272_v43  ;;  %v10869_v19 = vadd.f32 %v736_v25, %v10828_v23  ;;  %v665_v20 = vpop.f32.mrb[9].mxu0  ;;  %v738_v17 = vpop.f32.mrb[9].mxu1 }
 0x1cb   :  { %v10871_v32 = vadd.f32 %v665_v20, %v276_v22  ;;  %v10874_v15 = vadd.f32 %v738_v17, %v10834_v21  ;;  %v667_v16 = vpop.f32.mrb[10].mxu0  ;;  %v740_v42 = vpop.f32.mrb[10].mxu1 }
 0x1cc   :  { %12787 = vst [vmem:[#allocation86_spill] sm:$0xff] %v10866_v26  ;;  %12788 = vst [vmem:[#allocation87_spill] sm:$0xff] %v10869_v19  ;;  %v10876_v11 = vadd.f32 %v667_v16, %v272_v43  ;;  %v10879_v14 = vadd.f32 %v740_v42, %v10828_v23  ;;  %v669_v13 = vpop.f32.mrb[11].mxu0  ;;  %v742_v0 = vpop.f32.mrb[11].mxu1 }
 0x1cd   :  { %12789 = vst [vmem:[#allocation88_spill] sm:$0xff] %v10871_v32  ;;  %12790 = vst [vmem:[#allocation89_spill] sm:$0xff] %v10874_v15  ;;  %v10881_v26 = vadd.f32 %v669_v13, %v276_v22  ;;  %v10884_v25 = vadd.f32 %v742_v0, %v10834_v21 }
 0x1ce   :  { %12791 = vst [vmem:[#allocation90_spill] sm:$0xff] %v10876_v11  ;;  %12792 = vst [vmem:[#allocation91_spill] sm:$0xff] %v10879_v14 }
 0x1cf   :  { %12793 = vst [vmem:[#allocation92_spill] sm:$0xff] %v10881_v26  ;;  %12794 = vst [vmem:[#allocation93_spill] sm:$0xff] %v10884_v25 }
 0x1d1   :  { %v673_v19 = vpop.f32.mrb[12].mxu0  ;;  %v746_v20 = vpop.f32.mrb[12].mxu1 }
 0x1d2   :  { %v10886_v32 = vadd.f32 %v673_v19, %v272_v43  ;;  %v10889_v17 = vadd.f32 %v746_v20, %v10828_v23  ;;  %v675_v15 = vpop.f32.mrb[13].mxu0  ;;  %v748_v16 = vpop.f32.mrb[13].mxu1 }
 0x1d3   :  { %v10891_v11 = vadd.f32 %v675_v15, %v276_v22  ;;  %v10894_v42 = vadd.f32 %v748_v16, %v10834_v21  ;;  %v677_v14 = vpop.f32.mrb[14].mxu0  ;;  %v750_v13 = vpop.f32.mrb[14].mxu1  ;;  %v644_v15 = vadd.f32 %v10822_v30, %v272_v43 }
 0x1d4   :  { %12795 = vst [vmem:[#allocation94_spill] sm:$0xff] %v10886_v32  ;;  %12796 = vst [vmem:[#allocation95_spill] sm:$0xff] %v10889_v17  ;;  %v10896_v26 = vadd.f32 %v677_v14, %v272_v43  ;;  %v10899_v0 = vadd.f32 %v750_v13, %v10828_v23  ;;  %v679_v25 = vpop.f32.mrb[15].mxu0  ;;  %v752_v19 = vpop.f32.mrb[15].mxu1 }
 0x1d5   :  { %12797 = vst [vmem:[#allocation96_spill] sm:$0xff] %v10891_v11  ;;  %12798 = vst [vmem:[#allocation97_spill] sm:$0xff] %v10894_v42  ;;  %v10901_v32 = vadd.f32 %v679_v25, %v276_v22  ;;  %v10904_v20 = vadd.f32 %v752_v19, %v10834_v21  ;;  %v646_v11 = vadd.f32 %v645_v36, %v276_v22 }
 0x1d6   :  { %12799 = vst [vmem:[#allocation98_spill] sm:$0xff] %v10896_v26  ;;  %12800 = vst [vmem:[#allocation99_spill] sm:$0xff] %v10899_v0  ;;  %v717_v19 = vadd.f32 %v10824_v45, %v10828_v23  ;;  %v719_v22 = vadd.f32 %v10830_v24, %v10834_v21 }
 0x1d7   :  { %12801 = vst [vmem:[#allocation100_spill] sm:$0xff] %v10901_v32  ;;  %12802 = vst [vmem:[#allocation101_spill] sm:$0xff] %v10904_v20  ;;  %v11233_v20 = vld [vmem:[#allocation10 + $0xc4] ss:$16 sps:$4 sm:$0xff]  }
 0x1d9   :  { %v1031_v17 = vpop.f32.mrb[16].mxu1 }
 0x1da   :  { %v1079_v16 = vadd.f32 %v1031_v17, %v644_v15  ;;  %v1033_v42 = vpop.f32.mrb[17].mxu1  ;;  %v792_v17 = vld [vmem:[%s12508_s2] sm:$0xff] }
 0x1db   :  { %v1080_v18 = vadd.f32 %v1033_v42, %v646_v11  ;;  %v1035_v10 = vpop.f32.mrb[18].mxu1 }
 0x1dc   :  { %v1036_v14 = vpop.f32.mrb[19].mxu1  ;;  %v8327_v12 = vmul.f32 -1.442695, %v1079_v16 }
 0x1dd   :  { %v8328_v26 = vmul.f32 -1.442695, %v1080_v18 }
 0x1df   :  { %9839 = vpow2.f32 %v8328_v26 }
 0x1e0   :  { %9841 = vpow2.f32 %v8327_v12 }
 0x1e9   :  { %v9840_v13 = vpop.eup %9839 }
 0x1ea   :  { %v9842_v0 = vpop.eup %9841  ;;  %v1092_v25 = vadd.f32 1.0, %v9840_v13 }
 0x1eb   :  { %v1086_v32 = vadd.f32 1.0, %v9842_v0 }
 0x1ec   :  { %9843 = vrcp.f32 %v1092_v25  ;;  %v10096_v25 = vld [vmem:[#allocation7] ss:$16 sps:$4 sm:$0xff]  }
 0x1ed   :  { %9845 = vrcp.f32 %v1086_v32 }
 0x1f6   :  { %v9844_v43 = vpop.eup %9843 }
 0x1f7   :  { %v9846_v45 = vpop.eup %9845  ;;  %v1102_v42 = vmul.f32 %v9844_v43, %v792_v17 }
 0x1f9   :  { %v1072_v30 = vpop.f32.mrb[20].mxu1 }
 0x1fa   :  { %v1081_v36 = vadd.f32 %v1072_v30, %v717_v19  ;;  %v1074_v11 = vpop.f32.mrb[21].mxu1  ;;  %v10097_v19 = vld [vmem:[#allocation7 + $0x24] ss:$16 sps:$4 sm:$0xff]  }
 0x1fb   :  { %v1082_v10 = vadd.f32 %v1074_v11, %v719_v22  ;;  %v1076_v18 = vpop.f32.mrb[22].mxu1  ;;  %v10098_v22 = vld [vmem:[#allocation7 + $0x20] ss:$16 sps:$4 sm:$0xff]   ;;  %v10099_v30 = vld [vmem:[#allocation7 + $0x44] ss:$16 sps:$4 sm:$0xff]  }
 0x1fc   :  { %9847 = vtanh.f32 %v1081_v36  ;;  %v1077_v26 = vpop.f32.mrb[23].mxu1 }
 0x1fd   :  { %v8329_v12 = vmul.f32 -1.442695, %v1082_v10 }
 0x1ff   :  { %9849 = vpow2.f32 %v8329_v12 }
 0x206   :  { %v9848_v23 = vpop.eup %9847 }
 0x207   :  { %v1103_v21 = vmul.f32 %v9848_v23, %v9846_v45  ;;  %v10996_v45 = vld [vmem:[%s12514_s8 + $0x18] sm:$0xff] }
 0x209   :  { %v9850_v24 = vpop.eup %9849  ;;  %v10914_v0 = vadd.f32 %v1103_v21, %v1102_v42  ;;  %v11002_v42 = vld [vmem:[%s12514_s8 + $0x10] sm:$0xff] }
 0x20a   :  { %v1099_v15 = vadd.f32 1.0, %v9850_v24 }
 0x20b   :  { %9851 = vtanh.f32 %v10914_v0 }
 0x20c   :  { %9853 = vrcp.f32 %v1099_v15 }
 0x215   :  { %v9852_v32 = vpop.eup %9851 }
 0x216   :  { %v9854_v16 = vpop.eup %9853 }
 0x217   :  { %v1106_v14 = vmul.f32 %v9854_v16, %v9852_v32 }
 0x219   :  { %v1107_v13 = vpack.c.bf16 %v1106_v14, %v1106_v14 }
 0x21b   :  { %1608 = vmatmul.mubr.bf16.vlgmr.msra.gmra.mrb[20].mxu0 %v1107_v13  ;;  %1649 = vmatmul.mubr.bf16.vlgmr.msra.gmra.mrb[28].mxu1 %v1107_v13 }
 0x21c   :  { %1886 = vmatpush1.bf16.msra.mxu0 %v10096_v25  ;;  %1927 = vmatpush1.bf16.msra.mxu1 %v10565_v44 }
 0x21d   :  { %1887 = vmatprep.subr.bf16.mxu0 %v10097_v19  ;;  %1928 = vmatprep.subr.bf16.mxu1 %v10567_v46  ;;  %v1408_v46 = vpop.f32.mrb[24].mxu1  ;;  %v8294_v19 = vld [vmem:[%s12508_s2 + $0x8] sm:$0xff] }
 0x21e   :  { %1917 = vmatprep.mubr.bf16.mxu0 %v12746_v27  ;;  %1958 = vmatprep.mubr.bf16.mxu1 %v12746_v27 }
 0x220   :  { %1888 = vmatpush1.bf16.msra.mxu0 %v10098_v22  ;;  %1929 = vmatpush1.bf16.msra.mxu1 %v10571_v47 }
 0x221   :  { %1889 = vmatprep.subr.bf16.mxu0 %v10099_v30  ;;  %1930 = vmatprep.subr.bf16.mxu1 %v10573_v48  ;;  %v1410_v48 = vpop.f32.mrb[25].mxu1 }
 0x224   :  { %1890 = vmatpush1.bf16.msra.mxu0 %v10502_v28  ;;  %1931 = vmatpush1.bf16.msra.mxu1 %v10578_v49  ;;  %v12803_v28 = vld [vmem:[#allocation23_spill] sm:$0xff]  ;;  %v1412_v49 = vpop.f32.mrb[26].mxu1 }
 0x225   :  { %1891 = vmatprep.subr.bf16.mxu0 %v10504_v29  ;;  %1932 = vmatprep.subr.bf16.mxu1 %v10580_v50  ;;  %v12804_v29 = vld [vmem:[#allocation22_spill] sm:$0xff] }
 0x226   :  { %v12812_v50 = vld [vmem:[#allocation30_spill] sm:$0xff] }
 0x228   :  { %1892 = vmatpush1.bf16.msra.mxu0 %v10510_v31  ;;  %1933 = vmatpush1.bf16.msra.mxu1 %v10584_v51  ;;  %v12805_v31 = vld [vmem:[#allocation24_spill] sm:$0xff] }
 0x229   :  { %1893 = vmatprep.subr.bf16.mxu0 %v10516_v33  ;;  %1934 = vmatprep.subr.bf16.mxu1 %v10586_v52  ;;  %v12806_v33 = vld [vmem:[#allocation25_spill] sm:$0xff]  ;;  %v12813_v51 = vld [vmem:[#allocation32_spill] sm:$0xff]  ;;  %v1413_v52 = vpop.f32.mrb[27].mxu1 }
 0x22c   :  { %1894 = vmatpush1.bf16.msra.mxu0 %v10520_v34  ;;  %1935 = vmatpush1.bf16.msra.mxu1 %v10590_v53  ;;  %v12807_v34 = vld [vmem:[#allocation27_spill] sm:$0xff]  ;;  %v12814_v53 = vld [vmem:[#allocation33_spill] sm:$0xff] }
 0x22d   :  { %1895 = vmatprep.subr.bf16.mxu0 %v10522_v35  ;;  %1936 = vmatprep.subr.bf16.mxu1 %v10592_v54  ;;  %v1367_v35 = vpop.f32.mrb[16].mxu0  ;;  %v12815_v54 = vld [vmem:[#allocation35_spill] sm:$0xff] }
 0x230   :  { %1896 = vmatpush1.bf16.msra.mxu0 %v10530_v37  ;;  %1937 = vmatpush1.bf16.msra.mxu1 %v10596_v55  ;;  %v12808_v37 = vld [vmem:[#allocation26_spill] sm:$0xff] }
 0x231   :  { %1897 = vmatprep.subr.bf16.mxu0 %v10536_v38  ;;  %1938 = vmatprep.subr.bf16.mxu1 %v10598_v56  ;;  %v12809_v38 = vld [vmem:[#allocation28_spill] sm:$0xff]  ;;  %v12816_v55 = vld [vmem:[#allocation34_spill] sm:$0xff] }
 0x232   :  { %v12817_v56 = vld [vmem:[#allocation36_spill] sm:$0xff] }
 0x234   :  { %1898 = vmatpush1.bf16.msra.mxu0 %v10544_v39  ;;  %1939 = vmatpush1.bf16.msra.mxu1 %v10603_v57  ;;  %v1369_v39 = vpop.f32.mrb[17].mxu0  ;;  %v12818_v57 = vld [vmem:[#allocation37_spill] sm:$0xff] }
 0x235   :  { %1899 = vmatprep.subr.bf16.mxu0 %v10546_v40  ;;  %1940 = vmatprep.subr.bf16.mxu1 %v10606_v58  ;;  %v12810_v40 = vld [vmem:[#allocation29_spill] sm:$0xff]  ;;  %v1371_v44 = vpop.f32.mrb[18].mxu0  ;;  %v12819_v58 = vld [vmem:[#allocation39_spill] sm:$0xff] }
 0x236   :  { %v1372_v47 = vpop.f32.mrb[19].mxu0 }
 0x238   :  { %1900 = vmatpush1.bf16.msra.mxu0 %v10550_v41  ;;  %1941 = vmatpush1.bf16.msra.mxu1 %v10609_v59  ;;  %v12811_v41 = vld [vmem:[#allocation31_spill] sm:$0xff]  ;;  %v12820_v59 = vld [vmem:[#allocation38_spill] sm:$0xff] }
 0x239   :  { %2221 = vmatprep.subr.bf16.mxu0 %v10616_v61  ;;  %2262 = vmatprep.subr.bf16.mxu1 %v10620_v62  ;;  %v12822_v61 = vld [vmem:[#allocation41_spill] sm:$0xff]  ;;  %v12823_v62 = vld [vmem:[#allocation42_spill] sm:$0xff] }
 0x23b   :  { %1918 = vmatmul.mubr.bf16.vlgmr.msra.gmra.mrb[24].mxu0 %v1107_v13  ;;  %1959 = vmatmul.mubr.bf16.vlgmr.msra.gmra.mrb[32].mxu1 %v1107_v13 }
 0x23c   :  { %2222 = vmatpush1.bf16.msra.mxu0 %v10614_v60  ;;  %2263 = vmatpush1.bf16.msra.mxu1 %v10622_v63  ;;  %v12821_v60 = vld [vmem:[#allocation40_spill] sm:$0xff] }
 0x23d   :  { %2223 = vmatprep.subr.bf16.mxu0 %v10626_v1  ;;  %2264 = vmatprep.subr.bf16.mxu1 %v10630_v3  ;;  %v10984_v63 = vld [vmem:[%s12514_s8] sm:$0xff] }
 0x23e   :  { %2253 = vmatprep.mubr.bf16.mxu0 %v12746_v27  ;;  %2294 = vmatprep.mubr.bf16.mxu1 %v12746_v27 }
 0x240   :  { %2224 = vmatpush1.bf16.msra.mxu0 %v10628_v2  ;;  %2265 = vmatpush1.bf16.msra.mxu1 %v10633_v4 }
 0x241   :  { %2225 = vmatprep.subr.bf16.mxu0 %v10638_v5  ;;  %2266 = vmatprep.subr.bf16.mxu1 %v10642_v7  ;;  %v10989_v5 = vld [vmem:[%s12514_s8 + $0x8] sm:$0xff] }
 0x244   :  { %2226 = vmatpush1.bf16.msra.mxu0 %v10640_v6  ;;  %2267 = vmatpush1.bf16.msra.mxu1 %v10645_v8 }
 0x245   :  { %2227 = vmatprep.subr.bf16.mxu0 %v10650_v9  ;;  %2268 = vmatprep.subr.bf16.mxu1 %v12803_v28 }
 0x248   :  { %2228 = vmatpush1.bf16.msra.mxu0 %v12804_v29  ;;  %2269 = vmatpush1.bf16.msra.mxu1 %v12805_v31 }
 0x249   :  { %2229 = vmatprep.subr.bf16.mxu0 %v12806_v33  ;;  %2270 = vmatprep.subr.bf16.mxu1 %v12807_v34 }
 0x24c   :  { %2230 = vmatpush1.bf16.msra.mxu0 %v12808_v37  ;;  %2271 = vmatpush1.bf16.msra.mxu1 %v12809_v38  ;;  %v12825_v38 = vld [vmem:[#allocation75_spill] sm:$0xff] }
 0x24d   :  { %2231 = vmatprep.subr.bf16.mxu0 %v12810_v40  ;;  %2272 = vmatprep.subr.bf16.mxu1 %v12811_v41  ;;  %12880 = vst [vmem:[#allocation75_spill] sm:$0xff] %v11233_v20 }
 0x250   :  { %2232 = vmatpush1.bf16.msra.mxu0 %v12812_v50  ;;  %2273 = vmatpush1.bf16.msra.mxu1 %v12813_v51 }
 0x251   :  { %2233 = vmatprep.subr.bf16.mxu0 %v12814_v53  ;;  %2274 = vmatprep.subr.bf16.mxu1 %v12815_v54 }
 0x254   :  { %2234 = vmatpush1.bf16.msra.mxu0 %v12816_v55  ;;  %2275 = vmatpush1.bf16.msra.mxu1 %v12817_v56 }
 0x255   :  { %2235 = vmatprep.subr.bf16.mxu0 %v12818_v57  ;;  %2276 = vmatprep.subr.bf16.mxu1 %v12819_v58 }
 0x258   :  { %2236 = vmatpush1.bf16.msra.mxu0 %v12820_v59  ;;  %2277 = vmatpush1.bf16.msra.mxu1 %v12821_v60 }
 0x259   :  { %2463 = vmatprep.subr.bf16.mxu0 %v12822_v61  ;;  %2504 = vmatprep.subr.bf16.mxu1 %v12823_v62 }
 0x2ee   :  { %v1609_v1 = vpop.f32.mrb[20].mxu0  ;;  %v1650_v2 = vpop.f32.mrb[28].mxu1 }
 0x2ef   :  { %v1610_v3 = vadd.f32 %v1609_v1, %v1367_v35  ;;  %v1651_v4 = vadd.f32 %v1650_v2, %v1408_v46  ;;  %v1611_v6 = vpop.f32.mrb[21].mxu0  ;;  %v1652_v7 = vpop.f32.mrb[29].mxu1  ;;  %v12824_v35 = vld [vmem:[#allocation74_spill] sm:$0xff]  ;;  %v12826_v46 = vld [vmem:[#allocation76_spill] sm:$0xff] }
 0x2f0   :  { %v1612_v8 = vadd.f32 %v1611_v6, %v1369_v39  ;;  %v1653_v9 = vadd.f32 %v1652_v7, %v1410_v48  ;;  %v1613_v36 = vpop.f32.mrb[22].mxu0  ;;  %v1654_v11 = vpop.f32.mrb[30].mxu1  ;;  %v12827_v48 = vld [vmem:[#allocation77_spill] sm:$0xff]  ;;  %v12832_v7 = vld [vmem:[#allocation46_spill] sm:$0xff] }
 0x2f1   :  { %v1657_v10 = vadd.f32 %v1610_v3, %v10984_v63  ;;  %v1614_v18 = vpop.f32.mrb[23].mxu0  ;;  %v1655_v26 = vpop.f32.mrb[31].mxu1  ;;  %v1659_v24 = vadd.f32 %v1651_v4, %v11002_v42  ;;  %v12829_v3 = vld [vmem:[#allocation43_spill] sm:$0xff]  ;;  %v12830_v4 = vld [vmem:[#allocation44_spill] sm:$0xff]  ;;  %v12831_v6 = vld [vmem:[#allocation45_spill] sm:$0xff] }
 0x2f2   :  { %v1658_v12 = vadd.f32 %v1612_v8, %v10989_v5  ;;  %v1660_v23 = vadd.f32 %v1653_v9, %v10996_v45  ;;  %v12833_v8 = vld [vmem:[#allocation47_spill] sm:$0xff]  ;;  %v12834_v9 = vld [vmem:[#allocation48_spill] sm:$0xff]  ;;  %v12835_v36 = vld [vmem:[#allocation49_spill] sm:$0xff] }
 0x2f3   :  { %v8394_v43 = vmul.f32 -1.442695, %v1657_v10  ;;  %v12836_v11 = vld [vmem:[#allocation50_spill] sm:$0xff] }
 0x2f4   :  { %v8395_v17 = vmul.f32 -1.442695, %v1658_v12  ;;  %v8396_v21 = vmul.f32 -1.442695, %v1660_v23  ;;  %v12837_v12 = vld [vmem:[#allocation51_spill] sm:$0xff] }
 0x2f5   :  { %9855 = vpow2.f32 %v8394_v43  ;;  %v12838_v43 = vld [vmem:[#allocation52_spill] sm:$0xff] }
 0x2f6   :  { %9857 = vpow2.f32 %v8395_v17 }
 0x2f7   :  { %9859 = vpow2.f32 %v8396_v21 }
 0x2f8   :  { %9861 = vtanh.f32 %v1659_v24  ;;  %v12839_v24 = vld [vmem:[#allocation53_spill] sm:$0xff] }
 0x2ff   :  { %v9856_v15 = vpop.eup %9855 }
 0x300   :  { %v9858_v32 = vpop.eup %9857  ;;  %v1664_v16 = vadd.f32 1.0, %v9856_v15  ;;  %v12840_v15 = vld [vmem:[#allocation54_spill] sm:$0xff] }
 0x301   :  { %v1670_v14 = vadd.f32 1.0, %v9858_v32  ;;  %v9860_v13 = vpop.eup %9859 }
 0x302   :  { %9863 = vrcp.f32 %v1664_v16  ;;  %v9862_v25 = vpop.eup %9861  ;;  %v1677_v29 = vadd.f32 1.0, %v9860_v13  ;;  %v12842_v13 = vld [vmem:[#allocation56_spill] sm:$0xff] }
 0x303   :  { %9865 = vrcp.f32 %v1670_v14  ;;  %v12841_v14 = vld [vmem:[#allocation55_spill] sm:$0xff] }
 0x304   :  { %9867 = vrcp.f32 %v1677_v29  ;;  %v12849_v29 = vld [vmem:[#allocation61_spill] sm:$0xff] }
 0x30c   :  { %v9864_v22 = vpop.eup %9863 }
 0x30d   :  { %v9866_v30 = vpop.eup %9865  ;;  %v1681_v28 = vmul.f32 %v9864_v22, %v9862_v25  ;;  %v12843_v25 = vld [vmem:[#allocation57_spill] sm:$0xff]  ;;  %v12845_v22 = vld [vmem:[#allocation59_spill] sm:$0xff] }
 0x30e   :  { %v1680_v31 = vmul.f32 %v9866_v30, %v8294_v19  ;;  %v1919_v33 = vpop.f32.mrb[24].mxu0  ;;  %v1960_v34 = vpop.f32.mrb[32].mxu1  ;;  %v12844_v19 = vld [vmem:[#allocation58_spill] sm:$0xff]  ;;  %v12846_v30 = vld [vmem:[#allocation60_spill] sm:$0xff] }
 0x30f   :  { %v1967_v37 = vadd.f32 %v1919_v33, %v12824_v35  ;;  %v1969_v39 = vadd.f32 %v1960_v34, %v12825_v38  ;;  %v1921_v40 = vpop.f32.mrb[25].mxu0  ;;  %v1962_v41 = vpop.f32.mrb[33].mxu1  ;;  %v12851_v33 = vld [vmem:[#allocation65_spill] sm:$0xff]  ;;  %v12852_v34 = vld [vmem:[#allocation66_spill] sm:$0xff]  ;;  %v12853_v38 = vld [vmem:[#allocation67_spill] sm:$0xff] }
 0x310   :  { %v11010_v44 = vadd.f32 %v1681_v28, %v1680_v31  ;;  %v1968_v47 = vadd.f32 %v1921_v40, %v12826_v46  ;;  %v1970_v49 = vadd.f32 %v1962_v41, %v12827_v48  ;;  %v1923_v50 = vpop.f32.mrb[26].mxu0  ;;  %v1964_v51 = vpop.f32.mrb[34].mxu1  ;;  %v12847_v28 = vld [vmem:[#allocation62_spill] sm:$0xff]  ;;  %v12850_v31 = vld [vmem:[#allocation63_spill] sm:$0xff]  ;;  %v12855_v40 = vld [vmem:[#allocation69_spill] sm:$0xff] }
 0x311   :  { %v8429_v52 = vmul.f32 -1.442695, %v1967_v37  ;;  %v1924_v53 = vpop.f32.mrb[27].mxu0  ;;  %v1965_v54 = vpop.f32.mrb[35].mxu1  ;;  %v12856_v41 = vld [vmem:[#allocation70_spill] sm:$0xff]  ;;  %v12858_v50 = vld [vmem:[#allocation72_spill] sm:$0xff] }
 0x312   :  { %v8430_v55 = vmul.f32 -1.442695, %v1968_v47  ;;  %9869 = vtanh.f32 %v11010_v44  ;;  %v8431_v56 = vmul.f32 -1.442695, %v1970_v49  ;;  %v9868_v57 = vpop.eup %9867  ;;  %v11053_v47 = vld [vmem:[#allocation7 + $0x4] ss:$16 sps:$4 sm:$0xff]  }
 0x313   :  { %9871 = vpow2.f32 %v8429_v52  ;;  %v11055_v48 = vld [vmem:[#allocation7 + $0xc] ss:$16 sps:$4 sm:$0xff]   ;;  %v11059_v51 = vld [vmem:[#allocation7] ss:$16 sps:$4 sm:$0xff]   ;;  %v11061_v52 = vld [vmem:[#allocation7 + $0x8] ss:$16 sps:$4 sm:$0xff]  }
 0x314   :  { %9873 = vpow2.f32 %v8430_v55  ;;  %v12857_v49 = vld [vmem:[#allocation71_spill] sm:$0xff]  ;;  %v11067_v54 = vld [vmem:[#allocation7 + $0x24] ss:$16 sps:$4 sm:$0xff]  }
 0x315   :  { %9875 = vpow2.f32 %v8431_v56  ;;  %v11069_v55 = vld [vmem:[#allocation7 + $0x2c] ss:$16 sps:$4 sm:$0xff]   ;;  %v11075_v56 = vld [vmem:[#allocation7 + $0x20] ss:$16 sps:$4 sm:$0xff]  }
 0x316   :  { %9877 = vtanh.f32 %v1969_v39  ;;  %v12854_v39 = vld [vmem:[#allocation68_spill] sm:$0xff] }
 0x31c   :  { %v9870_v58 = vpop.eup %9869 }
 0x31d   :  { %v9872_v59 = vpop.eup %9871  ;;  %v11015_v60 = vmul.f32 %v9870_v58, %v9868_v57  ;;  %v11077_v57 = vld [vmem:[#allocation7 + $0x28] ss:$16 sps:$4 sm:$0xff]   ;;  %v11081_v58 = vld [vmem:[#allocation7 + $0x44] ss:$16 sps:$4 sm:$0xff]  }
 0x31e   :  { %v9874_v61 = vpop.eup %9873  ;;  %v1974_v62 = vadd.f32 1.0, %v9872_v59  ;;  %v11083_v59 = vld [vmem:[#allocation7 + $0x4c] ss:$16 sps:$4 sm:$0xff]  }
 0x31f   :  { %12828 = vst [vmem:[#allocation23_spill] sm:$0xff] %v11015_v60  ;;  %v1980_v1 = vadd.f32 1.0, %v9874_v61  ;;  %v2028_v2 = vpack.c.bf16 %v11015_v60, %v11015_v60  ;;  %v9876_v10 = vpop.eup %9875  ;;  %v11089_v61 = vld [vmem:[#allocation7 + $0x40] ss:$16 sps:$4 sm:$0xff]   ;;  %v11227_v60 = vld [vmem:[#allocation10 + $0xa8] ss:$16 sps:$4 sm:$0xff]  }
 0x320   :  { %9879 = vrcp.f32 %v1974_v62  ;;  %v9878_v18 = vpop.eup %9877  ;;  %v1987_v21 = vadd.f32 1.0, %v9876_v10  ;;  %v11091_v62 = vld [vmem:[#allocation7 + $0x48] ss:$16 sps:$4 sm:$0xff]   ;;  %v11125_v10 = vld [vmem:[#allocation7 + $0xa0] ss:$16 sps:$4 sm:$0xff]   ;;  %12879 = vst [vmem:[#allocation74_spill] sm:$0xff] %v11227_v60 }
 0x321   :  { %9881 = vrcp.f32 %v1980_v1  ;;  %2254 = vmatmul.mubr.bf16.vlgmr.msra.gmra.mrb[28].mxu0 %v2028_v2  ;;  %2295 = vmatmul.mubr.bf16.vlgmr.msra.gmra.mrb[36].mxu1 %v2028_v2  ;;  %v11095_v1 = vld [vmem:[#allocation7 + $0x64] ss:$16 sps:$4 sm:$0xff]   ;;  %v11097_v2 = vld [vmem:[#allocation7 + $0x6c] ss:$16 sps:$4 sm:$0xff]  }
 0x322   :  { %2464 = vmatpush1.bf16.msra.mxu0 %v12829_v3  ;;  %2505 = vmatpush1.bf16.msra.mxu1 %v12830_v4  ;;  %9883 = vrcp.f32 %v1987_v21  ;;  %v11101_v3 = vld [vmem:[#allocation7 + $0x60] ss:$16 sps:$4 sm:$0xff]   ;;  %v11103_v4 = vld [vmem:[#allocation7 + $0x68] ss:$16 sps:$4 sm:$0xff]   ;;  %v11145_v21 = vld [vmem:[#allocation7 + $0xec] ss:$16 sps:$4 sm:$0xff]  }
 0x323   :  { %2465 = vmatprep.subr.bf16.mxu0 %v12831_v6  ;;  %2506 = vmatprep.subr.bf16.mxu1 %v12832_v7  ;;  %v11107_v6 = vld [vmem:[#allocation7 + $0x84] ss:$16 sps:$4 sm:$0xff]   ;;  %v11109_v7 = vld [vmem:[#allocation7 + $0x8c] ss:$16 sps:$4 sm:$0xff]  }
 0x324   :  { %2495 = vmatprep.mubr.bf16.mxu0 %v12746_v27  ;;  %2536 = vmatprep.mubr.bf16.mxu1 %v12746_v27 }
 0x326   :  { %2466 = vmatpush1.bf16.msra.mxu0 %v12833_v8  ;;  %2507 = vmatpush1.bf16.msra.mxu1 %v12834_v9  ;;  %v11113_v8 = vld [vmem:[#allocation7 + $0x80] ss:$16 sps:$4 sm:$0xff]   ;;  %v11115_v9 = vld [vmem:[#allocation7 + $0x88] ss:$16 sps:$4 sm:$0xff]  }
 0x327   :  { %2467 = vmatprep.subr.bf16.mxu0 %v12835_v36  ;;  %2508 = vmatprep.subr.bf16.mxu1 %v12836_v11  ;;  %v11119_v36 = vld [vmem:[#allocation7 + $0xa4] ss:$16 sps:$4 sm:$0xff]   ;;  %v11121_v11 = vld [vmem:[#allocation7 + $0xac] ss:$16 sps:$4 sm:$0xff]  }
 0x32a   :  { %v9880_v26 = vpop.eup %9879  ;;  %2468 = vmatpush1.bf16.msra.mxu0 %v12837_v12  ;;  %2509 = vmatpush1.bf16.msra.mxu1 %v12838_v43  ;;  %v11133_v12 = vld [vmem:[#allocation7 + $0xcc] ss:$16 sps:$4 sm:$0xff]   ;;  %v11137_v43 = vld [vmem:[#allocation7 + $0xc0] ss:$16 sps:$4 sm:$0xff]  }
 0x32b   :  { %v9882_v17 = vpop.eup %9881  ;;  %v1991_v23 = vmul.f32 %v9880_v26, %v9878_v18  ;;  %2469 = vmatprep.subr.bf16.mxu0 %v12839_v24  ;;  %2510 = vmatprep.subr.bf16.mxu1 %v12840_v15  ;;  %v11127_v18 = vld [vmem:[#allocation7 + $0xa8] ss:$16 sps:$4 sm:$0xff]   ;;  %v11131_v26 = vld [vmem:[#allocation7 + $0xc4] ss:$16 sps:$4 sm:$0xff]   ;;  %v11149_v24 = vld [vmem:[#allocation7 + $0xe0] ss:$16 sps:$4 sm:$0xff]  }
 0x32c   :  { %v1990_v32 = vmul.f32 %v9882_v17, %v10914_v0  ;;  %v12848_v0 = vld [vmem:[#allocation64_spill] sm:$0xff]  ;;  %v9884_v35 = vpop.eup %9883  ;;  %v11139_v17 = vld [vmem:[#allocation7 + $0xc8] ss:$16 sps:$4 sm:$0xff]  }
 0x32d   :  { %v11151_v15 = vld [vmem:[#allocation7 + $0xe8] ss:$16 sps:$4 sm:$0xff]  }
 0x32e   :  { %v11034_v16 = vadd.f32 %v1991_v23, %v1990_v32  ;;  %2470 = vmatpush1.bf16.msra.mxu0 %v12841_v14  ;;  %2511 = vmatpush1.bf16.msra.mxu1 %v12842_v13  ;;  %v11143_v23 = vld [vmem:[#allocation7 + $0xe4] ss:$16 sps:$4 sm:$0xff]   ;;  %v11163_v14 = vld [vmem:[#allocation10 + $0xc] ss:$16 sps:$4 sm:$0xff]   ;;  %v11165_v13 = vld [vmem:[#allocation10] ss:$16 sps:$4 sm:$0xff]  }
 0x32f   :  { %2471 = vmatprep.subr.bf16.mxu0 %v12843_v25  ;;  %2512 = vmatprep.subr.bf16.mxu1 %v12844_v19  ;;  %v11161_v32 = vld [vmem:[#allocation10 + $0x4] ss:$16 sps:$4 sm:$0xff]   ;;  %v11167_v25 = vld [vmem:[#allocation10 + $0x8] ss:$16 sps:$4 sm:$0xff]  }
 0x330   :  { %9885 = vtanh.f32 %v11034_v16  ;;  %12859 = vst [vmem:[#allocation22_spill] sm:$0xff] %v11167_v25  ;;  %v11173_v19 = vld [vmem:[#allocation10 + $0x24] ss:$16 sps:$4 sm:$0xff]  }
 0x331   :  { %12860 = vst [vmem:[#allocation24_spill] sm:$0xff] %v11173_v19 }
 0x332   :  { %2472 = vmatpush1.bf16.msra.mxu0 %v12845_v22  ;;  %2513 = vmatpush1.bf16.msra.mxu1 %v12846_v30  ;;  %v11175_v22 = vld [vmem:[#allocation10 + $0x2c] ss:$16 sps:$4 sm:$0xff]   ;;  %v11177_v30 = vld [vmem:[#allocation10 + $0x20] ss:$16 sps:$4 sm:$0xff]  }
 0x333   :  { %2473 = vmatprep.subr.bf16.mxu0 %v12847_v28  ;;  %2514 = vmatprep.subr.bf16.mxu1 %v12848_v0  ;;  %12861 = vst [vmem:[#allocation25_spill] sm:$0xff] %v11175_v22  ;;  %12862 = vst [vmem:[#allocation27_spill] sm:$0xff] %v11177_v30  ;;  %v11179_v28 = vld [vmem:[#allocation10 + $0x28] ss:$16 sps:$4 sm:$0xff]   ;;  %v11185_v0 = vld [vmem:[#allocation10 + $0x44] ss:$16 sps:$4 sm:$0xff]  }
 0x334   :  { %12863 = vst [vmem:[#allocation26_spill] sm:$0xff] %v11179_v28  ;;  %12864 = vst [vmem:[#allocation28_spill] sm:$0xff] %v11185_v0 }
 0x336   :  { %2474 = vmatpush1.bf16.msra.mxu0 %v12849_v29  ;;  %2515 = vmatpush1.bf16.msra.mxu1 %v12850_v31  ;;  %v11187_v29 = vld [vmem:[#allocation10 + $0x4c] ss:$16 sps:$4 sm:$0xff]   ;;  %v11189_v31 = vld [vmem:[#allocation10 + $0x40] ss:$16 sps:$4 sm:$0xff]  }
 0x337   :  { %2475 = vmatprep.subr.bf16.mxu0 %v12851_v33  ;;  %2516 = vmatprep.subr.bf16.mxu1 %v12852_v34  ;;  %12865 = vst [vmem:[#allocation29_spill] sm:$0xff] %v11187_v29  ;;  %12866 = vst [vmem:[#allocation31_spill] sm:$0xff] %v11189_v31  ;;  %v11191_v33 = vld [vmem:[#allocation10 + $0x48] ss:$16 sps:$4 sm:$0xff]   ;;  %v11197_v34 = vld [vmem:[#allocation10 + $0x64] ss:$16 sps:$4 sm:$0xff]  }
 0x338   :  { %12867 = vst [vmem:[#allocation30_spill] sm:$0xff] %v11191_v33  ;;  %12868 = vst [vmem:[#allocation32_spill] sm:$0xff] %v11197_v34 }
 0x33a   :  { %v9886_v37 = vpop.eup %9885  ;;  %2476 = vmatpush1.bf16.msra.mxu0 %v12853_v38  ;;  %2517 = vmatpush1.bf16.msra.mxu1 %v12854_v39  ;;  %v11203_v38 = vld [vmem:[#allocation10 + $0x68] ss:$16 sps:$4 sm:$0xff]   ;;  %v11209_v39 = vld [vmem:[#allocation10 + $0x84] ss:$16 sps:$4 sm:$0xff]  }
 0x33b   :  { %2477 = vmatprep.subr.bf16.mxu0 %v12855_v40  ;;  %2518 = vmatprep.subr.bf16.mxu1 %v12856_v41  ;;  %v1994_v46 = vmul.f32 %v9886_v37, %v9884_v35  ;;  %v11199_v35 = vld [vmem:[#allocation10 + $0x6c] ss:$16 sps:$4 sm:$0xff]   ;;  %v11201_v37 = vld [vmem:[#allocation10 + $0x60] ss:$16 sps:$4 sm:$0xff]   ;;  %12871 = vst [vmem:[#allocation34_spill] sm:$0xff] %v11203_v38  ;;  %12872 = vst [vmem:[#allocation36_spill] sm:$0xff] %v11209_v39 }
 0x33c   :  { %12869 = vst [vmem:[#allocation33_spill] sm:$0xff] %v11199_v35  ;;  %12870 = vst [vmem:[#allocation35_spill] sm:$0xff] %v11201_v37  ;;  %v11211_v40 = vld [vmem:[#allocation10 + $0x8c] ss:$16 sps:$4 sm:$0xff]   ;;  %v11213_v41 = vld [vmem:[#allocation10 + $0x80] ss:$16 sps:$4 sm:$0xff]  }
 0x33d   :  { %v11063_v53 = vpack.c.bf16 %v1994_v46, %v1994_v46  ;;  %12873 = vst [vmem:[#allocation37_spill] sm:$0xff] %v11211_v40  ;;  %12874 = vst [vmem:[#allocation39_spill] sm:$0xff] %v11213_v41  ;;  %v11215_v46 = vld [vmem:[#allocation10 + $0x88] ss:$16 sps:$4 sm:$0xff]  }
 0x33e   :  { %2478 = vmatpush1.bf16.msra.mxu0 %v12857_v49  ;;  %2519 = vmatpush1.bf16.msra.mxu1 %v12858_v50  ;;  %12875 = vst [vmem:[#allocation38_spill] sm:$0xff] %v11215_v46  ;;  %v11221_v49 = vld [vmem:[#allocation10 + $0xa4] ss:$16 sps:$4 sm:$0xff]   ;;  %v11223_v50 = vld [vmem:[#allocation10 + $0xac] ss:$16 sps:$4 sm:$0xff]  }
 0x33f   :  { %2774 = vmatprep.subr.bf16.mxu0 %v11053_v47  ;;  %2815 = vmatprep.subr.bf16.mxu1 %v11055_v48  ;;  %12876 = vst [vmem:[#allocation40_spill] sm:$0xff] %v11221_v49  ;;  %12877 = vst [vmem:[#allocation41_spill] sm:$0xff] %v11223_v50 }
 0x341   :  { %2496 = vmatmul.mubr.bf16.vlgmr.msra.gmra.mrb[32].mxu0 %v11063_v53  ;;  %2537 = vmatmul.mubr.bf16.vlgmr.msra.gmra.mrb[40].mxu1 %v11063_v53 }
 0x342   :  { %2775 = vmatpush1.bf16.msra.mxu0 %v11059_v51  ;;  %2816 = vmatpush1.bf16.msra.mxu1 %v11061_v52 }
 0x343   :  { %2776 = vmatprep.subr.bf16.mxu0 %v11067_v54  ;;  %2817 = vmatprep.subr.bf16.mxu1 %v11069_v55 }
 0x344   :  { %2806 = vmatprep.mubr.bf16.mxu0 %v12746_v27  ;;  %2847 = vmatprep.mubr.bf16.mxu1 %v12746_v27 }
 0x346   :  { %2777 = vmatpush1.bf16.msra.mxu0 %v11075_v56  ;;  %2818 = vmatpush1.bf16.msra.mxu1 %v11077_v57 }
 0x347   :  { %2778 = vmatprep.subr.bf16.mxu0 %v11081_v58  ;;  %2819 = vmatprep.subr.bf16.mxu1 %v11083_v59 }
 0x34a   :  { %2779 = vmatpush1.bf16.msra.mxu0 %v11089_v61  ;;  %2820 = vmatpush1.bf16.msra.mxu1 %v11091_v62 }
 0x34b   :  { %2780 = vmatprep.subr.bf16.mxu0 %v11095_v1  ;;  %2821 = vmatprep.subr.bf16.mxu1 %v11097_v2 }
 0x34e   :  { %2781 = vmatpush1.bf16.msra.mxu0 %v11101_v3  ;;  %2822 = vmatpush1.bf16.msra.mxu1 %v11103_v4 }
 0x34f   :  { %2782 = vmatprep.subr.bf16.mxu0 %v11107_v6  ;;  %2823 = vmatprep.subr.bf16.mxu1 %v11109_v7 }
 0x352   :  { %2783 = vmatpush1.bf16.msra.mxu0 %v11113_v8  ;;  %2824 = vmatpush1.bf16.msra.mxu1 %v11115_v9 }
 0x353   :  { %2784 = vmatprep.subr.bf16.mxu0 %v11119_v36  ;;  %2825 = vmatprep.subr.bf16.mxu1 %v11121_v11 }
 0x356   :  { %2785 = vmatpush1.bf16.msra.mxu0 %v11125_v10  ;;  %2826 = vmatpush1.bf16.msra.mxu1 %v11127_v18 }
 0x357   :  { %2786 = vmatprep.subr.bf16.mxu0 %v11131_v26  ;;  %2827 = vmatprep.subr.bf16.mxu1 %v11133_v12 }
 0x35a   :  { %2787 = vmatpush1.bf16.msra.mxu0 %v11137_v43  ;;  %2828 = vmatpush1.bf16.msra.mxu1 %v11139_v17 }
 0x35b   :  { %2788 = vmatprep.subr.bf16.mxu0 %v11143_v23  ;;  %2829 = vmatprep.subr.bf16.mxu1 %v11145_v21 }
 0x35e   :  { %2789 = vmatpush1.bf16.msra.mxu0 %v11149_v24  ;;  %2830 = vmatpush1.bf16.msra.mxu1 %v11151_v15 }
 0x35f   :  { %3110 = vmatprep.subr.bf16.mxu0 %v11161_v32  ;;  %3151 = vmatprep.subr.bf16.mxu1 %v11163_v14 }
 0x361   :  { %2807 = vmatmul.mubr.bf16.vlgmr.msra.gmra.mrb[36].mxu0 %v11063_v53  ;;  %2848 = vmatmul.mubr.bf16.vlgmr.msra.gmra.mrb[44].mxu1 %v11063_v53  ;;  %v11225_v53 = vld [vmem:[#allocation10 + $0xa0] ss:$16 sps:$4 sm:$0xff]  }
 0x362   :  { %3142 = vmatprep.mubr.bf16.mxu0 %v12746_v27  ;;  %3183 = vmatprep.mubr.bf16.mxu1 %v12746_v27  ;;  %12878 = vst [vmem:[#allocation42_spill] sm:$0xff] %v11225_v53 }
 0x363   :  { %3111 = vmatpush1.bf16.msra.mxu0 %v11165_v13  ;;  %3152 = vmatpush1.bf16.msra.mxu1 %v11167_v25 }
 0x364   :  { %3112 = vmatprep.subr.bf16.mxu0 %v11173_v19  ;;  %3153 = vmatprep.subr.bf16.mxu1 %v11175_v22 }
 0x367   :  { %3113 = vmatpush1.bf16.msra.mxu0 %v11177_v30  ;;  %3154 = vmatpush1.bf16.msra.mxu1 %v11179_v28 }
 0x368   :  { %3114 = vmatprep.subr.bf16.mxu0 %v11185_v0  ;;  %3155 = vmatprep.subr.bf16.mxu1 %v11187_v29 }
 0x36b   :  { %3115 = vmatpush1.bf16.msra.mxu0 %v11189_v31  ;;  %3156 = vmatpush1.bf16.msra.mxu1 %v11191_v33 }
 0x36c   :  { %3116 = vmatprep.subr.bf16.mxu0 %v11197_v34  ;;  %3157 = vmatprep.subr.bf16.mxu1 %v11199_v35 }
 0x36f   :  { %3117 = vmatpush1.bf16.msra.mxu0 %v11201_v37  ;;  %3158 = vmatpush1.bf16.msra.mxu1 %v11203_v38 }
 0x370   :  { %3118 = vmatprep.subr.bf16.mxu0 %v11209_v39  ;;  %3159 = vmatprep.subr.bf16.mxu1 %v11211_v40  ;;  %v11239_v40 = vld [vmem:[#allocation10 + $0xc8] ss:$16 sps:$4 sm:$0xff]  }
 0x371   :  { %12883 = vst [vmem:[#allocation43_spill] sm:$0xff] %v11239_v40 }
 0x373   :  { %3119 = vmatpush1.bf16.msra.mxu0 %v11213_v41  ;;  %3160 = vmatpush1.bf16.msra.mxu1 %v11215_v46  ;;  %v11235_v41 = vld [vmem:[#allocation10 + $0xcc] ss:$16 sps:$4 sm:$0xff]   ;;  %v11237_v46 = vld [vmem:[#allocation10 + $0xc0] ss:$16 sps:$4 sm:$0xff]  }
 0x374   :  { %3120 = vmatprep.subr.bf16.mxu0 %v11221_v49  ;;  %3161 = vmatprep.subr.bf16.mxu1 %v11223_v50  ;;  %12881 = vst [vmem:[#allocation76_spill] sm:$0xff] %v11235_v41  ;;  %12882 = vst [vmem:[#allocation77_spill] sm:$0xff] %v11237_v46  ;;  %v11245_v50 = vld [vmem:[#allocation10 + $0xe4] ss:$16 sps:$4 sm:$0xff]   ;;  %v11251_v49 = vld [vmem:[#allocation10 + $0xe8] ss:$16 sps:$4 sm:$0xff]  }
 0x375   :  { %12884 = vst [vmem:[#allocation44_spill] sm:$0xff] %v11245_v50  ;;  %12887 = vst [vmem:[#allocation47_spill] sm:$0xff] %v11251_v49 }
 0x377   :  { %3121 = vmatpush1.bf16.msra.mxu0 %v11225_v53  ;;  %3162 = vmatpush1.bf16.msra.mxu1 %v11227_v60  ;;  %v11247_v53 = vld [vmem:[#allocation10 + $0xec] ss:$16 sps:$4 sm:$0xff]   ;;  %v11249_v60 = vld [vmem:[#allocation10 + $0xe0] ss:$16 sps:$4 sm:$0xff]  }
 0x378   :  { %3122 = vmatprep.subr.bf16.mxu0 %v11233_v20  ;;  %3163 = vmatprep.subr.bf16.mxu1 %v11235_v41  ;;  %12885 = vst [vmem:[#allocation45_spill] sm:$0xff] %v11247_v53  ;;  %12886 = vst [vmem:[#allocation46_spill] sm:$0xff] %v11249_v60  ;;  %v11257_v41 = vld [vmem:[#allocation9 + $0x4] ss:$16 sps:$4 sm:$0xff]  }
 0x379   :  { %12888 = vst [vmem:[#allocation48_spill] sm:$0xff] %v11257_v41 }
 0x37b   :  { %3123 = vmatpush1.bf16.msra.mxu0 %v11237_v46  ;;  %3164 = vmatpush1.bf16.msra.mxu1 %v11239_v40  ;;  %v11259_v46 = vld [vmem:[#allocation9 + $0xc] ss:$16 sps:$4 sm:$0xff]  }
 0x37c   :  { %3124 = vmatprep.subr.bf16.mxu0 %v11245_v50  ;;  %3165 = vmatprep.subr.bf16.mxu1 %v11247_v53  ;;  %12889 = vst [vmem:[#allocation49_spill] sm:$0xff] %v11259_v46 }
 0x37f   :  { %3125 = vmatpush1.bf16.msra.mxu0 %v11249_v60  ;;  %3166 = vmatpush1.bf16.msra.mxu1 %v11251_v49 }
 0x380   :  { %3352 = vmatprep.subr.bf16.mxu0 %v11257_v41  ;;  %3393 = vmatprep.subr.bf16.mxu1 %v11259_v46 }
 0x3f4   :  { %v2255_v40 = vpop.f32.mrb[28].mxu0  ;;  %v2296_v20 = vpop.f32.mrb[36].mxu1 }
 0x3f5   :  { %v2257_v39 = vpop.f32.mrb[29].mxu0  ;;  %v2298_v38 = vpop.f32.mrb[37].mxu1 }
 0x3f6   :  { %v2259_v37 = vpop.f32.mrb[30].mxu0  ;;  %v2300_v50 = vpop.f32.mrb[38].mxu1 }
 0x3f7   :  { %v2260_v35 = vpop.f32.mrb[31].mxu0  ;;  %v2301_v53 = vpop.f32.mrb[39].mxu1 }
 0x414   :  { %v2497_v34 = vpop.f32.mrb[32].mxu0  ;;  %v2538_v60 = vpop.f32.mrb[40].mxu1 }
 0x415   :  { %v2498_v33 = vadd.f32 %v2497_v34, %v2255_v40  ;;  %v2539_v49 = vadd.f32 %v2538_v60, %v2296_v20  ;;  %v2499_v31 = vpop.f32.mrb[33].mxu0  ;;  %v2540_v29 = vpop.f32.mrb[41].mxu1 }
 0x416   :  { %v2500_v0 = vadd.f32 %v2499_v31, %v2257_v39  ;;  %v2541_v28 = vadd.f32 %v2540_v29, %v2298_v38  ;;  %v2501_v30 = vpop.f32.mrb[34].mxu0  ;;  %v2542_v41 = vpop.f32.mrb[42].mxu1 }
 0x417   :  { %v2545_v46 = vadd.f32 %v2498_v33, %v10984_v63  ;;  %v2502_v22 = vpop.f32.mrb[35].mxu0  ;;  %v2543_v19 = vpop.f32.mrb[43].mxu1  ;;  %v2547_v20 = vadd.f32 %v2539_v49, %v11002_v42  ;;  %v12890_v41 = vld [vmem:[#allocation78_spill] sm:$0xff]  ;;  %v12891_v49 = vld [vmem:[#allocation79_spill] sm:$0xff] }
 0x418   :  { %v2546_v25 = vadd.f32 %v2500_v0, %v10989_v5  ;;  %v2548_v35 = vadd.f32 %v2541_v28, %v10996_v45 }
 0x419   :  { %v8496_v37 = vmul.f32 -1.442695, %v2545_v46 }
 0x41a   :  { %v8497_v50 = vmul.f32 -1.442695, %v2546_v25  ;;  %v8498_v34 = vmul.f32 -1.442695, %v2548_v35 }
 0x41b   :  { %9887 = vpow2.f32 %v8496_v37 }
 0x41c   :  { %9889 = vpow2.f32 %v8497_v50 }
 0x41d   :  { %9891 = vpow2.f32 %v8498_v34  ;;  %v12892_v34 = vld [vmem:[#allocation80_spill] sm:$0xff] }
 0x41e   :  { %9893 = vtanh.f32 %v2547_v20 }
 0x425   :  { %v9888_v60 = vpop.eup %9887 }
 0x426   :  { %v9890_v31 = vpop.eup %9889  ;;  %v2552_v29 = vadd.f32 1.0, %v9888_v60  ;;  %v12893_v60 = vld [vmem:[#allocation81_spill] sm:$0xff] }
 0x427   :  { %v2558_v30 = vadd.f32 1.0, %v9890_v31  ;;  %v9892_v19 = vpop.eup %9891 }
 0x428   :  { %9895 = vrcp.f32 %v2552_v29  ;;  %v9894_v22 = vpop.eup %9893  ;;  %v2565_v38 = vadd.f32 1.0, %v9892_v19 }
 0x429   :  { %9897 = vrcp.f32 %v2558_v30 }
 0x42a   :  { %9899 = vrcp.f32 %v2565_v38  ;;  %v11279_v38 = vld [vmem:[#allocation9 + $0x8] ss:$16 sps:$4 sm:$0xff]  }
 0x432   :  { %v9896_v0 = vpop.eup %9895 }
 0x433   :  { %v9898_v33 = vpop.eup %9897  ;;  %v2569_v25 = vmul.f32 %v9896_v0, %v9894_v22 }
 0x434   :  { %v2568_v39 = vmul.f32 %v9898_v33, %v11010_v44  ;;  %v2808_v28 = vpop.f32.mrb[36].mxu0  ;;  %v2849_v40 = vpop.f32.mrb[44].mxu1 }
 0x435   :  { %v2856_v46 = vadd.f32 %v2808_v28, %v12890_v41  ;;  %v2858_v53 = vadd.f32 %v2849_v40, %v12891_v49  ;;  %v2810_v37 = vpop.f32.mrb[37].mxu0  ;;  %v2851_v50 = vpop.f32.mrb[45].mxu1 }
 0x436   :  { %v11270_v35 = vadd.f32 %v2569_v25, %v2568_v39  ;;  %v2857_v20 = vadd.f32 %v2810_v37, %v12892_v34  ;;  %v2859_v31 = vadd.f32 %v2851_v50, %v12893_v60  ;;  %v2812_v29 = vpop.f32.mrb[38].mxu0  ;;  %v2853_v30 = vpop.f32.mrb[46].mxu1  ;;  %v11277_v37 = vld [vmem:[#allocation9] ss:$16 sps:$4 sm:$0xff]   ;;  %v11283_v34 = vld [vmem:[#allocation9 + $0x24] ss:$16 sps:$4 sm:$0xff]  }
 0x437   :  { %v8531_v19 = vmul.f32 -1.442695, %v2856_v46  ;;  %v2813_v22 = vpop.f32.mrb[39].mxu0  ;;  %v2854_v44 = vpop.f32.mrb[47].mxu1  ;;  %v11289_v60 = vld [vmem:[#allocation9 + $0x20] ss:$16 sps:$4 sm:$0xff]  }
 0x438   :  { %v8532_v0 = vmul.f32 -1.442695, %v2857_v20  ;;  %9901 = vtanh.f32 %v11270_v35  ;;  %v8533_v33 = vmul.f32 -1.442695, %v2859_v31  ;;  %v9900_v28 = vpop.eup %9899  ;;  %v11285_v20 = vld [vmem:[#allocation9 + $0x2c] ss:$16 sps:$4 sm:$0xff]  }
 0x439   :  { %9903 = vpow2.f32 %v8531_v19  ;;  %v11291_v31 = vld [vmem:[#allocation9 + $0x28] ss:$16 sps:$4 sm:$0xff]   ;;  %v11297_v29 = vld [vmem:[#allocation9 + $0x4c] ss:$16 sps:$4 sm:$0xff]   ;;  %v11303_v30 = vld [vmem:[#allocation9 + $0x40] ss:$16 sps:$4 sm:$0xff]  }
 0x43a   :  { %9905 = vpow2.f32 %v8532_v0  ;;  %12895 = vst [vmem:[#allocation51_spill] sm:$0xff] %v11297_v29  ;;  %12896 = vst [vmem:[#allocation52_spill] sm:$0xff] %v11303_v30  ;;  %v11305_v19 = vld [vmem:[#allocation9 + $0x48] ss:$16 sps:$4 sm:$0xff]   ;;  %v11309_v22 = vld [vmem:[#allocation9 + $0x64] ss:$16 sps:$4 sm:$0xff]  }
 0x43b   :  { %9907 = vpow2.f32 %v8533_v33  ;;  %12897 = vst [vmem:[#allocation53_spill] sm:$0xff] %v11305_v19  ;;  %v11311_v44 = vld [vmem:[#allocation9 + $0x6c] ss:$16 sps:$4 sm:$0xff]  }
 0x43c   :  { %9909 = vtanh.f32 %v2858_v53  ;;  %v11295_v53 = vld [vmem:[#allocation9 + $0x44] ss:$16 sps:$4 sm:$0xff]  }
 0x442   :  { %v9902_v40 = vpop.eup %9901 }
 0x443   :  { %v9904_v25 = vpop.eup %9903  ;;  %v11275_v39 = vmul.f32 %v9902_v40, %v9900_v28  ;;  %v11315_v40 = vld [vmem:[#allocation9 + $0x60] ss:$16 sps:$4 sm:$0xff]  }
 0x444   :  { %v9906_v41 = vpop.eup %9905  ;;  %v2863_v49 = vadd.f32 1.0, %v9904_v25  ;;  %v11317_v25 = vld [vmem:[#allocation9 + $0x68] ss:$16 sps:$4 sm:$0xff]  }
 0x445   :  { %12894 = vst [vmem:[#allocation50_spill] sm:$0xff] %v11275_v39  ;;  %v2869_v46 = vadd.f32 1.0, %v9906_v41  ;;  %v2917_v50 = vpack.c.bf16 %v11275_v39, %v11275_v39  ;;  %v9908_v0 = vpop.eup %9907  ;;  %v11323_v39 = vld [vmem:[#allocation9 + $0x8c] ss:$16 sps:$4 sm:$0xff]  }
 0x446   :  { %9911 = vrcp.f32 %v2863_v49  ;;  %v9910_v33 = vpop.eup %9909  ;;  %12898 = vst [vmem:[#allocation54_spill] sm:$0xff] %v11323_v39 }
 0x447   :  { %9913 = vrcp.f32 %v2869_v46  ;;  %3143 = vmatmul.mubr.bf16.vlgmr.msra.gmra.mrb[40].mxu0 %v2917_v50  ;;  %3184 = vmatmul.mubr.bf16.vlgmr.msra.gmra.mrb[48].mxu1 %v2917_v50  ;;  %v2876_v46 = vadd.f32 1.0, %v9908_v0  ;;  %v11321_v50 = vld [vmem:[#allocation9 + $0x84] ss:$16 sps:$4 sm:$0xff]  }
 0x448   :  { %3353 = vmatpush1.bf16.msra.mxu0 %v11277_v37  ;;  %3394 = vmatpush1.bf16.msra.mxu1 %v11279_v38  ;;  %v11336_v0 = vld [vmem:[#allocation9 + $0xa4] ss:$16 sps:$4 sm:$0xff]  }
 0x449   :  { %3354 = vmatprep.subr.bf16.mxu0 %v11283_v34  ;;  %3395 = vmatprep.subr.bf16.mxu1 %v11285_v20  ;;  %9915 = vrcp.f32 %v2876_v46  ;;  %12901 = vst [vmem:[#allocation57_spill] sm:$0xff] %v11336_v0  ;;  %v11355_v46 = vld [vmem:[#allocation9 + $0xc0] ss:$16 sps:$4 sm:$0xff]  }
 0x44a   :  { %3384 = vmatprep.mubr.bf16.mxu0 %v12746_v27  ;;  %3425 = vmatprep.mubr.bf16.mxu1 %v12746_v27 }
 0x44c   :  { %3355 = vmatpush1.bf16.msra.mxu0 %v11289_v60  ;;  %3396 = vmatpush1.bf16.msra.mxu1 %v11291_v31 }
 0x44d   :  { %3356 = vmatprep.subr.bf16.mxu0 %v11295_v53  ;;  %3397 = vmatprep.subr.bf16.mxu1 %v11297_v29 }
 0x450   :  { %v9912_v28 = vpop.eup %9911  ;;  %3357 = vmatpush1.bf16.msra.mxu0 %v11303_v30  ;;  %3398 = vmatpush1.bf16.msra.mxu1 %v11305_v19  ;;  %v11330_v19 = vld [vmem:[#allocation9 + $0x80] ss:$16 sps:$4 sm:$0xff]  }
 0x451   :  { %v9914_v41 = vpop.eup %9913  ;;  %v2880_v49 = vmul.f32 %v9912_v28, %v9910_v33  ;;  %3358 = vmatprep.subr.bf16.mxu0 %v11309_v22  ;;  %3399 = vmatprep.subr.bf16.mxu1 %v11311_v44  ;;  %12899 = vst [vmem:[#allocation55_spill] sm:$0xff] %v11330_v19  ;;  %v11332_v33 = vld [vmem:[#allocation9 + $0x88] ss:$16 sps:$4 sm:$0xff]   ;;  %v11338_v28 = vld [vmem:[#allocation9 + $0xac] ss:$16 sps:$4 sm:$0xff]  }
 0x452   :  { %v2879_v29 = vmul.f32 %v9914_v41, %v11034_v16  ;;  %12900 = vst [vmem:[#allocation56_spill] sm:$0xff] %v11332_v33  ;;  %12902 = vst [vmem:[#allocation58_spill] sm:$0xff] %v11338_v28  ;;  %v11343_v16 = vld [vmem:[#allocation9 + $0xa0] ss:$16 sps:$4 sm:$0xff]   ;;  %v11349_v41 = vld [vmem:[#allocation9 + $0xc4] ss:$16 sps:$4 sm:$0xff]  }
 0x453   :  { %12903 = vst [vmem:[#allocation59_spill] sm:$0xff] %v11343_v16  ;;  %12905 = vst [vmem:[#allocation62_spill] sm:$0xff] %v11349_v41 }
 0x454   :  { %v11326_v30 = vadd.f32 %v2880_v49, %v2879_v29  ;;  %3359 = vmatpush1.bf16.msra.mxu0 %v11315_v40  ;;  %3400 = vmatpush1.bf16.msra.mxu1 %v11317_v25  ;;  %v11345_v29 = vld [vmem:[#allocation9 + $0xa8] ss:$16 sps:$4 sm:$0xff]   ;;  %v11351_v49 = vld [vmem:[#allocation9 + $0xcc] ss:$16 sps:$4 sm:$0xff]  }
 0x455   :  { %3360 = vmatprep.subr.bf16.mxu0 %v11321_v50  ;;  %3401 = vmatprep.subr.bf16.mxu1 %v11323_v39  ;;  %12904 = vst [vmem:[#allocation60_spill] sm:$0xff] %v11345_v29  ;;  %12906 = vst [vmem:[#allocation64_spill] sm:$0xff] %v11351_v49 }
 0x456   :  { %9917 = vtanh.f32 %v11326_v30 }
 0x458   :  { %3361 = vmatpush1.bf16.msra.mxu0 %v11330_v19  ;;  %3402 = vmatpush1.bf16.msra.mxu1 %v11332_v33  ;;  %v11357_v19 = vld [vmem:[#allocation9 + $0xc8] ss:$16 sps:$4 sm:$0xff]   ;;  %v11361_v33 = vld [vmem:[#allocation9 + $0xe4] ss:$16 sps:$4 sm:$0xff]  }
 0x459   :  { %3362 = vmatprep.subr.bf16.mxu0 %v11336_v0  ;;  %3403 = vmatprep.subr.bf16.mxu1 %v11338_v28  ;;  %v11363_v0 = vld [vmem:[#allocation9 + $0xec] ss:$16 sps:$4 sm:$0xff]   ;;  %v9916_v28 = vpop.eup %9915 }
 0x45c   :  { %3363 = vmatpush1.bf16.msra.mxu0 %v11343_v16  ;;  %3404 = vmatpush1.bf16.msra.mxu1 %v11345_v29  ;;  %v11367_v16 = vld [vmem:[#allocation9 + $0xe0] ss:$16 sps:$4 sm:$0xff]   ;;  %v11369_v29 = vld [vmem:[#allocation9 + $0xe8] ss:$16 sps:$4 sm:$0xff]  }
 0x45d   :  { %3364 = vmatprep.subr.bf16.mxu0 %v11349_v41  ;;  %3405 = vmatprep.subr.bf16.mxu1 %v11351_v49 }
 0x460   :  { %v9918_v39 = vpop.eup %9917  ;;  %3365 = vmatpush1.bf16.msra.mxu0 %v11355_v46  ;;  %3406 = vmatpush1.bf16.msra.mxu1 %v11357_v19 }
 0x461   :  { %3366 = vmatprep.subr.bf16.mxu0 %v11361_v33  ;;  %3407 = vmatprep.subr.bf16.mxu1 %v11363_v0  ;;  %v2883_v41 = vmul.f32 %v9918_v39, %v9916_v28 }
 0x463   :  { %v2884_v49 = vpack.c.bf16 %v2883_v41, %v2883_v41 }
 0x464   :  { %3367 = vmatpush1.bf16.msra.mxu0 %v11367_v16  ;;  %3408 = vmatpush1.bf16.msra.mxu1 %v11369_v29 }
 0x465   :  { %3663 = vmatprep.subr.bf16.mxu0 %v11053_v47  ;;  %3704 = vmatprep.subr.bf16.mxu1 %v11055_v48  ;;  %v12907_v47 = vld [vmem:[#allocation22_spill] sm:$0xff]  ;;  %v12908_v48 = vld [vmem:[#allocation24_spill] sm:$0xff] }
 0x467   :  { %3385 = vmatmul.mubr.bf16.vlgmr.msra.gmra.mrb[44].mxu0 %v2884_v49  ;;  %3426 = vmatmul.mubr.bf16.vlgmr.msra.gmra.mrb[52].mxu1 %v2884_v49 }
 0x468   :  { %3664 = vmatpush1.bf16.msra.mxu0 %v11059_v51  ;;  %3705 = vmatpush1.bf16.msra.mxu1 %v11061_v52  ;;  %v12909_v51 = vld [vmem:[#allocation25_spill] sm:$0xff]  ;;  %v12910_v52 = vld [vmem:[#allocation27_spill] sm:$0xff] }
 0x469   :  { %3665 = vmatprep.subr.bf16.mxu0 %v11067_v54  ;;  %3706 = vmatprep.subr.bf16.mxu1 %v11069_v55  ;;  %v12911_v54 = vld [vmem:[#allocation26_spill] sm:$0xff]  ;;  %v12912_v55 = vld [vmem:[#allocation28_spill] sm:$0xff] }
 0x46a   :  { %3695 = vmatprep.mubr.bf16.mxu0 %v12746_v27  ;;  %3736 = vmatprep.mubr.bf16.mxu1 %v12746_v27 }
 0x46c   :  { %3666 = vmatpush1.bf16.msra.mxu0 %v11075_v56  ;;  %3707 = vmatpush1.bf16.msra.mxu1 %v11077_v57  ;;  %v12913_v56 = vld [vmem:[#allocation29_spill] sm:$0xff]  ;;  %v12914_v57 = vld [vmem:[#allocation31_spill] sm:$0xff] }
 0x46d   :  { %3667 = vmatprep.subr.bf16.mxu0 %v11081_v58  ;;  %3708 = vmatprep.subr.bf16.mxu1 %v11083_v59  ;;  %v12915_v58 = vld [vmem:[#allocation30_spill] sm:$0xff]  ;;  %v12916_v59 = vld [vmem:[#allocation32_spill] sm:$0xff] }
 0x470   :  { %3668 = vmatpush1.bf16.msra.mxu0 %v11089_v61  ;;  %3709 = vmatpush1.bf16.msra.mxu1 %v11091_v62  ;;  %v12917_v61 = vld [vmem:[#allocation33_spill] sm:$0xff]  ;;  %v12918_v62 = vld [vmem:[#allocation35_spill] sm:$0xff] }
 0x471   :  { %3669 = vmatprep.subr.bf16.mxu0 %v11095_v1  ;;  %3710 = vmatprep.subr.bf16.mxu1 %v11097_v2  ;;  %v12919_v1 = vld [vmem:[#allocation34_spill] sm:$0xff]  ;;  %v12920_v2 = vld [vmem:[#allocation36_spill] sm:$0xff] }
 0x474   :  { %3670 = vmatpush1.bf16.msra.mxu0 %v11101_v3  ;;  %3711 = vmatpush1.bf16.msra.mxu1 %v11103_v4  ;;  %v12921_v3 = vld [vmem:[#allocation37_spill] sm:$0xff]  ;;  %v12922_v4 = vld [vmem:[#allocation39_spill] sm:$0xff] }
 0x475   :  { %3671 = vmatprep.subr.bf16.mxu0 %v11107_v6  ;;  %3712 = vmatprep.subr.bf16.mxu1 %v11109_v7  ;;  %v12923_v6 = vld [vmem:[#allocation38_spill] sm:$0xff]  ;;  %v12924_v7 = vld [vmem:[#allocation40_spill] sm:$0xff] }
 0x478   :  { %3672 = vmatpush1.bf16.msra.mxu0 %v11113_v8  ;;  %3713 = vmatpush1.bf16.msra.mxu1 %v11115_v9  ;;  %v12925_v8 = vld [vmem:[#allocation41_spill] sm:$0xff]  ;;  %v12926_v9 = vld [vmem:[#allocation42_spill] sm:$0xff] }
 0x479   :  { %3673 = vmatprep.subr.bf16.mxu0 %v11119_v36  ;;  %3714 = vmatprep.subr.bf16.mxu1 %v11121_v11  ;;  %v12927_v36 = vld [vmem:[#allocation74_spill] sm:$0xff]  ;;  %v12928_v11 = vld [vmem:[#allocation75_spill] sm:$0xff] }
 0x47c   :  { %3674 = vmatpush1.bf16.msra.mxu0 %v11125_v10  ;;  %3715 = vmatpush1.bf16.msra.mxu1 %v11127_v18  ;;  %v12929_v10 = vld [vmem:[#allocation76_spill] sm:$0xff]  ;;  %v12930_v18 = vld [vmem:[#allocation77_spill] sm:$0xff] }
 0x47d   :  { %3675 = vmatprep.subr.bf16.mxu0 %v11131_v26  ;;  %3716 = vmatprep.subr.bf16.mxu1 %v11133_v12  ;;  %v12931_v26 = vld [vmem:[#allocation43_spill] sm:$0xff]  ;;  %v12932_v12 = vld [vmem:[#allocation44_spill] sm:$0xff] }
 0x480   :  { %3676 = vmatpush1.bf16.msra.mxu0 %v11137_v43  ;;  %3717 = vmatpush1.bf16.msra.mxu1 %v11139_v17  ;;  %v12933_v43 = vld [vmem:[#allocation45_spill] sm:$0xff]  ;;  %v12934_v17 = vld [vmem:[#allocation46_spill] sm:$0xff] }
 0x481   :  { %3677 = vmatprep.subr.bf16.mxu0 %v11143_v23  ;;  %3718 = vmatprep.subr.bf16.mxu1 %v11145_v21  ;;  %v12935_v23 = vld [vmem:[#allocation47_spill] sm:$0xff]  ;;  %v12936_v21 = vld [vmem:[#allocation48_spill] sm:$0xff] }
 0x484   :  { %3678 = vmatpush1.bf16.msra.mxu0 %v11149_v24  ;;  %3719 = vmatpush1.bf16.msra.mxu1 %v11151_v15  ;;  %v12937_v24 = vld [vmem:[#allocation49_spill] sm:$0xff] }
 0x485   :  { %3999 = vmatprep.subr.bf16.mxu0 %v11161_v32  ;;  %4040 = vmatprep.subr.bf16.mxu1 %v11163_v14 }
 0x487   :  { %3696 = vmatmul.mubr.bf16.vlgmr.msra.gmra.mrb[48].mxu0 %v2884_v49  ;;  %3737 = vmatmul.mubr.bf16.vlgmr.msra.gmra.mrb[56].mxu1 %v2884_v49 }
 0x488   :  { %4000 = vmatpush1.bf16.msra.mxu0 %v11165_v13  ;;  %4041 = vmatpush1.bf16.msra.mxu1 %v12907_v47 }
 0x489   :  { %4001 = vmatprep.subr.bf16.mxu0 %v12908_v48  ;;  %4042 = vmatprep.subr.bf16.mxu1 %v12909_v51 }
 0x48a   :  { %4031 = vmatprep.mubr.bf16.mxu0 %v12746_v27  ;;  %4072 = vmatprep.mubr.bf16.mxu1 %v12746_v27 }
 0x48c   :  { %4002 = vmatpush1.bf16.msra.mxu0 %v12910_v52  ;;  %4043 = vmatpush1.bf16.msra.mxu1 %v12911_v54 }
 0x48d   :  { %4003 = vmatprep.subr.bf16.mxu0 %v12912_v55  ;;  %4044 = vmatprep.subr.bf16.mxu1 %v12913_v56 }
 0x490   :  { %4004 = vmatpush1.bf16.msra.mxu0 %v12914_v57  ;;  %4045 = vmatpush1.bf16.msra.mxu1 %v12915_v58 }
 0x491   :  { %4005 = vmatprep.subr.bf16.mxu0 %v12916_v59  ;;  %4046 = vmatprep.subr.bf16.mxu1 %v12917_v61 }
 0x494   :  { %4006 = vmatpush1.bf16.msra.mxu0 %v12918_v62  ;;  %4047 = vmatpush1.bf16.msra.mxu1 %v12919_v1 }
 0x495   :  { %4007 = vmatprep.subr.bf16.mxu0 %v12920_v2  ;;  %4048 = vmatprep.subr.bf16.mxu1 %v12921_v3 }
 0x498   :  { %4008 = vmatpush1.bf16.msra.mxu0 %v12922_v4  ;;  %4049 = vmatpush1.bf16.msra.mxu1 %v12923_v6 }
 0x499   :  { %4009 = vmatprep.subr.bf16.mxu0 %v12924_v7  ;;  %4050 = vmatprep.subr.bf16.mxu1 %v12925_v8 }
 0x49c   :  { %4010 = vmatpush1.bf16.msra.mxu0 %v12926_v9  ;;  %4051 = vmatpush1.bf16.msra.mxu1 %v12927_v36 }
 0x49d   :  { %4011 = vmatprep.subr.bf16.mxu0 %v12928_v11  ;;  %4052 = vmatprep.subr.bf16.mxu1 %v12929_v10 }
 0x4a0   :  { %4012 = vmatpush1.bf16.msra.mxu0 %v12930_v18  ;;  %4053 = vmatpush1.bf16.msra.mxu1 %v12931_v26 }
 0x4a1   :  { %4013 = vmatprep.subr.bf16.mxu0 %v12932_v12  ;;  %4054 = vmatprep.subr.bf16.mxu1 %v12933_v43 }
 0x4a4   :  { %4014 = vmatpush1.bf16.msra.mxu0 %v12934_v17  ;;  %4055 = vmatpush1.bf16.msra.mxu1 %v12935_v23 }
 0x4a5   :  { %4241 = vmatprep.subr.bf16.mxu0 %v12936_v21  ;;  %4282 = vmatprep.subr.bf16.mxu1 %v12937_v24  ;;  %v12938_v21 = vld [vmem:[#allocation82_spill] sm:$0xff]  ;;  %v12939_v24 = vld [vmem:[#allocation83_spill] sm:$0xff] }
 0x51a   :  { %v3144_v15 = vpop.f32.mrb[40].mxu0  ;;  %v3185_v32 = vpop.f32.mrb[48].mxu1 }
 0x51b   :  { %v3146_v14 = vpop.f32.mrb[41].mxu0  ;;  %v3187_v13 = vpop.f32.mrb[49].mxu1 }
 0x51c   :  { %v3148_v39 = vpop.f32.mrb[42].mxu0  ;;  %v3189_v28 = vpop.f32.mrb[50].mxu1 }
 0x51d   :  { %v3149_v41 = vpop.f32.mrb[43].mxu0  ;;  %v3190_v49 = vpop.f32.mrb[51].mxu1  ;;  %v12940_v39 = vld [vmem:[#allocation84_spill] sm:$0xff] }
 0x51e   :  { %v12941_v41 = vld [vmem:[#allocation85_spill] sm:$0xff] }
 0x53a   :  { %v3386_v47 = vpop.f32.mrb[44].mxu0  ;;  %v3427_v48 = vpop.f32.mrb[52].mxu1 }
 0x53b   :  { %v3387_v51 = vadd.f32 %v3386_v47, %v3144_v15  ;;  %v3428_v52 = vadd.f32 %v3427_v48, %v3185_v32  ;;  %v3388_v54 = vpop.f32.mrb[45].mxu0  ;;  %v3429_v55 = vpop.f32.mrb[53].mxu1 }
 0x53c   :  { %v3389_v56 = vadd.f32 %v3388_v54, %v3146_v14  ;;  %v3430_v57 = vadd.f32 %v3429_v55, %v3187_v13  ;;  %v3390_v58 = vpop.f32.mrb[46].mxu0  ;;  %v3431_v59 = vpop.f32.mrb[54].mxu1 }
 0x53d   :  { %v3434_v61 = vadd.f32 %v3387_v51, %v10984_v63  ;;  %v3391_v62 = vpop.f32.mrb[47].mxu0  ;;  %v3432_v1 = vpop.f32.mrb[55].mxu1  ;;  %v3436_v8 = vadd.f32 %v3428_v52, %v11002_v42 }
 0x53e   :  { %v3435_v2 = vadd.f32 %v3389_v56, %v10989_v5  ;;  %v3437_v6 = vadd.f32 %v3430_v57, %v10996_v45 }
 0x53f   :  { %v8598_v3 = vmul.f32 -1.442695, %v3434_v61 }
 0x540   :  { %v8599_v4 = vmul.f32 -1.442695, %v3435_v2  ;;  %v8600_v7 = vmul.f32 -1.442695, %v3437_v6 }
 0x541   :  { %9919 = vpow2.f32 %v8598_v3  ;;  %v12943_v3 = vld [vmem:[#allocation51_spill] sm:$0xff] }
 0x542   :  { %9921 = vpow2.f32 %v8599_v4 }
 0x543   :  { %9923 = vpow2.f32 %v8600_v7 }
 0x544   :  { %9925 = vtanh.f32 %v3436_v8 }
 0x54b   :  { %v9920_v9 = vpop.eup %9919 }
 0x54c   :  { %v9922_v36 = vpop.eup %9921  ;;  %v3441_v11 = vadd.f32 1.0, %v9920_v9  ;;  %v12947_v9 = vld [vmem:[#allocation55_spill] sm:$0xff] }
 0x54d   :  { %v3447_v10 = vadd.f32 1.0, %v9922_v36  ;;  %v9924_v63 = vpop.eup %9923  ;;  %v12951_v36 = vld [vmem:[#allocation59_spill] sm:$0xff] }
 0x54e   :  { %9927 = vrcp.f32 %v3441_v11  ;;  %v9926_v18 = vpop.eup %9925  ;;  %v3454_v43 = vadd.f32 1.0, %v9924_v63  ;;  %v12954_v11 = vld [vmem:[#allocation64_spill] sm:$0xff] }
 0x54f   :  { %9929 = vrcp.f32 %v3447_v10 }
 0x550   :  { %9931 = vrcp.f32 %v3454_v43  ;;  %v11525_v43 = vld [vmem:[#allocation7 + $0x4c] ss:$16 sps:$4 sm:$0xff]  }
 0x558   :  { %v9928_v5 = vpop.eup %9927 }
 0x559   :  { %v9930_v26 = vpop.eup %9929  ;;  %v3458_v12 = vmul.f32 %v9928_v5, %v9926_v18  ;;  %v11495_v18 = vld [vmem:[#allocation7 + $0x4] ss:$16 sps:$4 sm:$0xff]   ;;  %v11497_v5 = vld [vmem:[#allocation7 + $0xc] ss:$16 sps:$4 sm:$0xff]  }
 0x55a   :  { %v3457_v17 = vmul.f32 %v9930_v26, %v11270_v35  ;;  %v3697_v45 = vpop.f32.mrb[48].mxu0  ;;  %v3738_v23 = vpop.f32.mrb[56].mxu1 }
 0x55b   :  { %v3745_v42 = vadd.f32 %v3697_v45, %v12938_v21  ;;  %v3747_v15 = vadd.f32 %v3738_v23, %v12939_v24  ;;  %v3699_v32 = vpop.f32.mrb[49].mxu0  ;;  %v3740_v14 = vpop.f32.mrb[57].mxu1  ;;  %v11533_v45 = vld [vmem:[#allocation7 + $0x48] ss:$16 sps:$4 sm:$0xff]   ;;  %v11537_v23 = vld [vmem:[#allocation7 + $0x64] ss:$16 sps:$4 sm:$0xff]  }
 0x55c   :  { %v11452_v13 = vadd.f32 %v3458_v12, %v3457_v17  ;;  %v3746_v28 = vadd.f32 %v3699_v32, %v12940_v39  ;;  %v3748_v49 = vadd.f32 %v3740_v14, %v12941_v41  ;;  %v3701_v47 = vpop.f32.mrb[50].mxu0  ;;  %v3742_v48 = vpop.f32.mrb[58].mxu1  ;;  %v11503_v12 = vld [vmem:[#allocation7] ss:$16 sps:$4 sm:$0xff]   ;;  %v11539_v21 = vld [vmem:[#allocation7 + $0x6c] ss:$16 sps:$4 sm:$0xff]  }
 0x55d   :  { %v8633_v51 = vmul.f32 -1.442695, %v3745_v42  ;;  %v3702_v52 = vpop.f32.mrb[51].mxu0  ;;  %v3743_v35 = vpop.f32.mrb[59].mxu1  ;;  %v11531_v17 = vld [vmem:[#allocation7 + $0x40] ss:$16 sps:$4 sm:$0xff]  }
 0x55e   :  { %v8634_v54 = vmul.f32 -1.442695, %v3746_v28  ;;  %9933 = vtanh.f32 %v11452_v13  ;;  %v8635_v55 = vmul.f32 -1.442695, %v3748_v49  ;;  %v9932_v56 = vpop.eup %9931  ;;  %v11543_v42 = vld [vmem:[#allocation7 + $0x60] ss:$16 sps:$4 sm:$0xff]  }
 0x55f   :  { %9935 = vpow2.f32 %v8633_v51  ;;  %v11545_v24 = vld [vmem:[#allocation7 + $0x68] ss:$16 sps:$4 sm:$0xff]   ;;  %v11551_v32 = vld [vmem:[#allocation7 + $0x8c] ss:$16 sps:$4 sm:$0xff]   ;;  %v11555_v14 = vld [vmem:[#allocation7 + $0x80] ss:$16 sps:$4 sm:$0xff]  }
 0x560   :  { %9937 = vpow2.f32 %v8634_v54  ;;  %v11557_v39 = vld [vmem:[#allocation7 + $0x88] ss:$16 sps:$4 sm:$0xff]   ;;  %v11561_v28 = vld [vmem:[#allocation7 + $0xa4] ss:$16 sps:$4 sm:$0xff]   ;;  %v11563_v41 = vld [vmem:[#allocation7 + $0xac] ss:$16 sps:$4 sm:$0xff]  }
 0x561   :  { %9939 = vpow2.f32 %v8635_v55  ;;  %v11567_v49 = vld [vmem:[#allocation7 + $0xa0] ss:$16 sps:$4 sm:$0xff]   ;;  %v11569_v47 = vld [vmem:[#allocation7 + $0xa8] ss:$16 sps:$4 sm:$0xff]   ;;  %v11573_v48 = vld [vmem:[#allocation7 + $0xc4] ss:$16 sps:$4 sm:$0xff]  }
 0x562   :  { %9941 = vtanh.f32 %v3747_v15  ;;  %v11549_v15 = vld [vmem:[#allocation7 + $0x84] ss:$16 sps:$4 sm:$0xff]   ;;  %v11575_v51 = vld [vmem:[#allocation7 + $0xcc] ss:$16 sps:$4 sm:$0xff]   ;;  %v11579_v52 = vld [vmem:[#allocation7 + $0xc0] ss:$16 sps:$4 sm:$0xff]  }
 0x563   :  { %v11581_v35 = vld [vmem:[#allocation7 + $0xc8] ss:$16 sps:$4 sm:$0xff]   ;;  %v11585_v54 = vld [vmem:[#allocation7 + $0xe4] ss:$16 sps:$4 sm:$0xff]   ;;  %v11587_v55 = vld [vmem:[#allocation7 + $0xec] ss:$16 sps:$4 sm:$0xff]  }
 0x568   :  { %v9934_v57 = vpop.eup %9933 }
 0x569   :  { %v9936_v58 = vpop.eup %9935  ;;  %v11457_v59 = vmul.f32 %v9934_v57, %v9932_v56  ;;  %v11591_v56 = vld [vmem:[#allocation7 + $0xe0] ss:$16 sps:$4 sm:$0xff]   ;;  %v11593_v57 = vld [vmem:[#allocation7 + $0xe8] ss:$16 sps:$4 sm:$0xff]  }
 0x56a   :  { %v9938_v61 = vpop.eup %9937  ;;  %v3752_v62 = vadd.f32 1.0, %v9936_v58  ;;  %v11603_v58 = vld [vmem:[#allocation10 + $0x4] ss:$16 sps:$4 sm:$0xff]  }
 0x56b   :  { %12942 = vst [vmem:[#allocation61_spill] sm:$0xff] %v11457_v59  ;;  %v3758_v1 = vadd.f32 1.0, %v9938_v61  ;;  %v3806_v2 = vpack.c.bf16 %v11457_v59, %v11457_v59  ;;  %v9940_v4 = vpop.eup %9939  ;;  %v11605_v61 = vld [vmem:[#allocation10 + $0xc] ss:$16 sps:$4 sm:$0xff]   ;;  %v11687_v59 = vld [vmem:[#allocation10 + $0xe4] ss:$16 sps:$4 sm:$0xff]  }
 0x56c   :  { %9943 = vrcp.f32 %v3752_v62  ;;  %v3765_v8 = vadd.f32 1.0, %v9940_v4  ;;  %v11607_v62 = vld [vmem:[#allocation10] ss:$16 sps:$4 sm:$0xff]   ;;  %12976 = vst [vmem:[#allocation30_spill] sm:$0xff] %v11687_v59 }
 0x56d   :  { %9945 = vrcp.f32 %v3758_v1  ;;  %4032 = vmatmul.mubr.bf16.vlgmr.msra.gmra.mrb[52].mxu0 %v3806_v2  ;;  %4073 = vmatmul.mubr.bf16.vlgmr.msra.gmra.mrb[60].mxu1 %v3806_v2  ;;  %v11609_v1 = vld [vmem:[#allocation10 + $0x8] ss:$16 sps:$4 sm:$0xff]   ;;  %v11615_v2 = vld [vmem:[#allocation10 + $0x24] ss:$16 sps:$4 sm:$0xff]   ;;  %v11619_v4 = vld [vmem:[#allocation10 + $0x20] ss:$16 sps:$4 sm:$0xff]  }
 0x56e   :  { %4242 = vmatpush1.bf16.msra.mxu0 %v11277_v37  ;;  %4283 = vmatpush1.bf16.msra.mxu1 %v11279_v38  ;;  %v9942_v37 = vpop.eup %9941  ;;  %v12944_v38 = vld [vmem:[#allocation52_spill] sm:$0xff]  ;;  %9947 = vrcp.f32 %v3765_v8  ;;  %v11641_v8 = vld [vmem:[#allocation10 + $0x6c] ss:$16 sps:$4 sm:$0xff]  }
 0x56f   :  { %4243 = vmatprep.subr.bf16.mxu0 %v11283_v34  ;;  %4284 = vmatprep.subr.bf16.mxu1 %v11285_v20  ;;  %v12945_v34 = vld [vmem:[#allocation53_spill] sm:$0xff]  ;;  %12961 = vst [vmem:[#allocation70_spill] sm:$0xff] %v11641_v8 }
 0x570   :  { %4273 = vmatprep.mubr.bf16.mxu0 %v12746_v27  ;;  %4314 = vmatprep.mubr.bf16.mxu1 %v12746_v27 }
 0x572   :  { %4244 = vmatpush1.bf16.msra.mxu0 %v11289_v60  ;;  %4285 = vmatpush1.bf16.msra.mxu1 %v11291_v31 }
 0x573   :  { %4245 = vmatprep.subr.bf16.mxu0 %v11295_v53  ;;  %4286 = vmatprep.subr.bf16.mxu1 %v12943_v3  ;;  %v12946_v53 = vld [vmem:[#allocation54_spill] sm:$0xff]  ;;  %v11617_v3 = vld [vmem:[#allocation10 + $0x2c] ss:$16 sps:$4 sm:$0xff]  }
 0x576   :  { %v9944_v6 = vpop.eup %9943  ;;  %4246 = vmatpush1.bf16.msra.mxu0 %v12944_v38  ;;  %4287 = vmatpush1.bf16.msra.mxu1 %v12945_v34  ;;  %v11629_v38 = vld [vmem:[#allocation10 + $0x4c] ss:$16 sps:$4 sm:$0xff]   ;;  %v11631_v34 = vld [vmem:[#allocation10 + $0x40] ss:$16 sps:$4 sm:$0xff]  }
 0x577   :  { %v9946_v20 = vpop.eup %9945  ;;  %v3769_v7 = vmul.f32 %v9944_v6, %v9942_v37  ;;  %4247 = vmatprep.subr.bf16.mxu0 %v11309_v22  ;;  %4288 = vmatprep.subr.bf16.mxu1 %v11311_v44  ;;  %v12948_v22 = vld [vmem:[#allocation56_spill] sm:$0xff]  ;;  %v12949_v44 = vld [vmem:[#allocation57_spill] sm:$0xff]  ;;  %12957 = vst [vmem:[#allocation66_spill] sm:$0xff] %v11629_v38  ;;  %12958 = vst [vmem:[#allocation67_spill] sm:$0xff] %v11631_v34 }
 0x578   :  { %v3768_v60 = vmul.f32 %v9946_v20, %v11326_v30  ;;  %v12950_v30 = vld [vmem:[#allocation58_spill] sm:$0xff]  ;;  %v11621_v37 = vld [vmem:[#allocation10 + $0x28] ss:$16 sps:$4 sm:$0xff]  }
 0x579   :  { %12955 = vst [vmem:[#allocation63_spill] sm:$0xff] %v11621_v37  ;;  %v11627_v6 = vld [vmem:[#allocation10 + $0x44] ss:$16 sps:$4 sm:$0xff]   ;;  %v11633_v20 = vld [vmem:[#allocation10 + $0x48] ss:$16 sps:$4 sm:$0xff]  }
 0x57a   :  { %v11476_v31 = vadd.f32 %v3769_v7, %v3768_v60  ;;  %4248 = vmatpush1.bf16.msra.mxu0 %v11315_v40  ;;  %4289 = vmatpush1.bf16.msra.mxu1 %v11317_v25  ;;  %v12952_v40 = vld [vmem:[#allocation60_spill] sm:$0xff]  ;;  %v12953_v25 = vld [vmem:[#allocation62_spill] sm:$0xff]  ;;  %12956 = vst [vmem:[#allocation65_spill] sm:$0xff] %v11627_v6  ;;  %12959 = vst [vmem:[#allocation68_spill] sm:$0xff] %v11633_v20 }
 0x57b   :  { %4249 = vmatprep.subr.bf16.mxu0 %v11321_v50  ;;  %4290 = vmatprep.subr.bf16.mxu1 %v12946_v53  ;;  %v9948_v50 = vpop.eup %9947  ;;  %v11639_v7 = vld [vmem:[#allocation10 + $0x64] ss:$16 sps:$4 sm:$0xff]   ;;  %v11643_v60 = vld [vmem:[#allocation10 + $0x60] ss:$16 sps:$4 sm:$0xff]   ;;  %v11645_v53 = vld [vmem:[#allocation10 + $0x68] ss:$16 sps:$4 sm:$0xff]  }
 0x57c   :  { %9949 = vtanh.f32 %v11476_v31  ;;  %12960 = vst [vmem:[#allocation69_spill] sm:$0xff] %v11639_v7  ;;  %12962 = vst [vmem:[#allocation71_spill] sm:$0xff] %v11643_v60 }
 0x57d   :  { %12963 = vst [vmem:[#allocation72_spill] sm:$0xff] %v11645_v53 }
 0x57e   :  { %4250 = vmatpush1.bf16.msra.mxu0 %v12947_v9  ;;  %4291 = vmatpush1.bf16.msra.mxu1 %v12948_v22  ;;  %v11651_v9 = vld [vmem:[#allocation10 + $0x84] ss:$16 sps:$4 sm:$0xff]   ;;  %v11653_v22 = vld [vmem:[#allocation10 + $0x8c] ss:$16 sps:$4 sm:$0xff]  }
 0x57f   :  { %4251 = vmatprep.subr.bf16.mxu0 %v12949_v44  ;;  %4292 = vmatprep.subr.bf16.mxu1 %v12950_v30  ;;  %12964 = vst [vmem:[#allocation78_spill] sm:$0xff] %v11651_v9  ;;  %12965 = vst [vmem:[#allocation79_spill] sm:$0xff] %v11653_v22  ;;  %v11655_v44 = vld [vmem:[#allocation10 + $0x80] ss:$16 sps:$4 sm:$0xff]   ;;  %v11657_v30 = vld [vmem:[#allocation10 + $0x88] ss:$16 sps:$4 sm:$0xff]  }
 0x580   :  { %12966 = vst [vmem:[#allocation80_spill] sm:$0xff] %v11655_v44  ;;  %12967 = vst [vmem:[#allocation81_spill] sm:$0xff] %v11657_v30 }
 0x582   :  { %4252 = vmatpush1.bf16.msra.mxu0 %v12951_v36  ;;  %4293 = vmatpush1.bf16.msra.mxu1 %v12952_v40  ;;  %v11663_v36 = vld [vmem:[#allocation10 + $0xa4] ss:$16 sps:$4 sm:$0xff]   ;;  %v11665_v40 = vld [vmem:[#allocation10 + $0xac] ss:$16 sps:$4 sm:$0xff]  }
 0x583   :  { %4253 = vmatprep.subr.bf16.mxu0 %v12953_v25  ;;  %4294 = vmatprep.subr.bf16.mxu1 %v12954_v11  ;;  %12968 = vst [vmem:[#allocation22_spill] sm:$0xff] %v11663_v36  ;;  %12969 = vst [vmem:[#allocation24_spill] sm:$0xff] %v11665_v40  ;;  %v11667_v25 = vld [vmem:[#allocation10 + $0xa0] ss:$16 sps:$4 sm:$0xff]   ;;  %v11669_v11 = vld [vmem:[#allocation10 + $0xa8] ss:$16 sps:$4 sm:$0xff]  }
 0x584   :  { %12970 = vst [vmem:[#allocation25_spill] sm:$0xff] %v11667_v25  ;;  %12971 = vst [vmem:[#allocation27_spill] sm:$0xff] %v11669_v11 }
 0x586   :  { %v9950_v10 = vpop.eup %9949  ;;  %4254 = vmatpush1.bf16.msra.mxu0 %v11355_v46  ;;  %4295 = vmatpush1.bf16.msra.mxu1 %v11357_v19  ;;  %v11505_v46 = vld [vmem:[#allocation7 + $0x8] ss:$16 sps:$4 sm:$0xff]   ;;  %v11509_v19 = vld [vmem:[#allocation7 + $0x24] ss:$16 sps:$4 sm:$0xff]  }
 0x587   :  { %4255 = vmatprep.subr.bf16.mxu0 %v11361_v33  ;;  %4296 = vmatprep.subr.bf16.mxu1 %v11363_v0  ;;  %v3772_v63 = vmul.f32 %v9950_v10, %v9948_v50  ;;  %v11511_v33 = vld [vmem:[#allocation7 + $0x2c] ss:$16 sps:$4 sm:$0xff]   ;;  %v11517_v0 = vld [vmem:[#allocation7 + $0x20] ss:$16 sps:$4 sm:$0xff]   ;;  %v11675_v50 = vld [vmem:[#allocation10 + $0xc4] ss:$16 sps:$4 sm:$0xff]  }
 0x588   :  { %12972 = vst [vmem:[#allocation26_spill] sm:$0xff] %v11675_v50  ;;  %v11677_v10 = vld [vmem:[#allocation10 + $0xcc] ss:$16 sps:$4 sm:$0xff]  }
 0x589   :  { %v11499_v26 = vpack.c.bf16 %v3772_v63, %v3772_v63  ;;  %12973 = vst [vmem:[#allocation28_spill] sm:$0xff] %v11677_v10  ;;  %v11679_v63 = vld [vmem:[#allocation10 + $0xc0] ss:$16 sps:$4 sm:$0xff]  }
 0x58a   :  { %4256 = vmatpush1.bf16.msra.mxu0 %v11367_v16  ;;  %4297 = vmatpush1.bf16.msra.mxu1 %v11369_v29  ;;  %v11519_v16 = vld [vmem:[#allocation7 + $0x28] ss:$16 sps:$4 sm:$0xff]   ;;  %v11523_v29 = vld [vmem:[#allocation7 + $0x44] ss:$16 sps:$4 sm:$0xff]   ;;  %12974 = vst [vmem:[#allocation29_spill] sm:$0xff] %v11679_v63 }
 0x58b   :  { %4552 = vmatprep.subr.bf16.mxu0 %v11495_v18  ;;  %4593 = vmatprep.subr.bf16.mxu1 %v11497_v5 }
 0x58d   :  { %4274 = vmatmul.mubr.bf16.vlgmr.msra.gmra.mrb[56].mxu0 %v11499_v26  ;;  %4315 = vmatmul.mubr.bf16.vlgmr.msra.gmra.mrb[64].mxu1 %v11499_v26 }
 0x58e   :  { %4553 = vmatpush1.bf16.msra.mxu0 %v11503_v12  ;;  %4594 = vmatpush1.bf16.msra.mxu1 %v11505_v46 }
 0x58f   :  { %4554 = vmatprep.subr.bf16.mxu0 %v11509_v19  ;;  %4595 = vmatprep.subr.bf16.mxu1 %v11511_v33 }
 0x590   :  { %4584 = vmatprep.mubr.bf16.mxu0 %v12746_v27  ;;  %4625 = vmatprep.mubr.bf16.mxu1 %v12746_v27 }
 0x592   :  { %4555 = vmatpush1.bf16.msra.mxu0 %v11517_v0  ;;  %4596 = vmatpush1.bf16.msra.mxu1 %v11519_v16 }
 0x593   :  { %4556 = vmatprep.subr.bf16.mxu0 %v11523_v29  ;;  %4597 = vmatprep.subr.bf16.mxu1 %v11525_v43 }
 0x596   :  { %4557 = vmatpush1.bf16.msra.mxu0 %v11531_v17  ;;  %4598 = vmatpush1.bf16.msra.mxu1 %v11533_v45 }
 0x597   :  { %4558 = vmatprep.subr.bf16.mxu0 %v11537_v23  ;;  %4599 = vmatprep.subr.bf16.mxu1 %v11539_v21 }
 0x59a   :  { %4559 = vmatpush1.bf16.msra.mxu0 %v11543_v42  ;;  %4600 = vmatpush1.bf16.msra.mxu1 %v11545_v24 }
 0x59b   :  { %4560 = vmatprep.subr.bf16.mxu0 %v11549_v15  ;;  %4601 = vmatprep.subr.bf16.mxu1 %v11551_v32 }
 0x59e   :  { %4561 = vmatpush1.bf16.msra.mxu0 %v11555_v14  ;;  %4602 = vmatpush1.bf16.msra.mxu1 %v11557_v39 }
 0x59f   :  { %4562 = vmatprep.subr.bf16.mxu0 %v11561_v28  ;;  %4603 = vmatprep.subr.bf16.mxu1 %v11563_v41 }
 0x5a2   :  { %4563 = vmatpush1.bf16.msra.mxu0 %v11567_v49  ;;  %4604 = vmatpush1.bf16.msra.mxu1 %v11569_v47 }
 0x5a3   :  { %4564 = vmatprep.subr.bf16.mxu0 %v11573_v48  ;;  %4605 = vmatprep.subr.bf16.mxu1 %v11575_v51 }
 0x5a6   :  { %4565 = vmatpush1.bf16.msra.mxu0 %v11579_v52  ;;  %4606 = vmatpush1.bf16.msra.mxu1 %v11581_v35 }
 0x5a7   :  { %4566 = vmatprep.subr.bf16.mxu0 %v11585_v54  ;;  %4607 = vmatprep.subr.bf16.mxu1 %v11587_v55 }
 0x5aa   :  { %4567 = vmatpush1.bf16.msra.mxu0 %v11591_v56  ;;  %4608 = vmatpush1.bf16.msra.mxu1 %v11593_v57 }
 0x5ab   :  { %4888 = vmatprep.subr.bf16.mxu0 %v11603_v58  ;;  %4929 = vmatprep.subr.bf16.mxu1 %v11605_v61 }
 0x5ad   :  { %4585 = vmatmul.mubr.bf16.vlgmr.msra.gmra.mrb[60].mxu0 %v11499_v26  ;;  %4626 = vmatmul.mubr.bf16.vlgmr.msra.gmra.mrb[68].mxu1 %v11499_v26  ;;  %v11681_v26 = vld [vmem:[#allocation10 + $0xc8] ss:$16 sps:$4 sm:$0xff]  }
 0x5ae   :  { %4920 = vmatprep.mubr.bf16.mxu0 %v12746_v27  ;;  %4961 = vmatprep.mubr.bf16.mxu1 %v12746_v27  ;;  %12975 = vst [vmem:[#allocation31_spill] sm:$0xff] %v11681_v26 }
 0x5af   :  { %4889 = vmatpush1.bf16.msra.mxu0 %v11607_v62  ;;  %4930 = vmatpush1.bf16.msra.mxu1 %v11609_v1 }
 0x5b0   :  { %4890 = vmatprep.subr.bf16.mxu0 %v11615_v2  ;;  %4931 = vmatprep.subr.bf16.mxu1 %v11617_v3 }
 0x5b3   :  { %4891 = vmatpush1.bf16.msra.mxu0 %v11619_v4  ;;  %4932 = vmatpush1.bf16.msra.mxu1 %v11621_v37 }
 0x5b4   :  { %4892 = vmatprep.subr.bf16.mxu0 %v11627_v6  ;;  %4933 = vmatprep.subr.bf16.mxu1 %v11629_v38 }
 0x5b7   :  { %4893 = vmatpush1.bf16.msra.mxu0 %v11631_v34  ;;  %4934 = vmatpush1.bf16.msra.mxu1 %v11633_v20 }
 0x5b8   :  { %4894 = vmatprep.subr.bf16.mxu0 %v11639_v7  ;;  %4935 = vmatprep.subr.bf16.mxu1 %v11641_v8 }
 0x5bb   :  { %4895 = vmatpush1.bf16.msra.mxu0 %v11643_v60  ;;  %4936 = vmatpush1.bf16.msra.mxu1 %v11645_v53 }
 0x5bc   :  { %4896 = vmatprep.subr.bf16.mxu0 %v11651_v9  ;;  %4937 = vmatprep.subr.bf16.mxu1 %v11653_v22 }
 0x5bf   :  { %4897 = vmatpush1.bf16.msra.mxu0 %v11655_v44  ;;  %4938 = vmatpush1.bf16.msra.mxu1 %v11657_v30 }
 0x5c0   :  { %4898 = vmatprep.subr.bf16.mxu0 %v11663_v36  ;;  %4939 = vmatprep.subr.bf16.mxu1 %v11665_v40  ;;  %v11693_v40 = vld [vmem:[#allocation10 + $0xe8] ss:$16 sps:$4 sm:$0xff]  }
 0x5c1   :  { %12979 = vst [vmem:[#allocation35_spill] sm:$0xff] %v11693_v40 }
 0x5c3   :  { %4899 = vmatpush1.bf16.msra.mxu0 %v11667_v25  ;;  %4940 = vmatpush1.bf16.msra.mxu1 %v11669_v11  ;;  %v11689_v25 = vld [vmem:[#allocation10 + $0xec] ss:$16 sps:$4 sm:$0xff]   ;;  %v11691_v11 = vld [vmem:[#allocation10 + $0xe0] ss:$16 sps:$4 sm:$0xff]  }
 0x5c4   :  { %4900 = vmatprep.subr.bf16.mxu0 %v11675_v50  ;;  %4941 = vmatprep.subr.bf16.mxu1 %v11677_v10  ;;  %12977 = vst [vmem:[#allocation32_spill] sm:$0xff] %v11689_v25  ;;  %12978 = vst [vmem:[#allocation33_spill] sm:$0xff] %v11691_v11  ;;  %v11699_v10 = vld [vmem:[#allocation9 + $0x4] ss:$16 sps:$4 sm:$0xff]  }
 0x5c5   :  { %12980 = vst [vmem:[#allocation34_spill] sm:$0xff] %v11699_v10 }
 0x5c7   :  { %4901 = vmatpush1.bf16.msra.mxu0 %v11679_v63  ;;  %4942 = vmatpush1.bf16.msra.mxu1 %v11681_v26  ;;  %v11701_v63 = vld [vmem:[#allocation9 + $0xc] ss:$16 sps:$4 sm:$0xff]  }
 0x5c8   :  { %4902 = vmatprep.subr.bf16.mxu0 %v11687_v59  ;;  %4943 = vmatprep.subr.bf16.mxu1 %v11689_v25  ;;  %12981 = vst [vmem:[#allocation36_spill] sm:$0xff] %v11701_v63 }
 0x5cb   :  { %4903 = vmatpush1.bf16.msra.mxu0 %v11691_v11  ;;  %4944 = vmatpush1.bf16.msra.mxu1 %v11693_v40 }
 0x5cc   :  { %5130 = vmatprep.subr.bf16.mxu0 %v11699_v10  ;;  %5171 = vmatprep.subr.bf16.mxu1 %v11701_v63  ;;  %v11708_v63 = vld [vmem:[%s12514_s8] sm:$0xff] }
 0x5cd   :  { %12982 = vst [vmem:[#allocation37_spill] sm:$0xff] %v11708_v63 }
 0x640   :  { %v4033_v26 = vpop.f32.mrb[52].mxu0  ;;  %v4074_v50 = vpop.f32.mrb[60].mxu1 }
 0x641   :  { %v4035_v36 = vpop.f32.mrb[53].mxu0  ;;  %v4076_v30 = vpop.f32.mrb[61].mxu1 }
 0x642   :  { %v4037_v44 = vpop.f32.mrb[54].mxu0  ;;  %v4078_v59 = vpop.f32.mrb[62].mxu1 }
 0x643   :  { %v4038_v22 = vpop.f32.mrb[55].mxu0  ;;  %v4079_v25 = vpop.f32.mrb[63].mxu1 }
 0x660   :  { %v4275_v9 = vpop.f32.mrb[56].mxu0  ;;  %v4316_v11 = vpop.f32.mrb[64].mxu1 }
 0x661   :  { %v4276_v53 = vadd.f32 %v4275_v9, %v4033_v26  ;;  %v4317_v40 = vadd.f32 %v4316_v11, %v4074_v50  ;;  %v4277_v60 = vpop.f32.mrb[57].mxu0  ;;  %v4318_v8 = vpop.f32.mrb[65].mxu1  ;;  %v11714_v9 = vld [vmem:[%s12514_s8 + $0x8] sm:$0xff] }
 0x662   :  { %v4278_v7 = vadd.f32 %v4277_v60, %v4035_v36  ;;  %v4319_v20 = vadd.f32 %v4318_v8, %v4076_v30  ;;  %v4279_v34 = vpop.f32.mrb[58].mxu0  ;;  %v4320_v10 = vpop.f32.mrb[66].mxu1  ;;  %12983 = vst [vmem:[#allocation39_spill] sm:$0xff] %v11714_v9  ;;  %v11726_v36 = vld [vmem:[%s12514_s8 + $0x10] sm:$0xff] }
 0x663   :  { %v4323_v44 = vadd.f32 %v11708_v63, %v4276_v53  ;;  %v4280_v59 = vpop.f32.mrb[59].mxu0  ;;  %v4321_v22 = vpop.f32.mrb[67].mxu1  ;;  %v11720_v34 = vld [vmem:[%s12514_s8 + $0x18] sm:$0xff]  ;;  %12985 = vst [vmem:[#allocation40_spill] sm:$0xff] %v11726_v36  ;;  %v4325_v11 = vadd.f32 %v11726_v36, %v4317_v40 }
 0x664   :  { %v4324_v25 = vadd.f32 %v11714_v9, %v4278_v7  ;;  %12984 = vst [vmem:[#allocation38_spill] sm:$0xff] %v11720_v34  ;;  %v4326_v53 = vadd.f32 %v11720_v34, %v4319_v20  ;;  %v12986_v9 = vld [vmem:[#allocation86_spill] sm:$0xff]  ;;  %v12987_v36 = vld [vmem:[#allocation87_spill] sm:$0xff] }
 0x665   :  { %v8700_v60 = vmul.f32 -1.442695, %v4323_v44 }
 0x666   :  { %v8701_v8 = vmul.f32 -1.442695, %v4324_v25  ;;  %v8702_v30 = vmul.f32 -1.442695, %v4326_v53 }
 0x667   :  { %9951 = vpow2.f32 %v8700_v60 }
 0x668   :  { %9953 = vpow2.f32 %v8701_v8 }
 0x669   :  { %9955 = vpow2.f32 %v8702_v30 }
 0x66a   :  { %9957 = vtanh.f32 %v4325_v11 }
 0x671   :  { %v9952_v7 = vpop.eup %9951 }
 0x672   :  { %v9954_v50 = vpop.eup %9953  ;;  %v4330_v10 = vadd.f32 1.0, %v9952_v7 }
 0x673   :  { %v4336_v26 = vadd.f32 1.0, %v9954_v50  ;;  %v9956_v44 = vpop.eup %9955  ;;  %v12988_v50 = vld [vmem:[#allocation88_spill] sm:$0xff] }
 0x674   :  { %9959 = vrcp.f32 %v4330_v10  ;;  %v9958_v59 = vpop.eup %9957  ;;  %v4343_v60 = vadd.f32 1.0, %v9956_v44 }
 0x675   :  { %9961 = vrcp.f32 %v4336_v26  ;;  %v12989_v26 = vld [vmem:[#allocation89_spill] sm:$0xff] }
 0x676   :  { %9963 = vrcp.f32 %v4343_v60 }
 0x67e   :  { %v9960_v22 = vpop.eup %9959 }
 0x67f   :  { %v9962_v20 = vpop.eup %9961  ;;  %v4347_v25 = vmul.f32 %v9960_v22, %v9958_v59 }
 0x680   :  { %v4346_v8 = vmul.f32 %v9962_v20, %v11452_v13  ;;  %v4586_v53 = vpop.f32.mrb[60].mxu0  ;;  %v4627_v34 = vpop.f32.mrb[68].mxu1 }
 0x681   :  { %v4634_v40 = vadd.f32 %v4586_v53, %v12986_v9  ;;  %v4636_v63 = vadd.f32 %v4627_v34, %v12987_v36  ;;  %v4588_v7 = vpop.f32.mrb[61].mxu0  ;;  %v4629_v30 = vpop.f32.mrb[69].mxu1 }
 0x682   :  { %v11732_v11 = vadd.f32 %v4347_v25, %v4346_v8  ;;  %v4635_v10 = vadd.f32 %v4588_v7, %v12988_v50  ;;  %v4637_v38 = vadd.f32 %v4629_v30, %v12989_v26  ;;  %v4590_v6 = vpop.f32.mrb[62].mxu0  ;;  %v4631_v37 = vpop.f32.mrb[70].mxu1  ;;  %v11745_v7 = vld [vmem:[#allocation9 + $0x24] ss:$16 sps:$4 sm:$0xff]   ;;  %v11751_v30 = vld [vmem:[#allocation9 + $0x20] ss:$16 sps:$4 sm:$0xff]  }
 0x683   :  { %v8735_v44 = vmul.f32 -1.442695, %v4634_v40  ;;  %v4591_v59 = vpop.f32.mrb[63].mxu0  ;;  %v4632_v13 = vpop.f32.mrb[71].mxu1  ;;  %v11739_v6 = vld [vmem:[#allocation9] ss:$16 sps:$4 sm:$0xff]  }
 0x684   :  { %v8736_v22 = vmul.f32 -1.442695, %v4635_v10  ;;  %9965 = vtanh.f32 %v11732_v11  ;;  %v8737_v9 = vmul.f32 -1.442695, %v4637_v38  ;;  %v9964_v34 = vpop.eup %9963  ;;  %v11741_v37 = vld [vmem:[#allocation9 + $0x8] ss:$16 sps:$4 sm:$0xff]  }
 0x685   :  { %9967 = vpow2.f32 %v8735_v44  ;;  %v11747_v38 = vld [vmem:[#allocation9 + $0x2c] ss:$16 sps:$4 sm:$0xff]   ;;  %v11753_v50 = vld [vmem:[#allocation9 + $0x28] ss:$16 sps:$4 sm:$0xff]   ;;  %v11765_v26 = vld [vmem:[#allocation9 + $0x40] ss:$16 sps:$4 sm:$0xff]  }
 0x686   :  { %9969 = vpow2.f32 %v8736_v22  ;;  %v11759_v10 = vld [vmem:[#allocation9 + $0x4c] ss:$16 sps:$4 sm:$0xff]   ;;  %12992 = vst [vmem:[#allocation74_spill] sm:$0xff] %v11765_v26  ;;  %v11767_v44 = vld [vmem:[#allocation9 + $0x48] ss:$16 sps:$4 sm:$0xff]  }
 0x687   :  { %9971 = vpow2.f32 %v8737_v9  ;;  %12991 = vst [vmem:[#allocation42_spill] sm:$0xff] %v11759_v10  ;;  %12993 = vst [vmem:[#allocation75_spill] sm:$0xff] %v11767_v44  ;;  %v11771_v59 = vld [vmem:[#allocation9 + $0x64] ss:$16 sps:$4 sm:$0xff]   ;;  %v11773_v13 = vld [vmem:[#allocation9 + $0x6c] ss:$16 sps:$4 sm:$0xff]  }
 0x688   :  { %9973 = vtanh.f32 %v4636_v63  ;;  %v11757_v63 = vld [vmem:[#allocation9 + $0x44] ss:$16 sps:$4 sm:$0xff]  }
 0x68e   :  { %v9966_v36 = vpop.eup %9965 }
 0x68f   :  { %v9968_v20 = vpop.eup %9967  ;;  %v11737_v25 = vmul.f32 %v9966_v36, %v9964_v34  ;;  %v11777_v36 = vld [vmem:[#allocation9 + $0x60] ss:$16 sps:$4 sm:$0xff]  }
 0x690   :  { %v9970_v8 = vpop.eup %9969  ;;  %v4641_v53 = vadd.f32 1.0, %v9968_v20  ;;  %v11779_v20 = vld [vmem:[#allocation9 + $0x68] ss:$16 sps:$4 sm:$0xff]  }
 0x691   :  { %12990 = vst [vmem:[#allocation41_spill] sm:$0xff] %v11737_v25  ;;  %v4647_v60 = vadd.f32 1.0, %v9970_v8  ;;  %v4695_v40 = vpack.c.bf16 %v11737_v25, %v11737_v25  ;;  %v9972_v22 = vpop.eup %9971  ;;  %v11785_v25 = vld [vmem:[#allocation9 + $0x8c] ss:$16 sps:$4 sm:$0xff]  }
 0x692   :  { %9975 = vrcp.f32 %v4641_v53  ;;  %v9974_v9 = vpop.eup %9973  ;;  %12994 = vst [vmem:[#allocation76_spill] sm:$0xff] %v11785_v25 }
 0x693   :  { %9977 = vrcp.f32 %v4647_v60  ;;  %4921 = vmatmul.mubr.bf16.vlgmr.msra.gmra.mrb[64].mxu0 %v4695_v40  ;;  %4962 = vmatmul.mubr.bf16.vlgmr.msra.gmra.mrb[72].mxu1 %v4695_v40  ;;  %v4654_v60 = vadd.f32 1.0, %v9972_v22  ;;  %v11783_v40 = vld [vmem:[#allocation9 + $0x84] ss:$16 sps:$4 sm:$0xff]  }
 0x694   :  { %5131 = vmatpush1.bf16.msra.mxu0 %v11739_v6  ;;  %5172 = vmatpush1.bf16.msra.mxu1 %v11741_v37  ;;  %v11798_v22 = vld [vmem:[#allocation9 + $0xa4] ss:$16 sps:$4 sm:$0xff]  }
 0x695   :  { %5132 = vmatprep.subr.bf16.mxu0 %v11745_v7  ;;  %5173 = vmatprep.subr.bf16.mxu1 %v11747_v38  ;;  %9979 = vrcp.f32 %v4654_v60  ;;  %12997 = vst [vmem:[#allocation44_spill] sm:$0xff] %v11798_v22  ;;  %v11817_v60 = vld [vmem:[#allocation9 + $0xc0] ss:$16 sps:$4 sm:$0xff]  }
 0x696   :  { %5162 = vmatprep.mubr.bf16.mxu0 %v12746_v27  ;;  %5203 = vmatprep.mubr.bf16.mxu1 %v12746_v27 }
 0x698   :  { %5133 = vmatpush1.bf16.msra.mxu0 %v11751_v30  ;;  %5174 = vmatpush1.bf16.msra.mxu1 %v11753_v50 }
 0x699   :  { %5134 = vmatprep.subr.bf16.mxu0 %v11757_v63  ;;  %5175 = vmatprep.subr.bf16.mxu1 %v11759_v10 }
 0x69c   :  { %v9976_v34 = vpop.eup %9975  ;;  %5135 = vmatpush1.bf16.msra.mxu0 %v11765_v26  ;;  %5176 = vmatpush1.bf16.msra.mxu1 %v11767_v44  ;;  %v11792_v44 = vld [vmem:[#allocation9 + $0x80] ss:$16 sps:$4 sm:$0xff]  }
 0x69d   :  { %v9978_v8 = vpop.eup %9977  ;;  %v4658_v53 = vmul.f32 %v9976_v34, %v9974_v9  ;;  %5136 = vmatprep.subr.bf16.mxu0 %v11771_v59  ;;  %5177 = vmatprep.subr.bf16.mxu1 %v11773_v13  ;;  %12995 = vst [vmem:[#allocation77_spill] sm:$0xff] %v11792_v44  ;;  %v11794_v9 = vld [vmem:[#allocation9 + $0x88] ss:$16 sps:$4 sm:$0xff]   ;;  %v11800_v34 = vld [vmem:[#allocation9 + $0xac] ss:$16 sps:$4 sm:$0xff]  }
 0x69e   :  { %v4657_v10 = vmul.f32 %v9978_v8, %v11476_v31  ;;  %12996 = vst [vmem:[#allocation43_spill] sm:$0xff] %v11794_v9  ;;  %12998 = vst [vmem:[#allocation45_spill] sm:$0xff] %v11800_v34  ;;  %v11805_v31 = vld [vmem:[#allocation9 + $0xa0] ss:$16 sps:$4 sm:$0xff]   ;;  %v11811_v8 = vld [vmem:[#allocation9 + $0xc4] ss:$16 sps:$4 sm:$0xff]  }
 0x69f   :  { %12999 = vst [vmem:[#allocation46_spill] sm:$0xff] %v11805_v31  ;;  %13001 = vst [vmem:[#allocation48_spill] sm:$0xff] %v11811_v8 }
 0x6a0   :  { %v11788_v26 = vadd.f32 %v4658_v53, %v4657_v10  ;;  %5137 = vmatpush1.bf16.msra.mxu0 %v11777_v36  ;;  %5178 = vmatpush1.bf16.msra.mxu1 %v11779_v20  ;;  %v11807_v10 = vld [vmem:[#allocation9 + $0xa8] ss:$16 sps:$4 sm:$0xff]   ;;  %v11813_v53 = vld [vmem:[#allocation9 + $0xcc] ss:$16 sps:$4 sm:$0xff]  }
 0x6a1   :  { %5138 = vmatprep.subr.bf16.mxu0 %v11783_v40  ;;  %5179 = vmatprep.subr.bf16.mxu1 %v11785_v25  ;;  %13000 = vst [vmem:[#allocation47_spill] sm:$0xff] %v11807_v10  ;;  %13002 = vst [vmem:[#allocation49_spill] sm:$0xff] %v11813_v53 }
 0x6a2   :  { %9981 = vtanh.f32 %v11788_v26 }
 0x6a4   :  { %5139 = vmatpush1.bf16.msra.mxu0 %v11792_v44  ;;  %5180 = vmatpush1.bf16.msra.mxu1 %v11794_v9  ;;  %v11819_v44 = vld [vmem:[#allocation9 + $0xc8] ss:$16 sps:$4 sm:$0xff]   ;;  %v11823_v9 = vld [vmem:[#allocation9 + $0xe4] ss:$16 sps:$4 sm:$0xff]  }
 0x6a5   :  { %5140 = vmatprep.subr.bf16.mxu0 %v11798_v22  ;;  %5181 = vmatprep.subr.bf16.mxu1 %v11800_v34  ;;  %v11825_v22 = vld [vmem:[#allocation9 + $0xec] ss:$16 sps:$4 sm:$0xff]   ;;  %v9980_v34 = vpop.eup %9979 }
 0x6a8   :  { %5141 = vmatpush1.bf16.msra.mxu0 %v11805_v31  ;;  %5182 = vmatpush1.bf16.msra.mxu1 %v11807_v10  ;;  %v11829_v31 = vld [vmem:[#allocation9 + $0xe0] ss:$16 sps:$4 sm:$0xff]   ;;  %v11831_v10 = vld [vmem:[#allocation9 + $0xe8] ss:$16 sps:$4 sm:$0xff]  }
 0x6a9   :  { %5142 = vmatprep.subr.bf16.mxu0 %v11811_v8  ;;  %5183 = vmatprep.subr.bf16.mxu1 %v11813_v53 }
 0x6ac   :  { %v9982_v25 = vpop.eup %9981  ;;  %5143 = vmatpush1.bf16.msra.mxu0 %v11817_v60  ;;  %5184 = vmatpush1.bf16.msra.mxu1 %v11819_v44 }
 0x6ad   :  { %5144 = vmatprep.subr.bf16.mxu0 %v11823_v9  ;;  %5185 = vmatprep.subr.bf16.mxu1 %v11825_v22  ;;  %v4661_v8 = vmul.f32 %v9982_v25, %v9980_v34 }
 0x6af   :  { %v4662_v53 = vpack.c.bf16 %v4661_v8, %v4661_v8 }
 0x6b0   :  { %5145 = vmatpush1.bf16.msra.mxu0 %v11829_v31  ;;  %5186 = vmatpush1.bf16.msra.mxu1 %v11831_v10 }
 0x6b1   :  { %5441 = vmatprep.subr.bf16.mxu0 %v11495_v18  ;;  %5482 = vmatprep.subr.bf16.mxu1 %v11497_v5  ;;  %v13003_v18 = vld [vmem:[#allocation63_spill] sm:$0xff]  ;;  %v13004_v5 = vld [vmem:[#allocation65_spill] sm:$0xff] }
 0x6b3   :  { %5163 = vmatmul.mubr.bf16.vlgmr.msra.gmra.mrb[68].mxu0 %v4662_v53  ;;  %5204 = vmatmul.mubr.bf16.vlgmr.msra.gmra.mrb[76].mxu1 %v4662_v53 }
 0x6b4   :  { %5442 = vmatpush1.bf16.msra.mxu0 %v11503_v12  ;;  %5483 = vmatpush1.bf16.msra.mxu1 %v11505_v46  ;;  %v13005_v12 = vld [vmem:[#allocation66_spill] sm:$0xff]  ;;  %v13006_v46 = vld [vmem:[#allocation67_spill] sm:$0xff] }
 0x6b5   :  { %5443 = vmatprep.subr.bf16.mxu0 %v11509_v19  ;;  %5484 = vmatprep.subr.bf16.mxu1 %v11511_v33  ;;  %v13007_v19 = vld [vmem:[#allocation68_spill] sm:$0xff]  ;;  %v13008_v33 = vld [vmem:[#allocation69_spill] sm:$0xff] }
 0x6b6   :  { %5473 = vmatprep.mubr.bf16.mxu0 %v12746_v27  ;;  %5514 = vmatprep.mubr.bf16.mxu1 %v12746_v27 }
 0x6b8   :  { %5444 = vmatpush1.bf16.msra.mxu0 %v11517_v0  ;;  %5485 = vmatpush1.bf16.msra.mxu1 %v11519_v16  ;;  %v13009_v0 = vld [vmem:[#allocation70_spill] sm:$0xff]  ;;  %v13010_v16 = vld [vmem:[#allocation71_spill] sm:$0xff] }
 0x6b9   :  { %5445 = vmatprep.subr.bf16.mxu0 %v11523_v29  ;;  %5486 = vmatprep.subr.bf16.mxu1 %v11525_v43  ;;  %v13011_v29 = vld [vmem:[#allocation72_spill] sm:$0xff]  ;;  %v13012_v43 = vld [vmem:[#allocation78_spill] sm:$0xff] }
 0x6bc   :  { %5446 = vmatpush1.bf16.msra.mxu0 %v11531_v17  ;;  %5487 = vmatpush1.bf16.msra.mxu1 %v11533_v45  ;;  %v13013_v17 = vld [vmem:[#allocation79_spill] sm:$0xff]  ;;  %v13014_v45 = vld [vmem:[#allocation80_spill] sm:$0xff] }
 0x6bd   :  { %5447 = vmatprep.subr.bf16.mxu0 %v11537_v23  ;;  %5488 = vmatprep.subr.bf16.mxu1 %v11539_v21  ;;  %v13015_v23 = vld [vmem:[#allocation81_spill] sm:$0xff]  ;;  %v13016_v21 = vld [vmem:[#allocation22_spill] sm:$0xff] }
 0x6c0   :  { %5448 = vmatpush1.bf16.msra.mxu0 %v11543_v42  ;;  %5489 = vmatpush1.bf16.msra.mxu1 %v11545_v24  ;;  %v13017_v42 = vld [vmem:[#allocation24_spill] sm:$0xff]  ;;  %v13018_v24 = vld [vmem:[#allocation25_spill] sm:$0xff] }
 0x6c1   :  { %5449 = vmatprep.subr.bf16.mxu0 %v11549_v15  ;;  %5490 = vmatprep.subr.bf16.mxu1 %v11551_v32  ;;  %v13019_v15 = vld [vmem:[#allocation27_spill] sm:$0xff]  ;;  %v13020_v32 = vld [vmem:[#allocation26_spill] sm:$0xff] }
 0x6c4   :  { %5450 = vmatpush1.bf16.msra.mxu0 %v11555_v14  ;;  %5491 = vmatpush1.bf16.msra.mxu1 %v11557_v39  ;;  %v13021_v14 = vld [vmem:[#allocation28_spill] sm:$0xff]  ;;  %v13022_v39 = vld [vmem:[#allocation29_spill] sm:$0xff] }
 0x6c5   :  { %5451 = vmatprep.subr.bf16.mxu0 %v11561_v28  ;;  %5492 = vmatprep.subr.bf16.mxu1 %v11563_v41  ;;  %v13023_v28 = vld [vmem:[#allocation31_spill] sm:$0xff]  ;;  %v13024_v41 = vld [vmem:[#allocation30_spill] sm:$0xff] }
 0x6c8   :  { %5452 = vmatpush1.bf16.msra.mxu0 %v11567_v49  ;;  %5493 = vmatpush1.bf16.msra.mxu1 %v11569_v47  ;;  %v13025_v49 = vld [vmem:[#allocation32_spill] sm:$0xff]  ;;  %v13026_v47 = vld [vmem:[#allocation33_spill] sm:$0xff] }
 0x6c9   :  { %5453 = vmatprep.subr.bf16.mxu0 %v11573_v48  ;;  %5494 = vmatprep.subr.bf16.mxu1 %v11575_v51  ;;  %v13027_v48 = vld [vmem:[#allocation35_spill] sm:$0xff]  ;;  %v13028_v51 = vld [vmem:[#allocation34_spill] sm:$0xff] }
 0x6cc   :  { %5454 = vmatpush1.bf16.msra.mxu0 %v11579_v52  ;;  %5495 = vmatpush1.bf16.msra.mxu1 %v11581_v35  ;;  %v13029_v52 = vld [vmem:[#allocation36_spill] sm:$0xff] }
 0x6cd   :  { %5455 = vmatprep.subr.bf16.mxu0 %v11585_v54  ;;  %5496 = vmatprep.subr.bf16.mxu1 %v11587_v55 }
 0x6d0   :  { %5456 = vmatpush1.bf16.msra.mxu0 %v11591_v56  ;;  %5497 = vmatpush1.bf16.msra.mxu1 %v11593_v57 }
 0x6d1   :  { %5777 = vmatprep.subr.bf16.mxu0 %v11603_v58  ;;  %5818 = vmatprep.subr.bf16.mxu1 %v11605_v61 }
 0x6d3   :  { %5474 = vmatmul.mubr.bf16.vlgmr.msra.gmra.mrb[72].mxu0 %v4662_v53  ;;  %5515 = vmatmul.mubr.bf16.vlgmr.msra.gmra.mrb[80].mxu1 %v4662_v53 }
 0x6d4   :  { %5778 = vmatpush1.bf16.msra.mxu0 %v11607_v62  ;;  %5819 = vmatpush1.bf16.msra.mxu1 %v11609_v1 }
 0x6d5   :  { %5779 = vmatprep.subr.bf16.mxu0 %v11615_v2  ;;  %5820 = vmatprep.subr.bf16.mxu1 %v11617_v3 }
 0x6d6   :  { %5809 = vmatprep.mubr.bf16.mxu0 %v12746_v27  ;;  %5850 = vmatprep.mubr.bf16.mxu1 %v12746_v27 }
 0x6d8   :  { %5780 = vmatpush1.bf16.msra.mxu0 %v11619_v4  ;;  %5821 = vmatpush1.bf16.msra.mxu1 %v13003_v18 }
 0x6d9   :  { %5781 = vmatprep.subr.bf16.mxu0 %v13004_v5  ;;  %5822 = vmatprep.subr.bf16.mxu1 %v13005_v12  ;;  %v13030_v12 = vld [vmem:[#allocation37_spill] sm:$0xff] }
 0x6dc   :  { %5782 = vmatpush1.bf16.msra.mxu0 %v13006_v46  ;;  %5823 = vmatpush1.bf16.msra.mxu1 %v13007_v19 }
 0x6dd   :  { %5783 = vmatprep.subr.bf16.mxu0 %v13008_v33  ;;  %5824 = vmatprep.subr.bf16.mxu1 %v13009_v0  ;;  %v13031_v0 = vld [vmem:[#allocation39_spill] sm:$0xff] }
 0x6e0   :  { %5784 = vmatpush1.bf16.msra.mxu0 %v13010_v16  ;;  %5825 = vmatpush1.bf16.msra.mxu1 %v13011_v29 }
 0x6e1   :  { %5785 = vmatprep.subr.bf16.mxu0 %v13012_v43  ;;  %5826 = vmatprep.subr.bf16.mxu1 %v13013_v17  ;;  %v13032_v17 = vld [vmem:[#allocation38_spill] sm:$0xff] }
 0x6e4   :  { %5786 = vmatpush1.bf16.msra.mxu0 %v13014_v45  ;;  %5827 = vmatpush1.bf16.msra.mxu1 %v13015_v23 }
 0x6e5   :  { %5787 = vmatprep.subr.bf16.mxu0 %v13016_v21  ;;  %5828 = vmatprep.subr.bf16.mxu1 %v13017_v42  ;;  %v13033_v21 = vld [vmem:[#allocation40_spill] sm:$0xff] }
 0x6e8   :  { %5788 = vmatpush1.bf16.msra.mxu0 %v13018_v24  ;;  %5829 = vmatpush1.bf16.msra.mxu1 %v13019_v15 }
 0x6e9   :  { %5789 = vmatprep.subr.bf16.mxu0 %v13020_v32  ;;  %5830 = vmatprep.subr.bf16.mxu1 %v13021_v14 }
 0x6ec   :  { %5790 = vmatpush1.bf16.msra.mxu0 %v13022_v39  ;;  %5831 = vmatpush1.bf16.msra.mxu1 %v13023_v28 }
 0x6ed   :  { %5791 = vmatprep.subr.bf16.mxu0 %v13024_v41  ;;  %5832 = vmatprep.subr.bf16.mxu1 %v13025_v49 }
 0x6f0   :  { %5792 = vmatpush1.bf16.msra.mxu0 %v13026_v47  ;;  %5833 = vmatpush1.bf16.msra.mxu1 %v13027_v48 }
 0x6f1   :  { %6019 = vmatprep.subr.bf16.mxu0 %v13028_v51  ;;  %6060 = vmatprep.subr.bf16.mxu1 %v13029_v52 }
 0x766   :  { %v4922_v35 = vpop.f32.mrb[64].mxu0  ;;  %v4963_v54 = vpop.f32.mrb[72].mxu1 }
 0x767   :  { %v4924_v55 = vpop.f32.mrb[65].mxu0  ;;  %v4965_v56 = vpop.f32.mrb[73].mxu1 }
 0x768   :  { %v4926_v57 = vpop.f32.mrb[66].mxu0  ;;  %v4967_v58 = vpop.f32.mrb[74].mxu1 }
 0x769   :  { %v4927_v61 = vpop.f32.mrb[67].mxu0  ;;  %v4968_v62 = vpop.f32.mrb[75].mxu1 }
 0x786   :  { %v5164_v1 = vpop.f32.mrb[68].mxu0  ;;  %v5205_v2 = vpop.f32.mrb[76].mxu1 }
 0x787   :  { %v5165_v3 = vadd.f32 %v5164_v1, %v4922_v35  ;;  %v5206_v4 = vadd.f32 %v5205_v2, %v4963_v54  ;;  %v5166_v25 = vpop.f32.mrb[69].mxu0  ;;  %v5207_v34 = vpop.f32.mrb[77].mxu1  ;;  %v13034_v54 = vld [vmem:[#allocation90_spill] sm:$0xff]  ;;  %v13036_v1 = vld [vmem:[#allocation92_spill] sm:$0xff] }
 0x788   :  { %v5167_v8 = vadd.f32 %v5166_v25, %v4924_v55  ;;  %v5208_v53 = vadd.f32 %v5207_v34, %v4965_v56  ;;  %v5168_v18 = vpop.f32.mrb[70].mxu0  ;;  %v5209_v5 = vpop.f32.mrb[78].mxu1  ;;  %v13035_v56 = vld [vmem:[#allocation91_spill] sm:$0xff] }
 0x789   :  { %v5212_v46 = vadd.f32 %v13030_v12, %v5165_v3  ;;  %v5169_v19 = vpop.f32.mrb[71].mxu0  ;;  %v5210_v33 = vpop.f32.mrb[79].mxu1  ;;  %v5214_v42 = vadd.f32 %v13033_v21, %v5206_v4  ;;  %v13037_v3 = vld [vmem:[#allocation93_spill] sm:$0xff] }
 0x78a   :  { %v5213_v16 = vadd.f32 %v13031_v0, %v5167_v8  ;;  %v5215_v45 = vadd.f32 %v13032_v17, %v5208_v53 }
 0x78b   :  { %v8802_v29 = vmul.f32 -1.442695, %v5212_v46 }
 0x78c   :  { %v8803_v43 = vmul.f32 -1.442695, %v5213_v16  ;;  %v8804_v23 = vmul.f32 -1.442695, %v5215_v45 }
 0x78d   :  { %9983 = vpow2.f32 %v8802_v29 }
 0x78e   :  { %9985 = vpow2.f32 %v8803_v43 }
 0x78f   :  { %9987 = vpow2.f32 %v8804_v23 }
 0x790   :  { %9989 = vtanh.f32 %v5214_v42  ;;  %v13039_v42 = vld [vmem:[#allocation42_spill] sm:$0xff] }
 0x797   :  { %v9984_v24 = vpop.eup %9983 }
 0x798   :  { %v9986_v15 = vpop.eup %9985  ;;  %v5219_v32 = vadd.f32 1.0, %v9984_v24 }
 0x799   :  { %v5225_v14 = vadd.f32 1.0, %v9986_v15  ;;  %v9988_v39 = vpop.eup %9987 }
 0x79a   :  { %9991 = vrcp.f32 %v5219_v32  ;;  %v9990_v28 = vpop.eup %9989  ;;  %v5232_v48 = vadd.f32 1.0, %v9988_v39  ;;  %v13043_v39 = vld [vmem:[#allocation77_spill] sm:$0xff] }
 0x79b   :  { %9993 = vrcp.f32 %v5225_v14 }
 0x79c   :  { %9995 = vrcp.f32 %v5232_v48  ;;  %v11957_v48 = vld [vmem:[#allocation7 + $0x4] ss:$16 sps:$4 sm:$0xff]  }
 0x7a4   :  { %v9992_v41 = vpop.eup %9991 }
 0x7a5   :  { %v9994_v49 = vpop.eup %9993  ;;  %v5236_v47 = vmul.f32 %v9992_v41, %v9990_v28  ;;  %v13047_v28 = vld [vmem:[#allocation46_spill] sm:$0xff]  ;;  %v13050_v41 = vld [vmem:[#allocation49_spill] sm:$0xff] }
 0x7a6   :  { %v5235_v51 = vmul.f32 %v9994_v49, %v11732_v11  ;;  %v5475_v52 = vpop.f32.mrb[72].mxu0  ;;  %v5516_v35 = vpop.f32.mrb[80].mxu1 }
 0x7a7   :  { %v5523_v55 = vadd.f32 %v5475_v52, %v13034_v54  ;;  %v5525_v57 = vadd.f32 %v5516_v35, %v13035_v56  ;;  %v5477_v58 = vpop.f32.mrb[73].mxu0  ;;  %v5518_v61 = vpop.f32.mrb[81].mxu1  ;;  %v11965_v35 = vld [vmem:[#allocation7] ss:$16 sps:$4 sm:$0xff]   ;;  %v11987_v54 = vld [vmem:[#allocation7 + $0x4c] ss:$16 sps:$4 sm:$0xff]  }
 0x7a8   :  { %v11914_v62 = vadd.f32 %v5236_v47, %v5235_v51  ;;  %v5524_v2 = vadd.f32 %v5477_v58, %v13036_v1  ;;  %v5526_v4 = vadd.f32 %v5518_v61, %v13037_v3  ;;  %v5479_v25 = vpop.f32.mrb[74].mxu0  ;;  %v5520_v34 = vpop.f32.mrb[82].mxu1  ;;  %v11959_v51 = vld [vmem:[#allocation7 + $0xc] ss:$16 sps:$4 sm:$0xff]   ;;  %v11995_v56 = vld [vmem:[#allocation7 + $0x48] ss:$16 sps:$4 sm:$0xff]  }
 0x7a9   :  { %v8837_v8 = vmul.f32 -1.442695, %v5523_v55  ;;  %v5480_v53 = vpop.f32.mrb[75].mxu0  ;;  %v5521_v11 = vpop.f32.mrb[83].mxu1  ;;  %v11993_v55 = vld [vmem:[#allocation7 + $0x40] ss:$16 sps:$4 sm:$0xff]  }
 0x7aa   :  { %v8838_v18 = vmul.f32 -1.442695, %v5524_v2  ;;  %9997 = vtanh.f32 %v11914_v62  ;;  %v8839_v5 = vmul.f32 -1.442695, %v5526_v4  ;;  %v9996_v46 = vpop.eup %9995  ;;  %v12001_v58 = vld [vmem:[#allocation7 + $0x6c] ss:$16 sps:$4 sm:$0xff]  }
 0x7ab   :  { %9999 = vpow2.f32 %v8837_v8  ;;  %v12005_v61 = vld [vmem:[#allocation7 + $0x60] ss:$16 sps:$4 sm:$0xff]   ;;  %v12007_v1 = vld [vmem:[#allocation7 + $0x68] ss:$16 sps:$4 sm:$0xff]   ;;  %v12011_v2 = vld [vmem:[#allocation7 + $0x84] ss:$16 sps:$4 sm:$0xff]  }
 0x7ac   :  { %10001 = vpow2.f32 %v8838_v18  ;;  %v12013_v3 = vld [vmem:[#allocation7 + $0x8c] ss:$16 sps:$4 sm:$0xff]   ;;  %v12017_v4 = vld [vmem:[#allocation7 + $0x80] ss:$16 sps:$4 sm:$0xff]   ;;  %v12019_v25 = vld [vmem:[#allocation7 + $0x88] ss:$16 sps:$4 sm:$0xff]  }
 0x7ad   :  { %10003 = vpow2.f32 %v8839_v5  ;;  %v12023_v34 = vld [vmem:[#allocation7 + $0xa4] ss:$16 sps:$4 sm:$0xff]   ;;  %v12025_v8 = vld [vmem:[#allocation7 + $0xac] ss:$16 sps:$4 sm:$0xff]   ;;  %v12029_v53 = vld [vmem:[#allocation7 + $0xa0] ss:$16 sps:$4 sm:$0xff]  }
 0x7ae   :  { %10005 = vtanh.f32 %v5525_v57  ;;  %v11999_v57 = vld [vmem:[#allocation7 + $0x64] ss:$16 sps:$4 sm:$0xff]   ;;  %v12031_v11 = vld [vmem:[#allocation7 + $0xa8] ss:$16 sps:$4 sm:$0xff]   ;;  %v12037_v5 = vld [vmem:[#allocation7 + $0xcc] ss:$16 sps:$4 sm:$0xff]  }
 0x7af   :  { %v12035_v18 = vld [vmem:[#allocation7 + $0xc4] ss:$16 sps:$4 sm:$0xff]  }
 0x7b4   :  { %v9998_v19 = vpop.eup %9997 }
 0x7b5   :  { %v10000_v33 = vpop.eup %9999  ;;  %v11919_v16 = vmul.f32 %v9998_v19, %v9996_v46  ;;  %v12041_v46 = vld [vmem:[#allocation7 + $0xc0] ss:$16 sps:$4 sm:$0xff]   ;;  %v12043_v19 = vld [vmem:[#allocation7 + $0xc8] ss:$16 sps:$4 sm:$0xff]  }
 0x7b6   :  { %v10002_v29 = vpop.eup %10001  ;;  %v5530_v43 = vadd.f32 1.0, %v10000_v33  ;;  %v12047_v33 = vld [vmem:[#allocation7 + $0xe4] ss:$16 sps:$4 sm:$0xff]  }
 0x7b7   :  { %13038 = vst [vmem:[#allocation82_spill] sm:$0xff] %v11919_v16  ;;  %v5536_v45 = vadd.f32 1.0, %v10002_v29  ;;  %v5584_v23 = vpack.c.bf16 %v11919_v16, %v11919_v16  ;;  %v10004_v24 = vpop.eup %10003  ;;  %v12049_v29 = vld [vmem:[#allocation7 + $0xec] ss:$16 sps:$4 sm:$0xff]   ;;  %v12137_v16 = vld [vmem:[#allocation10 + $0xc4] ss:$16 sps:$4 sm:$0xff]  }
 0x7b8   :  { %10007 = vrcp.f32 %v5530_v43  ;;  %v5543_v14 = vadd.f32 1.0, %v10004_v24  ;;  %v12053_v43 = vld [vmem:[#allocation7 + $0xe0] ss:$16 sps:$4 sm:$0xff]   ;;  %13072 = vst [vmem:[#allocation66_spill] sm:$0xff] %v12137_v16 }
 0x7b9   :  { %10009 = vrcp.f32 %v5536_v45  ;;  %5810 = vmatmul.mubr.bf16.vlgmr.msra.gmra.mrb[76].mxu0 %v5584_v23  ;;  %5851 = vmatmul.mubr.bf16.vlgmr.msra.gmra.mrb[84].mxu1 %v5584_v23  ;;  %v12055_v45 = vld [vmem:[#allocation7 + $0xe8] ss:$16 sps:$4 sm:$0xff]   ;;  %v12065_v23 = vld [vmem:[#allocation10 + $0x4] ss:$16 sps:$4 sm:$0xff]   ;;  %v12069_v24 = vld [vmem:[#allocation10] ss:$16 sps:$4 sm:$0xff]  }
 0x7ba   :  { %6020 = vmatpush1.bf16.msra.mxu0 %v11739_v6  ;;  %6061 = vmatpush1.bf16.msra.mxu1 %v11741_v37  ;;  %v10006_v6 = vpop.eup %10005  ;;  %v13040_v37 = vld [vmem:[#allocation74_spill] sm:$0xff]  ;;  %10011 = vrcp.f32 %v5543_v14  ;;  %v12091_v14 = vld [vmem:[#allocation10 + $0x4c] ss:$16 sps:$4 sm:$0xff]  }
 0x7bb   :  { %6021 = vmatprep.subr.bf16.mxu0 %v11745_v7  ;;  %6062 = vmatprep.subr.bf16.mxu1 %v11747_v38  ;;  %v13041_v7 = vld [vmem:[#allocation75_spill] sm:$0xff]  ;;  %13057 = vst [vmem:[#allocation54_spill] sm:$0xff] %v12091_v14 }
 0x7bc   :  { %6051 = vmatprep.mubr.bf16.mxu0 %v12746_v27  ;;  %6092 = vmatprep.mubr.bf16.mxu1 %v12746_v27 }
 0x7be   :  { %6022 = vmatpush1.bf16.msra.mxu0 %v11751_v30  ;;  %6063 = vmatpush1.bf16.msra.mxu1 %v11753_v50 }
 0x7bf   :  { %6023 = vmatprep.subr.bf16.mxu0 %v11757_v63  ;;  %6064 = vmatprep.subr.bf16.mxu1 %v13039_v42  ;;  %v13042_v63 = vld [vmem:[#allocation76_spill] sm:$0xff]  ;;  %v12067_v42 = vld [vmem:[#allocation10 + $0xc] ss:$16 sps:$4 sm:$0xff]  }
 0x7c2   :  { %v10008_v15 = vpop.eup %10007  ;;  %6024 = vmatpush1.bf16.msra.mxu0 %v13040_v37  ;;  %6065 = vmatpush1.bf16.msra.mxu1 %v13041_v7  ;;  %v12079_v37 = vld [vmem:[#allocation10 + $0x2c] ss:$16 sps:$4 sm:$0xff]   ;;  %v12081_v7 = vld [vmem:[#allocation10 + $0x20] ss:$16 sps:$4 sm:$0xff]  }
 0x7c3   :  { %v10010_v38 = vpop.eup %10009  ;;  %v5547_v32 = vmul.f32 %v10008_v15, %v10006_v6  ;;  %6025 = vmatprep.subr.bf16.mxu0 %v11771_v59  ;;  %6066 = vmatprep.subr.bf16.mxu1 %v11773_v13  ;;  %v13044_v59 = vld [vmem:[#allocation43_spill] sm:$0xff]  ;;  %v13045_v13 = vld [vmem:[#allocation44_spill] sm:$0xff]  ;;  %13053 = vst [vmem:[#allocation85_spill] sm:$0xff] %v12079_v37  ;;  %13054 = vst [vmem:[#allocation51_spill] sm:$0xff] %v12081_v7 }
 0x7c4   :  { %v5546_v30 = vmul.f32 %v10010_v38, %v11788_v26  ;;  %v13046_v26 = vld [vmem:[#allocation45_spill] sm:$0xff]  ;;  %v12077_v15 = vld [vmem:[#allocation10 + $0x24] ss:$16 sps:$4 sm:$0xff]  }
 0x7c5   :  { %v12071_v6 = vld [vmem:[#allocation10 + $0x8] ss:$16 sps:$4 sm:$0xff]   ;;  %13052 = vst [vmem:[#allocation84_spill] sm:$0xff] %v12077_v15 }
 0x7c6   :  { %v11938_v50 = vadd.f32 %v5547_v32, %v5546_v30  ;;  %6026 = vmatpush1.bf16.msra.mxu0 %v11777_v36  ;;  %6067 = vmatpush1.bf16.msra.mxu1 %v11779_v20  ;;  %v13048_v36 = vld [vmem:[#allocation47_spill] sm:$0xff]  ;;  %v13049_v20 = vld [vmem:[#allocation48_spill] sm:$0xff]  ;;  %13051 = vst [vmem:[#allocation83_spill] sm:$0xff] %v12071_v6 }
 0x7c7   :  { %6027 = vmatprep.subr.bf16.mxu0 %v11783_v40  ;;  %6068 = vmatprep.subr.bf16.mxu1 %v13042_v63  ;;  %v10012_v40 = vpop.eup %10011  ;;  %v12083_v38 = vld [vmem:[#allocation10 + $0x28] ss:$16 sps:$4 sm:$0xff]   ;;  %v12089_v32 = vld [vmem:[#allocation10 + $0x44] ss:$16 sps:$4 sm:$0xff]   ;;  %v12093_v30 = vld [vmem:[#allocation10 + $0x40] ss:$16 sps:$4 sm:$0xff]  }
 0x7c8   :  { %10013 = vtanh.f32 %v11938_v50  ;;  %13055 = vst [vmem:[#allocation52_spill] sm:$0xff] %v12083_v38  ;;  %13056 = vst [vmem:[#allocation53_spill] sm:$0xff] %v12089_v32  ;;  %v12095_v63 = vld [vmem:[#allocation10 + $0x48] ss:$16 sps:$4 sm:$0xff]  }
 0x7c9   :  { %13058 = vst [vmem:[#allocation55_spill] sm:$0xff] %v12093_v30  ;;  %13059 = vst [vmem:[#allocation56_spill] sm:$0xff] %v12095_v63 }
 0x7ca   :  { %6028 = vmatpush1.bf16.msra.mxu0 %v13043_v39  ;;  %6069 = vmatpush1.bf16.msra.mxu1 %v13044_v59  ;;  %v12101_v39 = vld [vmem:[#allocation10 + $0x64] ss:$16 sps:$4 sm:$0xff]   ;;  %v12103_v59 = vld [vmem:[#allocation10 + $0x6c] ss:$16 sps:$4 sm:$0xff]  }
 0x7cb   :  { %6029 = vmatprep.subr.bf16.mxu0 %v13045_v13  ;;  %6070 = vmatprep.subr.bf16.mxu1 %v13046_v26  ;;  %13060 = vst [vmem:[#allocation57_spill] sm:$0xff] %v12101_v39  ;;  %13061 = vst [vmem:[#allocation58_spill] sm:$0xff] %v12103_v59  ;;  %v12105_v13 = vld [vmem:[#allocation10 + $0x60] ss:$16 sps:$4 sm:$0xff]   ;;  %v12107_v26 = vld [vmem:[#allocation10 + $0x68] ss:$16 sps:$4 sm:$0xff]  }
 0x7cc   :  { %13062 = vst [vmem:[#allocation59_spill] sm:$0xff] %v12105_v13  ;;  %13063 = vst [vmem:[#allocation60_spill] sm:$0xff] %v12107_v26 }
 0x7ce   :  { %6030 = vmatpush1.bf16.msra.mxu0 %v13047_v28  ;;  %6071 = vmatpush1.bf16.msra.mxu1 %v13048_v36  ;;  %v12113_v28 = vld [vmem:[#allocation10 + $0x84] ss:$16 sps:$4 sm:$0xff]   ;;  %v12115_v36 = vld [vmem:[#allocation10 + $0x8c] ss:$16 sps:$4 sm:$0xff]  }
 0x7cf   :  { %6031 = vmatprep.subr.bf16.mxu0 %v13049_v20  ;;  %6072 = vmatprep.subr.bf16.mxu1 %v13050_v41  ;;  %13064 = vst [vmem:[#allocation62_spill] sm:$0xff] %v12113_v28  ;;  %13065 = vst [vmem:[#allocation64_spill] sm:$0xff] %v12115_v36  ;;  %v12117_v20 = vld [vmem:[#allocation10 + $0x80] ss:$16 sps:$4 sm:$0xff]   ;;  %v12119_v41 = vld [vmem:[#allocation10 + $0x88] ss:$16 sps:$4 sm:$0xff]  }
 0x7d0   :  { %13066 = vst [vmem:[#allocation86_spill] sm:$0xff] %v12117_v20  ;;  %13067 = vst [vmem:[#allocation87_spill] sm:$0xff] %v12119_v41 }
 0x7d2   :  { %v10014_v49 = vpop.eup %10013  ;;  %6032 = vmatpush1.bf16.msra.mxu0 %v11817_v60  ;;  %6073 = vmatpush1.bf16.msra.mxu1 %v11819_v44  ;;  %v11967_v60 = vld [vmem:[#allocation7 + $0x8] ss:$16 sps:$4 sm:$0xff]   ;;  %v11971_v44 = vld [vmem:[#allocation7 + $0x24] ss:$16 sps:$4 sm:$0xff]  }
 0x7d3   :  { %6033 = vmatprep.subr.bf16.mxu0 %v11823_v9  ;;  %6074 = vmatprep.subr.bf16.mxu1 %v11825_v22  ;;  %v5550_v47 = vmul.f32 %v10014_v49, %v10012_v40  ;;  %v11973_v9 = vld [vmem:[#allocation7 + $0x2c] ss:$16 sps:$4 sm:$0xff]   ;;  %v11979_v22 = vld [vmem:[#allocation7 + $0x20] ss:$16 sps:$4 sm:$0xff]   ;;  %v12125_v40 = vld [vmem:[#allocation10 + $0xa4] ss:$16 sps:$4 sm:$0xff]  }
 0x7d4   :  { %13068 = vst [vmem:[#allocation88_spill] sm:$0xff] %v12125_v40  ;;  %v12127_v49 = vld [vmem:[#allocation10 + $0xac] ss:$16 sps:$4 sm:$0xff]  }
 0x7d5   :  { %v11961_v52 = vpack.c.bf16 %v5550_v47, %v5550_v47  ;;  %13069 = vst [vmem:[#allocation89_spill] sm:$0xff] %v12127_v49  ;;  %v12129_v47 = vld [vmem:[#allocation10 + $0xa0] ss:$16 sps:$4 sm:$0xff]  }
 0x7d6   :  { %6034 = vmatpush1.bf16.msra.mxu0 %v11829_v31  ;;  %6075 = vmatpush1.bf16.msra.mxu1 %v11831_v10  ;;  %v11981_v31 = vld [vmem:[#allocation7 + $0x28] ss:$16 sps:$4 sm:$0xff]   ;;  %v11985_v10 = vld [vmem:[#allocation7 + $0x44] ss:$16 sps:$4 sm:$0xff]   ;;  %13070 = vst [vmem:[#allocation63_spill] sm:$0xff] %v12129_v47 }
 0x7d7   :  { %6330 = vmatprep.subr.bf16.mxu0 %v11957_v48  ;;  %6371 = vmatprep.subr.bf16.mxu1 %v11959_v51 }
 0x7d9   :  { %6052 = vmatmul.mubr.bf16.vlgmr.msra.gmra.mrb[80].mxu0 %v11961_v52  ;;  %6093 = vmatmul.mubr.bf16.vlgmr.msra.gmra.mrb[88].mxu1 %v11961_v52 }
 0x7da   :  { %6331 = vmatpush1.bf16.msra.mxu0 %v11965_v35  ;;  %6372 = vmatpush1.bf16.msra.mxu1 %v11967_v60 }
 0x7db   :  { %6332 = vmatprep.subr.bf16.mxu0 %v11971_v44  ;;  %6373 = vmatprep.subr.bf16.mxu1 %v11973_v9 }
 0x7dc   :  { %6362 = vmatprep.mubr.bf16.mxu0 %v12746_v27  ;;  %6403 = vmatprep.mubr.bf16.mxu1 %v12746_v27 }
 0x7de   :  { %6333 = vmatpush1.bf16.msra.mxu0 %v11979_v22  ;;  %6374 = vmatpush1.bf16.msra.mxu1 %v11981_v31 }
 0x7df   :  { %6334 = vmatprep.subr.bf16.mxu0 %v11985_v10  ;;  %6375 = vmatprep.subr.bf16.mxu1 %v11987_v54 }
 0x7e2   :  { %6335 = vmatpush1.bf16.msra.mxu0 %v11993_v55  ;;  %6376 = vmatpush1.bf16.msra.mxu1 %v11995_v56 }
 0x7e3   :  { %6336 = vmatprep.subr.bf16.mxu0 %v11999_v57  ;;  %6377 = vmatprep.subr.bf16.mxu1 %v12001_v58 }
 0x7e6   :  { %6337 = vmatpush1.bf16.msra.mxu0 %v12005_v61  ;;  %6378 = vmatpush1.bf16.msra.mxu1 %v12007_v1 }
 0x7e7   :  { %6338 = vmatprep.subr.bf16.mxu0 %v12011_v2  ;;  %6379 = vmatprep.subr.bf16.mxu1 %v12013_v3 }
 0x7ea   :  { %6339 = vmatpush1.bf16.msra.mxu0 %v12017_v4  ;;  %6380 = vmatpush1.bf16.msra.mxu1 %v12019_v25 }
 0x7eb   :  { %6340 = vmatprep.subr.bf16.mxu0 %v12023_v34  ;;  %6381 = vmatprep.subr.bf16.mxu1 %v12025_v8 }
 0x7ee   :  { %6341 = vmatpush1.bf16.msra.mxu0 %v12029_v53  ;;  %6382 = vmatpush1.bf16.msra.mxu1 %v12031_v11 }
 0x7ef   :  { %6342 = vmatprep.subr.bf16.mxu0 %v12035_v18  ;;  %6383 = vmatprep.subr.bf16.mxu1 %v12037_v5 }
 0x7f2   :  { %6343 = vmatpush1.bf16.msra.mxu0 %v12041_v46  ;;  %6384 = vmatpush1.bf16.msra.mxu1 %v12043_v19 }
 0x7f3   :  { %6344 = vmatprep.subr.bf16.mxu0 %v12047_v33  ;;  %6385 = vmatprep.subr.bf16.mxu1 %v12049_v29 }
 0x7f6   :  { %6345 = vmatpush1.bf16.msra.mxu0 %v12053_v43  ;;  %6386 = vmatpush1.bf16.msra.mxu1 %v12055_v45 }
 0x7f7   :  { %6666 = vmatprep.subr.bf16.mxu0 %v12065_v23  ;;  %6707 = vmatprep.subr.bf16.mxu1 %v12067_v42 }
 0x7f9   :  { %6363 = vmatmul.mubr.bf16.vlgmr.msra.gmra.mrb[84].mxu0 %v11961_v52  ;;  %6404 = vmatmul.mubr.bf16.vlgmr.msra.gmra.mrb[92].mxu1 %v11961_v52  ;;  %v12131_v52 = vld [vmem:[#allocation10 + $0xa8] ss:$16 sps:$4 sm:$0xff]  }
 0x7fa   :  { %6698 = vmatprep.mubr.bf16.mxu0 %v12746_v27  ;;  %6739 = vmatprep.mubr.bf16.mxu1 %v12746_v27  ;;  %13071 = vst [vmem:[#allocation65_spill] sm:$0xff] %v12131_v52 }
 0x7fb   :  { %6667 = vmatpush1.bf16.msra.mxu0 %v12069_v24  ;;  %6708 = vmatpush1.bf16.msra.mxu1 %v12071_v6 }
 0x7fc   :  { %6668 = vmatprep.subr.bf16.mxu0 %v12077_v15  ;;  %6709 = vmatprep.subr.bf16.mxu1 %v12079_v37 }
 0x7ff   :  { %6669 = vmatpush1.bf16.msra.mxu0 %v12081_v7  ;;  %6710 = vmatpush1.bf16.msra.mxu1 %v12083_v38 }
 0x800   :  { %6670 = vmatprep.subr.bf16.mxu0 %v12089_v32  ;;  %6711 = vmatprep.subr.bf16.mxu1 %v12091_v14 }
 0x803   :  { %6671 = vmatpush1.bf16.msra.mxu0 %v12093_v30  ;;  %6712 = vmatpush1.bf16.msra.mxu1 %v12095_v63 }
 0x804   :  { %6672 = vmatprep.subr.bf16.mxu0 %v12101_v39  ;;  %6713 = vmatprep.subr.bf16.mxu1 %v12103_v59 }
 0x807   :  { %6673 = vmatpush1.bf16.msra.mxu0 %v12105_v13  ;;  %6714 = vmatpush1.bf16.msra.mxu1 %v12107_v26 }
 0x808   :  { %6674 = vmatprep.subr.bf16.mxu0 %v12113_v28  ;;  %6715 = vmatprep.subr.bf16.mxu1 %v12115_v36  ;;  %v12143_v36 = vld [vmem:[#allocation10 + $0xc8] ss:$16 sps:$4 sm:$0xff]  }
 0x809   :  { %13075 = vst [vmem:[#allocation69_spill] sm:$0xff] %v12143_v36 }
 0x80b   :  { %6675 = vmatpush1.bf16.msra.mxu0 %v12117_v20  ;;  %6716 = vmatpush1.bf16.msra.mxu1 %v12119_v41  ;;  %v12139_v20 = vld [vmem:[#allocation10 + $0xcc] ss:$16 sps:$4 sm:$0xff]   ;;  %v12141_v41 = vld [vmem:[#allocation10 + $0xc0] ss:$16 sps:$4 sm:$0xff]  }
 0x80c   :  { %6676 = vmatprep.subr.bf16.mxu0 %v12125_v40  ;;  %6717 = vmatprep.subr.bf16.mxu1 %v12127_v49  ;;  %13073 = vst [vmem:[#allocation67_spill] sm:$0xff] %v12139_v20  ;;  %13074 = vst [vmem:[#allocation68_spill] sm:$0xff] %v12141_v41  ;;  %v12149_v49 = vld [vmem:[#allocation10 + $0xe4] ss:$16 sps:$4 sm:$0xff]   ;;  %v12155_v40 = vld [vmem:[#allocation10 + $0xe8] ss:$16 sps:$4 sm:$0xff]  }
 0x80d   :  { %13076 = vst [vmem:[#allocation70_spill] sm:$0xff] %v12149_v49  ;;  %13079 = vst [vmem:[#allocation78_spill] sm:$0xff] %v12155_v40 }
 0x80f   :  { %6677 = vmatpush1.bf16.msra.mxu0 %v12129_v47  ;;  %6718 = vmatpush1.bf16.msra.mxu1 %v12131_v52  ;;  %v12151_v47 = vld [vmem:[#allocation10 + $0xec] ss:$16 sps:$4 sm:$0xff]   ;;  %v12153_v52 = vld [vmem:[#allocation10 + $0xe0] ss:$16 sps:$4 sm:$0xff]  }
 0x810   :  { %6678 = vmatprep.subr.bf16.mxu0 %v12137_v16  ;;  %6719 = vmatprep.subr.bf16.mxu1 %v12139_v20  ;;  %13077 = vst [vmem:[#allocation71_spill] sm:$0xff] %v12151_v47  ;;  %13078 = vst [vmem:[#allocation72_spill] sm:$0xff] %v12153_v52  ;;  %v12161_v20 = vld [vmem:[#allocation9 + $0x4] ss:$16 sps:$4 sm:$0xff]  }
 0x811   :  { %13080 = vst [vmem:[#allocation79_spill] sm:$0xff] %v12161_v20 }
 0x813   :  { %6679 = vmatpush1.bf16.msra.mxu0 %v12141_v41  ;;  %6720 = vmatpush1.bf16.msra.mxu1 %v12143_v36  ;;  %v12163_v41 = vld [vmem:[#allocation9 + $0xc] ss:$16 sps:$4 sm:$0xff]  }
 0x814   :  { %6680 = vmatprep.subr.bf16.mxu0 %v12149_v49  ;;  %6721 = vmatprep.subr.bf16.mxu1 %v12151_v47  ;;  %13081 = vst [vmem:[#allocation80_spill] sm:$0xff] %v12163_v41 }
 0x817   :  { %6681 = vmatpush1.bf16.msra.mxu0 %v12153_v52  ;;  %6722 = vmatpush1.bf16.msra.mxu1 %v12155_v40 }
 0x818   :  { %6908 = vmatprep.subr.bf16.mxu0 %v12161_v20  ;;  %6949 = vmatprep.subr.bf16.mxu1 %v12163_v41 }
 0x88c   :  { %v5811_v36 = vpop.f32.mrb[76].mxu0  ;;  %v5852_v16 = vpop.f32.mrb[84].mxu1 }
 0x88d   :  { %v5813_v28 = vpop.f32.mrb[77].mxu0  ;;  %v5854_v26 = vpop.f32.mrb[85].mxu1 }
 0x88e   :  { %v5815_v13 = vpop.f32.mrb[78].mxu0  ;;  %v5856_v49 = vpop.f32.mrb[86].mxu1 }
 0x88f   :  { %v5816_v59 = vpop.f32.mrb[79].mxu0  ;;  %v5857_v47 = vpop.f32.mrb[87].mxu1 }
 0x8ac   :  { %v6053_v39 = vpop.f32.mrb[80].mxu0  ;;  %v6094_v52 = vpop.f32.mrb[88].mxu1 }
 0x8ad   :  { %v6054_v63 = vadd.f32 %v6053_v39, %v5811_v36  ;;  %v6095_v40 = vadd.f32 %v6094_v52, %v5852_v16  ;;  %v6055_v30 = vpop.f32.mrb[81].mxu0  ;;  %v6096_v14 = vpop.f32.mrb[89].mxu1  ;;  %v13084_v52 = vld [vmem:[#allocation96_spill] sm:$0xff] }
 0x8ae   :  { %v6056_v32 = vadd.f32 %v6055_v30, %v5813_v28  ;;  %v6097_v38 = vadd.f32 %v6096_v14, %v5854_v26  ;;  %v6057_v7 = vpop.f32.mrb[82].mxu0  ;;  %v6098_v20 = vpop.f32.mrb[90].mxu1  ;;  %v13082_v26 = vld [vmem:[#allocation94_spill] sm:$0xff]  ;;  %v13083_v28 = vld [vmem:[#allocation95_spill] sm:$0xff] }
 0x8af   :  { %v6101_v41 = vadd.f32 %v13030_v12, %v6054_v63  ;;  %v6058_v37 = vpop.f32.mrb[83].mxu0  ;;  %v6099_v15 = vpop.f32.mrb[91].mxu1  ;;  %v6103_v16 = vadd.f32 %v13033_v21, %v6095_v40 }
 0x8b0   :  { %v6102_v6 = vadd.f32 %v13031_v0, %v6056_v32  ;;  %v6104_v59 = vadd.f32 %v13032_v17, %v6097_v38 }
 0x8b1   :  { %v8904_v13 = vmul.f32 -1.442695, %v6101_v41 }
 0x8b2   :  { %v8905_v49 = vmul.f32 -1.442695, %v6102_v6  ;;  %v8906_v39 = vmul.f32 -1.442695, %v6104_v59 }
 0x8b3   :  { %10015 = vpow2.f32 %v8904_v13 }
 0x8b4   :  { %10017 = vpow2.f32 %v8905_v49  ;;  %v13085_v49 = vld [vmem:[#allocation97_spill] sm:$0xff] }
 0x8b5   :  { %10019 = vpow2.f32 %v8906_v39 }
 0x8b6   :  { %10021 = vtanh.f32 %v6103_v16 }
 0x8bd   :  { %v10016_v36 = vpop.eup %10015 }
 0x8be   :  { %v10018_v30 = vpop.eup %10017  ;;  %v6108_v14 = vadd.f32 1.0, %v10016_v36 }
 0x8bf   :  { %v6114_v7 = vadd.f32 1.0, %v10018_v30  ;;  %v10020_v12 = vpop.eup %10019 }
 0x8c0   :  { %10023 = vrcp.f32 %v6108_v14  ;;  %v10022_v15 = vpop.eup %10021  ;;  %v6121_v32 = vadd.f32 1.0, %v10020_v12 }
 0x8c1   :  { %10025 = vrcp.f32 %v6114_v7 }
 0x8c2   :  { %10027 = vrcp.f32 %v6121_v32  ;;  %v12183_v32 = vld [vmem:[#allocation9 + $0x8] ss:$16 sps:$4 sm:$0xff]  }
 0x8ca   :  { %v10024_v0 = vpop.eup %10023 }
 0x8cb   :  { %v10026_v37 = vpop.eup %10025  ;;  %v6125_v6 = vmul.f32 %v10024_v0, %v10022_v15 }
 0x8cc   :  { %v6124_v63 = vmul.f32 %v10026_v37, %v11914_v62  ;;  %v6364_v17 = vpop.f32.mrb[84].mxu0  ;;  %v6405_v38 = vpop.f32.mrb[92].mxu1 }
 0x8cd   :  { %v6412_v21 = vadd.f32 %v6364_v17, %v13082_v26  ;;  %v6414_v20 = vadd.f32 %v6405_v38, %v13083_v28  ;;  %v6366_v41 = vpop.f32.mrb[85].mxu0  ;;  %v6407_v40 = vpop.f32.mrb[93].mxu1  ;;  %v12181_v17 = vld [vmem:[#allocation9] ss:$16 sps:$4 sm:$0xff]   ;;  %v12189_v28 = vld [vmem:[#allocation9 + $0x2c] ss:$16 sps:$4 sm:$0xff]  }
 0x8ce   :  { %v12174_v47 = vadd.f32 %v6125_v6, %v6124_v63  ;;  %v6413_v13 = vadd.f32 %v6366_v41, %v13084_v52  ;;  %v6415_v59 = vadd.f32 %v6407_v40, %v13085_v49  ;;  %v6368_v39 = vpop.f32.mrb[86].mxu0  ;;  %v6409_v16 = vpop.f32.mrb[94].mxu1  ;;  %v12193_v41 = vld [vmem:[#allocation9 + $0x20] ss:$16 sps:$4 sm:$0xff]   ;;  %v12195_v40 = vld [vmem:[#allocation9 + $0x28] ss:$16 sps:$4 sm:$0xff]  }
 0x8cf   :  { %v8939_v36 = vmul.f32 -1.442695, %v6412_v21  ;;  %v6369_v30 = vpop.f32.mrb[87].mxu0  ;;  %v6410_v62 = vpop.f32.mrb[95].mxu1  ;;  %v12187_v21 = vld [vmem:[#allocation9 + $0x24] ss:$16 sps:$4 sm:$0xff]  }
 0x8d0   :  { %v8940_v14 = vmul.f32 -1.442695, %v6413_v13  ;;  %10029 = vtanh.f32 %v12174_v47  ;;  %v8941_v7 = vmul.f32 -1.442695, %v6415_v59  ;;  %v10028_v12 = vpop.eup %10027  ;;  %v12201_v52 = vld [vmem:[#allocation9 + $0x4c] ss:$16 sps:$4 sm:$0xff]  }
 0x8d1   :  { %10031 = vpow2.f32 %v8939_v36  ;;  %v12207_v13 = vld [vmem:[#allocation9 + $0x40] ss:$16 sps:$4 sm:$0xff]   ;;  %v12209_v49 = vld [vmem:[#allocation9 + $0x48] ss:$16 sps:$4 sm:$0xff]   ;;  %v12213_v59 = vld [vmem:[#allocation9 + $0x64] ss:$16 sps:$4 sm:$0xff]  }
 0x8d2   :  { %10033 = vpow2.f32 %v8940_v14  ;;  %v12215_v39 = vld [vmem:[#allocation9 + $0x6c] ss:$16 sps:$4 sm:$0xff]   ;;  %v12219_v62 = vld [vmem:[#allocation9 + $0x60] ss:$16 sps:$4 sm:$0xff]   ;;  %v12221_v14 = vld [vmem:[#allocation9 + $0x68] ss:$16 sps:$4 sm:$0xff]  }
 0x8d3   :  { %10035 = vpow2.f32 %v8941_v7 }
 0x8d4   :  { %10037 = vtanh.f32 %v6414_v20  ;;  %v12199_v20 = vld [vmem:[#allocation9 + $0x44] ss:$16 sps:$4 sm:$0xff]  }
 0x8da   :  { %v10030_v15 = vpop.eup %10029 }
 0x8db   :  { %v10032_v0 = vpop.eup %10031  ;;  %v12179_v37 = vmul.f32 %v10030_v15, %v10028_v12 }
 0x8dc   :  { %v10034_v6 = vpop.eup %10033  ;;  %v6419_v63 = vadd.f32 1.0, %v10032_v0  ;;  %v12225_v0 = vld [vmem:[#allocation9 + $0x84] ss:$16 sps:$4 sm:$0xff]  }
 0x8dd   :  { %13086 = vst [vmem:[#allocation81_spill] sm:$0xff] %v12179_v37  ;;  %v6425_v38 = vadd.f32 1.0, %v10034_v6  ;;  %v6473_v26 = vpack.c.bf16 %v12179_v37, %v12179_v37  ;;  %v10036_v16 = vpop.eup %10035  ;;  %v12227_v6 = vld [vmem:[#allocation9 + $0x8c] ss:$16 sps:$4 sm:$0xff]   ;;  %v12261_v37 = vld [vmem:[#allocation9 + $0xc8] ss:$16 sps:$4 sm:$0xff]  }
 0x8de   :  { %10039 = vrcp.f32 %v6419_v63  ;;  %v10038_v36 = vpop.eup %10037  ;;  %v6432_v15 = vadd.f32 1.0, %v10036_v16  ;;  %v12240_v16 = vld [vmem:[#allocation9 + $0xa4] ss:$16 sps:$4 sm:$0xff]  }
 0x8df   :  { %10041 = vrcp.f32 %v6425_v38  ;;  %6699 = vmatmul.mubr.bf16.vlgmr.msra.gmra.mrb[88].mxu0 %v6473_v26  ;;  %6740 = vmatmul.mubr.bf16.vlgmr.msra.gmra.mrb[96].mxu1 %v6473_v26  ;;  %v12234_v26 = vld [vmem:[#allocation9 + $0x80] ss:$16 sps:$4 sm:$0xff]   ;;  %13089 = vst [vmem:[#allocation25_spill] sm:$0xff] %v12240_v16 }
 0x8e0   :  { %6909 = vmatpush1.bf16.msra.mxu0 %v12181_v17  ;;  %6950 = vmatpush1.bf16.msra.mxu1 %v12183_v32  ;;  %13087 = vst [vmem:[#allocation22_spill] sm:$0xff] %v12234_v26  ;;  %10043 = vrcp.f32 %v6432_v15  ;;  %v12255_v15 = vld [vmem:[#allocation9 + $0xcc] ss:$16 sps:$4 sm:$0xff]  }
 0x8e1   :  { %6910 = vmatprep.subr.bf16.mxu0 %v12187_v21  ;;  %6951 = vmatprep.subr.bf16.mxu1 %v12189_v28  ;;  %13094 = vst [vmem:[#allocation31_spill] sm:$0xff] %v12255_v15 }
 0x8e2   :  { %6940 = vmatprep.mubr.bf16.mxu0 %v12746_v27  ;;  %6981 = vmatprep.mubr.bf16.mxu1 %v12746_v27 }
 0x8e4   :  { %6911 = vmatpush1.bf16.msra.mxu0 %v12193_v41  ;;  %6952 = vmatpush1.bf16.msra.mxu1 %v12195_v40 }
 0x8e5   :  { %6912 = vmatprep.subr.bf16.mxu0 %v12199_v20  ;;  %6953 = vmatprep.subr.bf16.mxu1 %v12201_v52 }
 0x8e8   :  { %v10040_v30 = vpop.eup %10039  ;;  %6913 = vmatpush1.bf16.msra.mxu0 %v12207_v13  ;;  %6954 = vmatpush1.bf16.msra.mxu1 %v12209_v49 }
 0x8e9   :  { %v10042_v7 = vpop.eup %10041  ;;  %v6436_v12 = vmul.f32 %v10040_v30, %v10038_v36  ;;  %6914 = vmatprep.subr.bf16.mxu0 %v12213_v59  ;;  %6955 = vmatprep.subr.bf16.mxu1 %v12215_v39  ;;  %v12236_v36 = vld [vmem:[#allocation9 + $0x88] ss:$16 sps:$4 sm:$0xff]   ;;  %v12242_v30 = vld [vmem:[#allocation9 + $0xac] ss:$16 sps:$4 sm:$0xff]  }
 0x8ea   :  { %v6435_v63 = vmul.f32 %v10042_v7, %v11938_v50  ;;  %13088 = vst [vmem:[#allocation24_spill] sm:$0xff] %v12236_v36  ;;  %13090 = vst [vmem:[#allocation27_spill] sm:$0xff] %v12242_v30  ;;  %v12247_v50 = vld [vmem:[#allocation9 + $0xa0] ss:$16 sps:$4 sm:$0xff]   ;;  %v12249_v7 = vld [vmem:[#allocation9 + $0xa8] ss:$16 sps:$4 sm:$0xff]  }
 0x8eb   :  { %13091 = vst [vmem:[#allocation26_spill] sm:$0xff] %v12247_v50  ;;  %13092 = vst [vmem:[#allocation28_spill] sm:$0xff] %v12249_v7 }
 0x8ec   :  { %v12230_v38 = vadd.f32 %v6436_v12, %v6435_v63  ;;  %6915 = vmatpush1.bf16.msra.mxu0 %v12219_v62  ;;  %6956 = vmatpush1.bf16.msra.mxu1 %v12221_v14  ;;  %v12253_v12 = vld [vmem:[#allocation9 + $0xc4] ss:$16 sps:$4 sm:$0xff]   ;;  %v12259_v63 = vld [vmem:[#allocation9 + $0xc0] ss:$16 sps:$4 sm:$0xff]  }
 0x8ed   :  { %6916 = vmatprep.subr.bf16.mxu0 %v12225_v0  ;;  %6957 = vmatprep.subr.bf16.mxu1 %v12227_v6  ;;  %13093 = vst [vmem:[#allocation29_spill] sm:$0xff] %v12253_v12 }
 0x8ee   :  { %10045 = vtanh.f32 %v12230_v38 }
 0x8f0   :  { %6917 = vmatpush1.bf16.msra.mxu0 %v12234_v26  ;;  %6958 = vmatpush1.bf16.msra.mxu1 %v12236_v36  ;;  %v12265_v36 = vld [vmem:[#allocation9 + $0xe4] ss:$16 sps:$4 sm:$0xff]  }
 0x8f1   :  { %6918 = vmatprep.subr.bf16.mxu0 %v12240_v16  ;;  %6959 = vmatprep.subr.bf16.mxu1 %v12242_v30  ;;  %v12267_v16 = vld [vmem:[#allocation9 + $0xec] ss:$16 sps:$4 sm:$0xff]   ;;  %v10044_v30 = vpop.eup %10043 }
 0x8f4   :  { %6919 = vmatpush1.bf16.msra.mxu0 %v12247_v50  ;;  %6960 = vmatpush1.bf16.msra.mxu1 %v12249_v7  ;;  %v12271_v50 = vld [vmem:[#allocation9 + $0xe0] ss:$16 sps:$4 sm:$0xff]   ;;  %v12273_v7 = vld [vmem:[#allocation9 + $0xe8] ss:$16 sps:$4 sm:$0xff]  }
 0x8f5   :  { %6920 = vmatprep.subr.bf16.mxu0 %v12253_v12  ;;  %6961 = vmatprep.subr.bf16.mxu1 %v12255_v15 }
 0x8f8   :  { %v10046_v26 = vpop.eup %10045  ;;  %6921 = vmatpush1.bf16.msra.mxu0 %v12259_v63  ;;  %6962 = vmatpush1.bf16.msra.mxu1 %v12261_v37 }
 0x8f9   :  { %6922 = vmatprep.subr.bf16.mxu0 %v12265_v36  ;;  %6963 = vmatprep.subr.bf16.mxu1 %v12267_v16  ;;  %v6439_v12 = vmul.f32 %v10046_v26, %v10044_v30 }
 0x8fb   :  { %v6440_v15 = vpack.c.bf16 %v6439_v12, %v6439_v12 }
 0x8fc   :  { %6923 = vmatpush1.bf16.msra.mxu0 %v12271_v50  ;;  %6964 = vmatpush1.bf16.msra.mxu1 %v12273_v7 }
 0x8fd   :  { %7219 = vmatprep.subr.bf16.mxu0 %v11957_v48  ;;  %7260 = vmatprep.subr.bf16.mxu1 %v11959_v51  ;;  %v13095_v48 = vld [vmem:[#allocation83_spill] sm:$0xff]  ;;  %v13096_v51 = vld [vmem:[#allocation84_spill] sm:$0xff] }
 0x8ff   :  { %6941 = vmatmul.mubr.bf16.vlgmr.msra.gmra.mrb[92].mxu0 %v6440_v15  ;;  %6982 = vmatmul.mubr.bf16.vlgmr.msra.gmra.mrb[100].mxu1 %v6440_v15 }
 0x900   :  { %7220 = vmatpush1.bf16.msra.mxu0 %v11965_v35  ;;  %7261 = vmatpush1.bf16.msra.mxu1 %v11967_v60  ;;  %v13097_v35 = vld [vmem:[#allocation85_spill] sm:$0xff]  ;;  %v13098_v60 = vld [vmem:[#allocation51_spill] sm:$0xff] }
 0x901   :  { %7221 = vmatprep.subr.bf16.mxu0 %v11971_v44  ;;  %7262 = vmatprep.subr.bf16.mxu1 %v11973_v9  ;;  %v13099_v44 = vld [vmem:[#allocation52_spill] sm:$0xff]  ;;  %v13100_v9 = vld [vmem:[#allocation53_spill] sm:$0xff] }
 0x902   :  { %7251 = vmatprep.mubr.bf16.mxu0 %v12746_v27  ;;  %7292 = vmatprep.mubr.bf16.mxu1 %v12746_v27 }
 0x904   :  { %7222 = vmatpush1.bf16.msra.mxu0 %v11979_v22  ;;  %7263 = vmatpush1.bf16.msra.mxu1 %v11981_v31  ;;  %v13101_v22 = vld [vmem:[#allocation54_spill] sm:$0xff]  ;;  %v13102_v31 = vld [vmem:[#allocation55_spill] sm:$0xff] }
 0x905   :  { %7223 = vmatprep.subr.bf16.mxu0 %v11985_v10  ;;  %7264 = vmatprep.subr.bf16.mxu1 %v11987_v54  ;;  %v13103_v10 = vld [vmem:[#allocation56_spill] sm:$0xff]  ;;  %v13104_v54 = vld [vmem:[#allocation57_spill] sm:$0xff] }
 0x908   :  { %7224 = vmatpush1.bf16.msra.mxu0 %v11993_v55  ;;  %7265 = vmatpush1.bf16.msra.mxu1 %v11995_v56  ;;  %v13105_v55 = vld [vmem:[#allocation58_spill] sm:$0xff]  ;;  %v13106_v56 = vld [vmem:[#allocation59_spill] sm:$0xff] }
 0x909   :  { %7225 = vmatprep.subr.bf16.mxu0 %v11999_v57  ;;  %7266 = vmatprep.subr.bf16.mxu1 %v12001_v58  ;;  %v13107_v57 = vld [vmem:[#allocation60_spill] sm:$0xff]  ;;  %v13108_v58 = vld [vmem:[#allocation62_spill] sm:$0xff] }
 0x90c   :  { %7226 = vmatpush1.bf16.msra.mxu0 %v12005_v61  ;;  %7267 = vmatpush1.bf16.msra.mxu1 %v12007_v1  ;;  %v13109_v61 = vld [vmem:[#allocation64_spill] sm:$0xff]  ;;  %v13110_v1 = vld [vmem:[#allocation86_spill] sm:$0xff] }
 0x90d   :  { %7227 = vmatprep.subr.bf16.mxu0 %v12011_v2  ;;  %7268 = vmatprep.subr.bf16.mxu1 %v12013_v3  ;;  %v13111_v2 = vld [vmem:[#allocation87_spill] sm:$0xff]  ;;  %v13112_v3 = vld [vmem:[#allocation88_spill] sm:$0xff] }
 0x910   :  { %7228 = vmatpush1.bf16.msra.mxu0 %v12017_v4  ;;  %7269 = vmatpush1.bf16.msra.mxu1 %v12019_v25  ;;  %v13113_v4 = vld [vmem:[#allocation89_spill] sm:$0xff]  ;;  %v13114_v25 = vld [vmem:[#allocation63_spill] sm:$0xff] }
 0x911   :  { %7229 = vmatprep.subr.bf16.mxu0 %v12023_v34  ;;  %7270 = vmatprep.subr.bf16.mxu1 %v12025_v8  ;;  %v13115_v34 = vld [vmem:[#allocation65_spill] sm:$0xff]  ;;  %v13116_v8 = vld [vmem:[#allocation66_spill] sm:$0xff] }
 0x914   :  { %7230 = vmatpush1.bf16.msra.mxu0 %v12029_v53  ;;  %7271 = vmatpush1.bf16.msra.mxu1 %v12031_v11  ;;  %v13117_v53 = vld [vmem:[#allocation67_spill] sm:$0xff]  ;;  %v13118_v11 = vld [vmem:[#allocation68_spill] sm:$0xff] }
 0x915   :  { %7231 = vmatprep.subr.bf16.mxu0 %v12035_v18  ;;  %7272 = vmatprep.subr.bf16.mxu1 %v12037_v5  ;;  %v13119_v18 = vld [vmem:[#allocation69_spill] sm:$0xff]  ;;  %v13120_v5 = vld [vmem:[#allocation70_spill] sm:$0xff] }
 0x918   :  { %7232 = vmatpush1.bf16.msra.mxu0 %v12041_v46  ;;  %7273 = vmatpush1.bf16.msra.mxu1 %v12043_v19  ;;  %v13121_v46 = vld [vmem:[#allocation71_spill] sm:$0xff]  ;;  %v13122_v19 = vld [vmem:[#allocation72_spill] sm:$0xff] }
 0x919   :  { %7233 = vmatprep.subr.bf16.mxu0 %v12047_v33  ;;  %7274 = vmatprep.subr.bf16.mxu1 %v12049_v29  ;;  %v13123_v33 = vld [vmem:[#allocation78_spill] sm:$0xff]  ;;  %v13124_v29 = vld [vmem:[#allocation79_spill] sm:$0xff] }
 0x91c   :  { %7234 = vmatpush1.bf16.msra.mxu0 %v12053_v43  ;;  %7275 = vmatpush1.bf16.msra.mxu1 %v12055_v45  ;;  %v13125_v43 = vld [vmem:[#allocation80_spill] sm:$0xff] }
 0x91d   :  { %7555 = vmatprep.subr.bf16.mxu0 %v12065_v23  ;;  %7596 = vmatprep.subr.bf16.mxu1 %v12067_v42 }
 0x91f   :  { %7252 = vmatmul.mubr.bf16.vlgmr.msra.gmra.mrb[96].mxu0 %v6440_v15  ;;  %7293 = vmatmul.mubr.bf16.vlgmr.msra.gmra.mrb[104].mxu1 %v6440_v15 }
 0x920   :  { %7556 = vmatpush1.bf16.msra.mxu0 %v12069_v24  ;;  %7597 = vmatpush1.bf16.msra.mxu1 %v13095_v48 }
 0x921   :  { %7557 = vmatprep.subr.bf16.mxu0 %v13096_v51  ;;  %7598 = vmatprep.subr.bf16.mxu1 %v13097_v35 }
 0x922   :  { %7587 = vmatprep.mubr.bf16.mxu0 %v12746_v27  ;;  %7628 = vmatprep.mubr.bf16.mxu1 %v12746_v27 }
 0x924   :  { %7558 = vmatpush1.bf16.msra.mxu0 %v13098_v60  ;;  %7599 = vmatpush1.bf16.msra.mxu1 %v13099_v44 }
 0x925   :  { %7559 = vmatprep.subr.bf16.mxu0 %v13100_v9  ;;  %7600 = vmatprep.subr.bf16.mxu1 %v13101_v22 }
 0x928   :  { %7560 = vmatpush1.bf16.msra.mxu0 %v13102_v31  ;;  %7601 = vmatpush1.bf16.msra.mxu1 %v13103_v10 }
 0x929   :  { %7561 = vmatprep.subr.bf16.mxu0 %v13104_v54  ;;  %7602 = vmatprep.subr.bf16.mxu1 %v13105_v55  ;;  %v12352_v55 = vld [vmem:[%s12514_s8] sm:$0xff] }
 0x92c   :  { %7562 = vmatpush1.bf16.msra.mxu0 %v13106_v56  ;;  %7603 = vmatpush1.bf16.msra.mxu1 %v13107_v57 }
 0x92d   :  { %7563 = vmatprep.subr.bf16.mxu0 %v13108_v58  ;;  %7604 = vmatprep.subr.bf16.mxu1 %v13109_v61  ;;  %v12358_v61 = vld [vmem:[%s12514_s8 + $0x8] sm:$0xff] }
 0x930   :  { %7564 = vmatpush1.bf16.msra.mxu0 %v13110_v1  ;;  %7605 = vmatpush1.bf16.msra.mxu1 %v13111_v2 }
 0x931   :  { %7565 = vmatprep.subr.bf16.mxu0 %v13112_v3  ;;  %7606 = vmatprep.subr.bf16.mxu1 %v13113_v4  ;;  %v12364_v4 = vld [vmem:[%s12514_s8 + $0x18] sm:$0xff] }
 0x934   :  { %7566 = vmatpush1.bf16.msra.mxu0 %v13114_v25  ;;  %7607 = vmatpush1.bf16.msra.mxu1 %v13115_v34 }
 0x935   :  { %7567 = vmatprep.subr.bf16.mxu0 %v13116_v8  ;;  %7608 = vmatprep.subr.bf16.mxu1 %v13117_v53  ;;  %v12370_v8 = vld [vmem:[%s12514_s8 + $0x10] sm:$0xff] }
 0x938   :  { %7568 = vmatpush1.bf16.msra.mxu0 %v13118_v11  ;;  %7609 = vmatpush1.bf16.msra.mxu1 %v13119_v18 }
 0x939   :  { %7569 = vmatprep.subr.bf16.mxu0 %v13120_v5  ;;  %7610 = vmatprep.subr.bf16.mxu1 %v13121_v46 }
 0x93c   :  { %7570 = vmatpush1.bf16.msra.mxu0 %v13122_v19  ;;  %7611 = vmatpush1.bf16.msra.mxu1 %v13123_v33 }
 0x93d   :  { %7797 = vmatprep.subr.bf16.mxu0 %v13124_v29  ;;  %7838 = vmatprep.subr.bf16.mxu1 %v13125_v43 }
 0x9b2   :  { %v6700_v45 = vpop.f32.mrb[88].mxu0  ;;  %v6741_v23 = vpop.f32.mrb[96].mxu1 }
 0x9b3   :  { %v6702_v42 = vpop.f32.mrb[89].mxu0  ;;  %v6743_v24 = vpop.f32.mrb[97].mxu1 }
 0x9b4   :  { %v6704_v26 = vpop.f32.mrb[90].mxu0  ;;  %v6745_v30 = vpop.f32.mrb[98].mxu1 }
 0x9b5   :  { %v6705_v12 = vpop.f32.mrb[91].mxu0  ;;  %v6746_v15 = vpop.f32.mrb[99].mxu1  ;;  %v13126_v30 = vld [vmem:[#allocation98_spill] sm:$0xff] }
 0x9b6   :  { %v13127_v15 = vld [vmem:[#allocation99_spill] sm:$0xff] }
 0x9d2   :  { %v6942_v48 = vpop.f32.mrb[92].mxu0  ;;  %v6983_v51 = vpop.f32.mrb[100].mxu1 }
 0x9d3   :  { %v6943_v35 = vadd.f32 %v6942_v48, %v6700_v45  ;;  %v6984_v60 = vadd.f32 %v6983_v51, %v6741_v23  ;;  %v6944_v44 = vpop.f32.mrb[93].mxu0  ;;  %v6985_v9 = vpop.f32.mrb[101].mxu1 }
 0x9d4   :  { %v6945_v22 = vadd.f32 %v6944_v44, %v6702_v42  ;;  %v6986_v31 = vadd.f32 %v6985_v9, %v6743_v24  ;;  %v6946_v10 = vpop.f32.mrb[94].mxu0  ;;  %v6987_v54 = vpop.f32.mrb[102].mxu1  ;;  %v13128_v44 = vld [vmem:[#allocation100_spill] sm:$0xff] }
 0x9d5   :  { %v6990_v56 = vadd.f32 %v12352_v55, %v6943_v35  ;;  %v6947_v57 = vpop.f32.mrb[95].mxu0  ;;  %v6988_v58 = vpop.f32.mrb[103].mxu1  ;;  %v6992_v53 = vadd.f32 %v12370_v8, %v6984_v60 }
 0x9d6   :  { %v6991_v1 = vadd.f32 %v12358_v61, %v6945_v22  ;;  %v6993_v25 = vadd.f32 %v12364_v4, %v6986_v31  ;;  %v13129_v22 = vld [vmem:[#allocation101_spill] sm:$0xff] }
 0x9d7   :  { %v9006_v2 = vmul.f32 -1.442695, %v6990_v56 }
 0x9d8   :  { %v9007_v3 = vmul.f32 -1.442695, %v6991_v1  ;;  %v9008_v34 = vmul.f32 -1.442695, %v6993_v25 }
 0x9d9   :  { %10047 = vpow2.f32 %v9006_v2 }
 0x9da   :  { %10049 = vpow2.f32 %v9007_v3 }
 0x9db   :  { %10051 = vpow2.f32 %v9008_v34 }
 0x9dc   :  { %10053 = vtanh.f32 %v6992_v53 }
 0x9e3   :  { %v10048_v11 = vpop.eup %10047 }
 0x9e4   :  { %v10050_v18 = vpop.eup %10049  ;;  %v6997_v5 = vadd.f32 1.0, %v10048_v11 }
 0x9e5   :  { %v7003_v46 = vadd.f32 1.0, %v10050_v18  ;;  %v10052_v19 = vpop.eup %10051 }
 0x9e6   :  { %10055 = vrcp.f32 %v6997_v5  ;;  %v10054_v33 = vpop.eup %10053  ;;  %v7010_v23 = vadd.f32 1.0, %v10052_v19 }
 0x9e7   :  { %10057 = vrcp.f32 %v7003_v46 }
 0x9e8   :  { %10059 = vrcp.f32 %v7010_v23  ;;  %v9824_v23 = vld [vmem:[#allocation12 + $0x30] ss:$8 sps:$4 sm:$0xff]  }
 0x9f0   :  { %v10056_v29 = vpop.eup %10055 }
 0x9f1   :  { %v10058_v43 = vpop.eup %10057  ;;  %v7014_v45 = vmul.f32 %v10056_v29, %v10054_v33  ;;  %v9817_v33 = vld [vmem:[#allocation12 + $0x4] ss:$8 sps:$4 sm:$0xff]  }
 0x9f2   :  { %v7013_v42 = vmul.f32 %v10058_v43, %v12174_v47  ;;  %v7253_v24 = vpop.f32.mrb[96].mxu0  ;;  %v7294_v26 = vpop.f32.mrb[104].mxu1  ;;  %v9815_v43 = vld [vmem:[#allocation12] ss:$8 sps:$4 sm:$0xff]  }
 0x9f3   :  { %v7301_v12 = vadd.f32 %v7253_v24, %v13126_v30  ;;  %v7303_v48 = vadd.f32 %v7294_v26, %v13127_v15  ;;  %v7255_v51 = vpop.f32.mrb[97].mxu0  ;;  %v7296_v35 = vpop.f32.mrb[105].mxu1  ;;  %v9830_v24 = vld [vmem:[#allocation12 + $0x50] ss:$8 sps:$4 sm:$0xff]   ;;  %v9835_v26 = vld [vmem:[#allocation12 + $0x64] ss:$8 sps:$4 sm:$0xff]  }
 0x9f4   :  { %v12376_v60 = vadd.f32 %v7014_v45, %v7013_v42  ;;  %v7302_v9 = vadd.f32 %v7255_v51, %v13128_v44  ;;  %v7304_v31 = vadd.f32 %v7296_v35, %v13129_v22  ;;  %v7257_v10 = vpop.f32.mrb[98].mxu0  ;;  %v7298_v54 = vpop.f32.mrb[106].mxu1  ;;  %v9820_v45 = vld [vmem:[#allocation12 + $0x14] ss:$8 sps:$4 sm:$0xff]   ;;  %v9833_v30 = vld [vmem:[#allocation12 + $0x60] ss:$8 sps:$4 sm:$0xff]  }
 0x9f5   :  { %v9041_v56 = vmul.f32 -1.442695, %v7301_v12  ;;  %v7258_v57 = vpop.f32.mrb[99].mxu0  ;;  %v7299_v47 = vpop.f32.mrb[107].mxu1  ;;  %v9832_v42 = vld [vmem:[#allocation12 + $0x54] ss:$8 sps:$4 sm:$0xff]  }
 0x9f6   :  { %v9042_v58 = vmul.f32 -1.442695, %v7302_v9  ;;  %10061 = vtanh.f32 %v12376_v60  ;;  %v9043_v1 = vmul.f32 -1.442695, %v7304_v31  ;;  %v10060_v2 = vpop.eup %10059  ;;  %v9838_v12 = vld [vmem:[#allocation12 + $0x74] ss:$8 sps:$4 sm:$0xff]  }
 0x9f7   :  { %10063 = vpow2.f32 %v9041_v56  ;;  %v9836_v15 = vld [vmem:[#allocation12 + $0x70] ss:$8 sps:$4 sm:$0xff]   ;;  %v13139_v51 = vld [vmem:[#allocation50_spill] sm:$0xff] }
 0x9f8   :  { %10065 = vpow2.f32 %v9042_v58  ;;  %v13140_v44 = vld [vmem:[#allocation61_spill] sm:$0xff]  ;;  %v13142_v31 = vld [vmem:[#allocation82_spill] sm:$0xff] }
 0x9f9   :  { %10067 = vpow2.f32 %v9043_v1  ;;  %v13141_v9 = vld [vmem:[#allocation41_spill] sm:$0xff] }
 0x9fa   :  { %10069 = vtanh.f32 %v7303_v48  ;;  %v13138_v48 = vld [vmem:[#allocation23_spill] sm:$0xff]  ;;  %v7918_v22 = vpack.c.bf16 %v13141_v9, %v13140_v44  ;;  %v13143_v10 = vld [vmem:[#allocation81_spill] sm:$0xff] }
 0x9fb   :  { %v7917_v35 = vpack.c.bf16 %v13139_v51, %v13138_v48  ;;  %v7919_v54 = vpack.c.bf16 %v13143_v10, %v13142_v31 }
 0xa00   :  { %v10062_v3 = vpop.eup %10061 }
 0xa01   :  { %v10064_v25 = vpop.eup %10063  ;;  %v12381_v34 = vmul.f32 %v10062_v3, %v10060_v2 }
 0xa02   :  { %v10066_v53 = vpop.eup %10065  ;;  %v7308_v11 = vadd.f32 1.0, %v10064_v25 }
 0xa03   :  { %v7314_v18 = vadd.f32 1.0, %v10066_v53  ;;  %v7362_v5 = vpack.c.bf16 %v12381_v34, %v12381_v34  ;;  %v10068_v46 = vpop.eup %10067 }
 0xa04   :  { %10071 = vrcp.f32 %v7308_v11 }
 0xa05   :  { %10073 = vrcp.f32 %v7314_v18  ;;  %7588 = vmatmul.mubr.bf16.vlgmr.msra.gmra.mrb[100].mxu0 %v7362_v5  ;;  %7629 = vmatmul.mubr.bf16.vlgmr.msra.gmra.mrb[108].mxu1 %v7362_v5 }
 0xa06   :  { %7798 = vmatpush1.bf16.msra.mxu0 %v12181_v17  ;;  %7839 = vmatpush1.bf16.msra.mxu1 %v12183_v32  ;;  %v10070_v17 = vpop.eup %10069 }
 0xa07   :  { %7799 = vmatprep.subr.bf16.mxu0 %v12187_v21  ;;  %7840 = vmatprep.subr.bf16.mxu1 %v12189_v28  ;;  %v7321_v28 = vadd.f32 1.0, %v10068_v46 }
 0xa08   :  { %7829 = vmatprep.mubr.bf16.mxu0 %v12746_v27  ;;  %7870 = vmatprep.mubr.bf16.mxu1 %v12746_v27 }
 0xa09   :  { %10075 = vrcp.f32 %v7321_v28 }
 0xa0a   :  { %7800 = vmatpush1.bf16.msra.mxu0 %v12193_v41  ;;  %7841 = vmatpush1.bf16.msra.mxu1 %v12195_v40 }
 0xa0b   :  { %7801 = vmatprep.subr.bf16.mxu0 %v12199_v20  ;;  %7842 = vmatprep.subr.bf16.mxu1 %v12201_v52  ;;  %v13130_v20 = vld [vmem:[#allocation22_spill] sm:$0xff]  ;;  %v13131_v52 = vld [vmem:[#allocation24_spill] sm:$0xff] }
 0xa0e   :  { %v10072_v19 = vpop.eup %10071  ;;  %7802 = vmatpush1.bf16.msra.mxu0 %v12207_v13  ;;  %7843 = vmatpush1.bf16.msra.mxu1 %v12209_v49  ;;  %v13132_v13 = vld [vmem:[#allocation25_spill] sm:$0xff]  ;;  %v13133_v49 = vld [vmem:[#allocation27_spill] sm:$0xff] }
 0xa0f   :  { %v10074_v32 = vpop.eup %10073  ;;  %v7325_v21 = vmul.f32 %v10072_v19, %v10070_v17  ;;  %7803 = vmatprep.subr.bf16.mxu0 %v12213_v59  ;;  %7844 = vmatprep.subr.bf16.mxu1 %v12215_v39  ;;  %v13134_v59 = vld [vmem:[#allocation26_spill] sm:$0xff]  ;;  %v13135_v39 = vld [vmem:[#allocation28_spill] sm:$0xff] }
 0xa10   :  { %v7324_v41 = vmul.f32 %v10074_v32, %v12230_v38 }
 0xa12   :  { %v7326_v40 = vadd.f32 %v7325_v21, %v7324_v41  ;;  %7804 = vmatpush1.bf16.msra.mxu0 %v12219_v62  ;;  %7845 = vmatpush1.bf16.msra.mxu1 %v12221_v14  ;;  %v13136_v62 = vld [vmem:[#allocation29_spill] sm:$0xff]  ;;  %v13137_v14 = vld [vmem:[#allocation31_spill] sm:$0xff] }
 0xa13   :  { %7805 = vmatprep.subr.bf16.mxu0 %v12225_v0  ;;  %7846 = vmatprep.subr.bf16.mxu1 %v12227_v6  ;;  %v10076_v0 = vpop.eup %10075 }
 0xa14   :  { %10077 = vtanh.f32 %v7326_v40  ;;  %8121 = vst [vmem:[#allocation16] sm:$0xff] %v7326_v40 }
 0xa16   :  { %7806 = vmatpush1.bf16.msra.mxu0 %v13130_v20  ;;  %7847 = vmatpush1.bf16.msra.mxu1 %v13131_v52 }
 0xa17   :  { %7807 = vmatprep.subr.bf16.mxu0 %v13132_v13  ;;  %7848 = vmatprep.subr.bf16.mxu1 %v13133_v49 }
 0xa1a   :  { %7808 = vmatpush1.bf16.msra.mxu0 %v13134_v59  ;;  %7849 = vmatpush1.bf16.msra.mxu1 %v13135_v39 }
 0xa1b   :  { %7809 = vmatprep.subr.bf16.mxu0 %v13136_v62  ;;  %7850 = vmatprep.subr.bf16.mxu1 %v13137_v14 }
 0xa1e   :  { %v10078_v6 = vpop.eup %10077  ;;  %7810 = vmatpush1.bf16.msra.mxu0 %v12259_v63  ;;  %7851 = vmatpush1.bf16.msra.mxu1 %v12261_v37  ;;  %v9818_v63 = vld [vmem:[#allocation12 + $0x10] ss:$8 sps:$4 sm:$0xff]   ;;  %v9823_v37 = vld [vmem:[#allocation12 + $0x24] ss:$8 sps:$4 sm:$0xff]  }
 0xa1f   :  { %7811 = vmatprep.subr.bf16.mxu0 %v12265_v36  ;;  %7852 = vmatprep.subr.bf16.mxu1 %v12267_v16  ;;  %v7328_v38 = vmul.f32 %v10078_v6, %v10076_v0  ;;  %v9821_v36 = vld [vmem:[#allocation12 + $0x20] ss:$8 sps:$4 sm:$0xff]   ;;  %v9826_v16 = vld [vmem:[#allocation12 + $0x34] ss:$8 sps:$4 sm:$0xff]  }
 0xa21   :  { %v7329_v29 = vpack.c.bf16 %v7328_v38, %v7328_v38  ;;  %8118 = vst [vmem:[#allocation14] sm:$0xff] %v7328_v38 }
 0xa22   :  { %7812 = vmatpush1.bf16.msra.mxu0 %v12271_v50  ;;  %7853 = vmatpush1.bf16.msra.mxu1 %v12273_v7  ;;  %v9829_v50 = vld [vmem:[#allocation12 + $0x44] ss:$8 sps:$4 sm:$0xff]   ;;  %v9827_v7 = vld [vmem:[#allocation12 + $0x40] ss:$8 sps:$4 sm:$0xff]  }
 0xa23   :  { %8029 = vmatprep.subr.bf16.mxu0 %v9817_v33  ;;  %v13144_v33 = vld [vmem:[#allocation73_spill] sm:$0xff] }
 0xa25   :  { %7830 = vmatmul.mubr.bf16.vlgmr.msra.gmra.mrb[104].mxu0 %v7329_v29  ;;  %7871 = vmatmul.mubr.bf16.vlgmr.msra.gmra.mrb[112].mxu1 %v7329_v29  ;;  %v13145_v29 = vsub.s32 0, %v13144_v33 }
 0xa26   :  { %8030 = vmatpush1.bf16.msra.mxu0 %v9815_v43  ;;  %8061 = vmatprep.mubr.bf16.mxu0 %v12746_v27 }
 0xa27   :  { %8031 = vmatprep.subr.bf16.mxu0 %v9820_v45 }
 0xa2a   :  { %8032 = vmatpush1.bf16.msra.mxu0 %v9818_v63 }
 0xa2b   :  { %8033 = vmatprep.subr.bf16.mxu0 %v9823_v37 }
 0xa2e   :  { %8034 = vmatpush1.bf16.msra.mxu0 %v9821_v36 }
 0xa2f   :  { %8035 = vmatprep.subr.bf16.mxu0 %v9826_v16 }
 0xa32   :  { %8036 = vmatpush1.bf16.msra.mxu0 %v9824_v23 }
 0xa33   :  { %8037 = vmatprep.subr.bf16.mxu0 %v9829_v50 }
 0xa36   :  { %8038 = vmatpush1.bf16.msra.mxu0 %v9827_v7 }
 0xa37   :  { %8039 = vmatprep.subr.bf16.mxu0 %v9832_v42 }
 0xa3a   :  { %8040 = vmatpush1.bf16.msra.mxu0 %v9830_v24 }
 0xa3b   :  { %8041 = vmatprep.subr.bf16.mxu0 %v9835_v26 }
 0xa3e   :  { %8042 = vmatpush1.bf16.msra.mxu0 %v9833_v30 }
 0xa3f   :  { %8043 = vmatprep.subr.bf16.mxu0 %v9838_v12 }
 0xa42   :  { %8044 = vmatpush1.bf16.msra.mxu0 %v9836_v15 }
 0xa45   :  { %8062 = vmatmul.mubr.bf16.vlgmr.msra.gmra.mrb[108].mxu0 %v7917_v35 }
 0xa46   :  { %8071 = vmatprep.mubr.bf16.mxu0 %v12746_v27 }
 0xa4d   :  { %8072 = vmatmul.mubr.bf16.gmra.mrb[112].mxu0 %v7918_v22 }
 0xa4e   :  { %8081 = vmatprep.mubr.bf16.mxu0 %v12746_v27 }
 0xa55   :  { %8082 = vmatmul.mubr.bf16.gmra.mrb[116].mxu0 %v7919_v54 }
 0xa56   :  { %8091 = vmatprep.mubr.bf16.mxu0 %v12746_v27 }
 0xad8   :  { %v7589_v56 = vpop.f32.mrb[100].mxu0  ;;  %v7630_v57 = vpop.f32.mrb[108].mxu1 }
 0xad9   :  { %v7591_v47 = vpop.f32.mrb[101].mxu0  ;;  %v7632_v58 = vpop.f32.mrb[109].mxu1 }
 0xada   :  { %v7593_v1 = vpop.f32.mrb[102].mxu0  ;;  %v7634_v2 = vpop.f32.mrb[110].mxu1 }
 0xadb   :  { %v7594_v3 = vpop.f32.mrb[103].mxu0  ;;  %v7635_v25 = vpop.f32.mrb[111].mxu1 }
 0xaf8   :  { %v7831_v53 = vpop.f32.mrb[104].mxu0  ;;  %v7872_v11 = vpop.f32.mrb[112].mxu1 }
 0xaf9   :  { %v7832_v18 = vadd.f32 %v7831_v53, %v7589_v56  ;;  %v7873_v5 = vadd.f32 %v7872_v11, %v7630_v57  ;;  %v7833_v46 = vpop.f32.mrb[105].mxu0  ;;  %v7874_v17 = vpop.f32.mrb[113].mxu1 }
 0xafa   :  { %v7834_v19 = vadd.f32 %v7833_v46, %v7591_v47  ;;  %v7875_v32 = vadd.f32 %v7874_v17, %v7632_v58  ;;  %v7835_v21 = vpop.f32.mrb[106].mxu0  ;;  %v7876_v28 = vpop.f32.mrb[114].mxu1 }
 0xafb   :  { %v7879_v27 = vadd.f32 %v12352_v55, %v7832_v18  ;;  %v7836_v41 = vpop.f32.mrb[107].mxu0  ;;  %v7877_v40 = vpop.f32.mrb[115].mxu1  ;;  %v7881_v39 = vadd.f32 %v12370_v8, %v7873_v5  ;;  %v7937_v55 = vld [vmem:[%s12516_s10] sm:$0x3]  ;;  %v13146_v8 = vsub.s32 1, %v13144_v33  ;;  %s10305_s10 = smov [#allocation14]  }
 0xafc   :  { %v7880_v20 = vadd.f32 %v12358_v61, %v7834_v19  ;;  %v7882_v49 = vadd.f32 %v12364_v4, %v7875_v32  ;;  %v12437_v4 = vrot.slane %v7937_v55, %v13145_v29  ;;  %s8141_s30 = sshll.u32 %s10305_s10, 4  ;;  %s8142_s30 = int_to_ptr.vmem [resolvable:$true] %s8141_s30 }
 0xafd   :  { %v9108_v52 = vmul.f32 -1.442695, %v7879_v27  ;;  %v12441_v45 = vrot.slane %v7937_v55, %v13146_v8  ;;  %s10218_s14 = scalar_lea.vmem %s8142_s30, 256  ;;  %p10223_p13 = scmp.lt.s32.totalorder %s8142_s30, %s8142_s30 }
 0xafe   :  { %v9109_v13 = vmul.f32 -1.442695, %v7880_v20  ;;  %v9110_v59 = vmul.f32 -1.442695, %v7882_v49  ;;  %p10219_p12 = scmp.ne.s32.totalorder %s8142_s30, %s10218_s14  ;;  %p10224_p0 = scmp.lt.s32.totalorder %s10218_s14, %s10218_s14 }
 0xaff   :  { %10079 = vpow2.f32 %v9108_v52 }
 0xb00   :  { %10081 = vpow2.f32 %v9109_v13  ;;  %p10225_p1 = por %p10224_p0, %p10223_p13 }
 0xb01   :  { %10083 = vpow2.f32 %v9110_v59 }
 0xb02   :  { %10085 = vtanh.f32 %v7881_v39  ;;  %p10226_p2 = pnand %p10225_p1, %p10219_p12 }
 0xb09   :  { %v10080_v62 = vpop.eup %10079 }
 0xb0a   :  { %v10082_v14 = vpop.eup %10081  ;;  %v7886_v0 = vadd.f32 1.0, %v10080_v62 }
 0xb0b   :  { %v7892_v6 = vadd.f32 1.0, %v10082_v14  ;;  %v10084_v61 = vpop.eup %10083 }
 0xb0c   :  { %10087 = vrcp.f32 %v7886_v0  ;;  %v10086_v38 = vpop.eup %10085  ;;  %v7899_v36 = vadd.f32 1.0, %v10084_v61 }
 0xb0d   :  { %10089 = vrcp.f32 %v7892_v6 }
 0xb0e   :  { %10091 = vrcp.f32 %v7899_v36 }
 0xb16   :  { %v10088_v43 = vpop.eup %10087 }
 0xb17   :  { %v10090_v63 = vpop.eup %10089  ;;  %v7903_v37 = vmul.f32 %v10088_v43, %v10086_v38 }
 0xb18   :  { %v7902_v16 = vmul.f32 %v10090_v63, %v12376_v60  ;;  %v8063_v23 = vpop.f32.mrb[108].mxu0  ;;  %v10092_v10 = vpop.eup %10091 }
 0xb19   :  { %v8064_v50 = vadd.f32 %v8063_v23, %v12437_v4  ;;  %v8065_v7 = vpop.f32.mrb[109].mxu0 }
 0xb1a   :  { %v8066_v42 = vadd.f32 %v8065_v7, %v12441_v45  ;;  %v8067_v24 = vpop.f32.mrb[110].mxu0  ;;  %v7904_v26 = vadd.f32 %v7903_v37, %v7902_v16 }
 0xb1b   :  { %8102 = vst [vmem:[#allocation13] sm:$0xff] %v8064_v50  ;;  %v8068_v30 = vadd.f32 %v8067_v24, %v12437_v4  ;;  %v8069_v12 = vpop.f32.mrb[111].mxu0 }
 0xb1c   :  { %8103 = vst [vmem:[#allocation13 + $0x8] sm:$0xff] %v8066_v42  ;;  %v8070_v15 = vadd.f32 %v8069_v12, %v12441_v45  ;;  %10093 = vtanh.f32 %v7904_v26  ;;  %8123 = vst [vmem:[#allocation16 + $0x8] sm:$0xff] %v7904_v26 }
 0xb1d   :  { %8104 = vst [vmem:[#allocation13 + $0x10] sm:$0xff] %v8068_v30 }
 0xb1e   :  { %8105 = vst [vmem:[#allocation13 + $0x18] sm:$0xff] %v8070_v15 }
 0xb20   :  { %v8073_v60 = vpop.f32.mrb[112].mxu0 }
 0xb21   :  { %v8074_v48 = vadd.f32 %v8073_v60, %v12437_v4  ;;  %v8075_v51 = vpop.f32.mrb[113].mxu0 }
 0xb22   :  { %v8076_v35 = vadd.f32 %v8075_v51, %v12441_v45  ;;  %v8077_v44 = vpop.f32.mrb[114].mxu0 }
 0xb23   :  { %8106 = vst [vmem:[#allocation13 + $0x20] sm:$0xff] %v8074_v48  ;;  %v8078_v9 = vadd.f32 %v8077_v44, %v12437_v4  ;;  %v8079_v22 = vpop.f32.mrb[115].mxu0 }
 0xb24   :  { %8107 = vst [vmem:[#allocation13 + $0x28] sm:$0xff] %v8076_v35  ;;  %v8080_v31 = vadd.f32 %v8079_v22, %v12441_v45 }
 0xb25   :  { %8108 = vst [vmem:[#allocation13 + $0x30] sm:$0xff] %v8078_v9 }
 0xb26   :  { %v10094_v54 = vpop.eup %10093  ;;  %8109 = vst [vmem:[#allocation13 + $0x38] sm:$0xff] %v8080_v31 }
 0xb27   :  { %v7906_v56 = vmul.f32 %v10094_v54, %v10092_v10 }
 0xb28   :  { %v8083_v57 = vpop.f32.mrb[116].mxu0 }
 0xb29   :  { %v8084_v47 = vadd.f32 %v8083_v57, %v12437_v4  ;;  %v8085_v58 = vpop.f32.mrb[117].mxu0  ;;  %v7920_v1 = vpack.c.bf16 %v7906_v56, %v12381_v34  ;;  %8120 = vst [vmem:[#allocation14 + $0x8] sm:$0xff] %v7906_v56 }
 0xb2a   :  { %v8086_v2 = vadd.f32 %v8085_v58, %v12441_v45  ;;  %v8087_v3 = vpop.f32.mrb[118].mxu0 }
 0xb2b   :  { %8110 = vst [vmem:[#allocation13 + $0x40] sm:$0xff] %v8084_v47  ;;  %v8088_v25 = vadd.f32 %v8087_v3, %v12437_v4  ;;  %v8089_v53 = vpop.f32.mrb[119].mxu0  ;;  %8092 = vmatmul.mubr.bf16.gmra.mrb[120].mxu0 %v7920_v1 }
 0xb2c   :  { %8111 = vst [vmem:[#allocation13 + $0x48] sm:$0xff] %v8086_v2  ;;  %v8090_v11 = vadd.f32 %v8089_v53, %v12441_v45 }
 0xb2d   :  { %8112 = vst [vmem:[#allocation13 + $0x50] sm:$0xff] %v8088_v25 }
 0xb2e   :  { %8113 = vst [vmem:[#allocation13 + $0x58] sm:$0xff] %v8090_v11 }
 0xb2f   :  { %10229 = shalt.err (!%p10226_p2)
}
 0xb30   :  { %s10230_s15 = scalar_lea.hbm %s12518_s12, 256 }
 0xb31   :  { %p10231_p3 = scmp.ne.s32.totalorder %s12518_s12, %s10230_s15  ;;  %p10234_p4 = scmp.lt.u32.totalorder %s10230_s15, %s12518_s12 }
 0xb33   :  { %p10236_p5 = pnand %p10234_p4, %p10231_p3 }
 0xb35   :  { %10239 = shalt.err (!%p10236_p5)
}
 0xb36   :  { %8147 = dma.vmem_to_hbm [thread:$0]  %s8142_s30, 256, %s12518_s12, [#allocation15], %s10301_s6, %s10301_s6, %s10302_s22  }
 0xb37   :  { %s10306_s19 = smov [#allocation16]  }
 0xb38   :  { %s8153_s23 = sshll.u32 %s10306_s19, 4  ;;  %s8154_s23 = int_to_ptr.vmem [resolvable:$true] %s8153_s23 }
 0xb39   :  { %s10240_s1 = scalar_lea.vmem %s8154_s23, 256  ;;  %p10245_p7 = scmp.lt.s32.totalorder %s8154_s23, %s8154_s23 }
 0xb3a   :  { %p10241_p6 = scmp.ne.s32.totalorder %s8154_s23, %s10240_s1  ;;  %p10246_p8 = scmp.lt.s32.totalorder %s10240_s1, %s10240_s1 }
 0xb3c   :  { %p10247_p9 = por %p10246_p8, %p10245_p7 }
 0xb3e   :  { %p10248_p10 = pnand %p10247_p9, %p10241_p6 }
 0xb40   :  { %10251 = shalt.err (!%p10248_p10)
}
 0xb41   :  { %s10252_s25 = scalar_lea.hbm %s12519_s13, 256 }
 0xb42   :  { %p10253_p11 = scmp.ne.s32.totalorder %s12519_s13, %s10252_s25  ;;  %p10256_p12 = scmp.lt.u32.totalorder %s10252_s25, %s12519_s13 }
 0xb44   :  { %p10258_p13 = pnand %p10256_p12, %p10253_p11 }
 0xb46   :  { %10261 = shalt.err (!%p10258_p13)
}
 0xb47   :  { %8159 = dma.vmem_to_hbm [thread:$0]  %s8154_s23, 256, %s12519_s13, [#allocation15], %s10301_s6, %s10301_s6, %s10302_s22  }
 0xb48   :  { %s10307_s29 = smov [#allocation13]  }
 0xb49   :  { %s8129_s10 = sshll.u32 %s10307_s29, 4  ;;  %s8130_s10 = int_to_ptr.vmem [resolvable:$true] %s8129_s10 }
 0xb4a   :  { %s10262_s13 = scalar_lea.vmem %s8130_s10, 2048  ;;  %p10267_p1 = scmp.lt.s32.totalorder %s8130_s10, %s8130_s10 }
 0xb4b   :  { %p10263_p0 = scmp.ne.s32.totalorder %s8130_s10, %s10262_s13  ;;  %p10268_p2 = scmp.lt.s32.totalorder %s10262_s13, %s10262_s13 }
 0xb4d   :  { %p10269_p3 = por %p10268_p2, %p10267_p1 }
 0xb4f   :  { %p10270_p4 = pnand %p10269_p3, %p10263_p0 }
 0xbfe   :  { %v8093_v34 = vpop.f32.mrb[120].mxu0 }
 0xbff   :  { %v8094_v18 = vadd.f32 %v8093_v34, %v12437_v4  ;;  %v8095_v5 = vpop.f32.mrb[121].mxu0 }
 0xc00   :  { %v8096_v46 = vadd.f32 %v8095_v5, %v12441_v45  ;;  %v8097_v17 = vpop.f32.mrb[122].mxu0 }
 0xc01   :  { %8114 = vst [vmem:[#allocation13 + $0x60] sm:$0xff] %v8094_v18  ;;  %v8098_v19 = vadd.f32 %v8097_v17, %v12437_v4  ;;  %v8099_v32 = vpop.f32.mrb[123].mxu0 }
 0xc02   :  { %8115 = vst [vmem:[#allocation13 + $0x68] sm:$0xff] %v8096_v46  ;;  %v8100_v21 = vadd.f32 %v8099_v32, %v12441_v45 }
 0xc03   :  { %8116 = vst [vmem:[#allocation13 + $0x70] sm:$0xff] %v8098_v19 }
 0xc04   :  { %8117 = vst [vmem:[#allocation13 + $0x78] sm:$0xff] %v8100_v21 }
 0xc05   :  { %10273 = shalt.err (!%p10270_p4)
}
 0xc06   :  { %s10274_s30 = scalar_lea.hbm %s12517_s11, 2048 }
 0xc07   :  { %p10275_p5 = scmp.ne.s32.totalorder %s12517_s11, %s10274_s30  ;;  %p10278_p6 = scmp.lt.u32.totalorder %s10274_s30, %s12517_s11 }
 0xc09   :  { %p10280_p7 = pnand %p10278_p6, %p10275_p5 }
 0xc0b   :  { %10283 = shalt.err (!%p10280_p7)
}
 0xc0c   :  { %8135 = dma.vmem_to_hbm [thread:$0]  %s8130_s10, 2048, %s12517_s11, [#allocation6], %s10296_s20, %s10296_s20, %s10297_s21  }
 0xc0d   :  { %10290 = dma.done.wait [#allocation6], 2048  }
 0xc0e   :  { %10291 = vsyncadd [#allocation6], 4294965248 }
 0xc0f   :  { %10292 = dma.done.wait [#allocation15], 512  }
 0xc10   :  { %10293 = vsyncadd [#allocation15], 4294966784 }
 0xc11   :  { %8169 = vsyncpa [#allocation5], 1 }
 0xc12   :  { %8170 = vsyncpa [#allocation8], 1 }
 0xc13   :  { %8171 = vsyncpa [#allocation11], 1 }
 0xc14   :  { %8172 = vsyncpa [#allocation6], 1 }
 0xc15   :  { %8173 = vsyncpa [#allocation15], 1 }

</bundles_post_ra>
